<compile_context>
chip_gen: v6e
topology: v6e:2x2x1
jax: 0.10.0
libtpu: 0.0.40
codegen_flags: <defaults>
</compile_context>

<pallas_src>
import numpy as np
import jax
import jax.numpy as jnp
from jax import lax
from jax.experimental import pallas as pl
from jax.experimental.pallas import tpu as pltpu


def _round_up(x, m):
    return ((x + m - 1) // m) * m


def _apply_act(r, activation):
    if activation == 'leaky_relu':
        return jnp.where(r >= 0, r, 0.01 * r)
    if activation == 'sigmoid':
        return 1.0 / (1.0 + jnp.exp(-r))
    return r


# ---------------------------------------------------------------------------
# Pallas GEMM:  A(M, K) @ B(K, N)  [+ fused activation]  ->  (M, N)
# For convs:  A = weights (Cout, K), B = im2col^T (K, B*Ho*Wo), so N is the
# lane-dense axis and M (= Cout) only pads to the 8-sublane granule.
# ---------------------------------------------------------------------------
def _make_gemm_kernel_single_k(activation):
    def kernel(a_ref, b_ref, o_ref):
        r = jnp.dot(a_ref[...], b_ref[...], preferred_element_type=jnp.float32)
        o_ref[...] = _apply_act(r, activation).astype(o_ref.dtype)
    return kernel


def _make_gemm_kernel_multi_k(activation):
    def kernel(a_ref, b_ref, o_ref, acc_ref):
        k = pl.program_id(2)

        @pl.when(k == 0)
        def _init():
            acc_ref[...] = jnp.zeros_like(acc_ref)

        acc_ref[...] += jnp.dot(a_ref[...], b_ref[...],
                                preferred_element_type=jnp.float32)

        @pl.when(k == pl.num_programs(2) - 1)
        def _finalize():
            o_ref[...] = _apply_act(acc_ref[...], activation).astype(o_ref.dtype)
    return kernel


def pallas_matmul(a, b, activation=None, out_dtype=jnp.float32):
    """A(M,K) @ B(K,N); bf16 MXU inputs, f32 accumulate, fused epilogue."""
    a = jnp.asarray(a)
    b = jnp.asarray(b)
    M, K = a.shape
    K2, N = b.shape
    assert K == K2

    # --- tiles: M is the small (Cout) axis, N is lane-dense ---
    Mp = _round_up(M, 8)
    if Mp > 256:
        TM, Mp = 256, _round_up(M, 256)
    else:
        TM = Mp
    Np = _round_up(N, 128)
    if Np > 512:
        TN, Np = 512, _round_up(N, 512)
    elif Np == 512:
        TN = 256                         # >= 2 parallel N blocks (v7x megacore)
    else:
        TN = Np
    Kp = _round_up(K, 128)
    if Kp > 2048:
        TK, Kp = 512, _round_up(K, 512)
    else:
        TK = Kp
    n_k = Kp // TK

    a_p = a.astype(jnp.bfloat16)
    b_p = b.astype(jnp.bfloat16)
    if (Mp, Kp) != (M, K):
        a_p = jnp.pad(a_p, ((0, Mp - M), (0, Kp - K)))
    if (Kp, Np) != (K, N):
        b_p = jnp.pad(b_p, ((0, Kp - K), (0, Np - N)))

    out_bytes = 2 if out_dtype == jnp.bfloat16 else 4
    cost = pl.CostEstimate(
        flops=2 * M * N * K,
        transcendentals=M * N if activation == 'sigmoid' else 0,
        bytes_accessed=(M * K + K * N) * 2 + M * N * out_bytes)

    if n_k == 1:
        out = pl.pallas_call(
            _make_gemm_kernel_single_k(activation),
            out_shape=jax.ShapeDtypeStruct((Mp, Np), out_dtype),
            grid=(Mp // TM, Np // TN),
            in_specs=[pl.BlockSpec((TM, TK), lambda i, j: (i, 0)),
                      pl.BlockSpec((TK, TN), lambda i, j: (0, j))],
            out_specs=pl.BlockSpec((TM, TN), lambda i, j: (i, j)),
            compiler_params=pltpu.CompilerParams(
                dimension_semantics=("parallel", "parallel")),
            cost_estimate=cost,
        )(a_p, b_p)
    else:
        out = pl.pallas_call(
            _make_gemm_kernel_multi_k(activation),
            out_shape=jax.ShapeDtypeStruct((Mp, Np), out_dtype),
            grid=(Mp // TM, Np // TN, n_k),
            in_specs=[pl.BlockSpec((TM, TK), lambda i, j, k: (i, k)),
                      pl.BlockSpec((TK, TN), lambda i, j, k: (k, j))],
            out_specs=pl.BlockSpec((TM, TN), lambda i, j, k: (i, j)),
            scratch_shapes=[pltpu.VMEM((TM, TN), jnp.float32)],
            compiler_params=pltpu.CompilerParams(
                dimension_semantics=("parallel", "parallel", "arbitrary")),
            cost_estimate=cost,
        )(a_p, b_p)

    if (Mp, Np) != (M, N):
        out = out[:M, :N]
    return out


# ---------------------------------------------------------------------------
# Conv layers (channel-major layout: activations are (C, B, H, W))
# ---------------------------------------------------------------------------
# TODO(synk): fold im2col into the kernel K axis (Element-offset BlockSpecs
# over (kh, kw, Cin) windows) to remove the XLA-materialized column matrix.
def conv2d_cm(x, w, stride=1, padding=0, activation=None,
              out_dtype=jnp.bfloat16):
    """x: (Cin, B, H, W), w: (Cout, Cin, kh, kw)  (PyTorch Conv2d weights)."""
    C, B, H, W = x.shape
    Cout, Cin, kh, kw = w.shape
    assert C == Cin
    if padding > 0:
        x = jnp.pad(x, ((0, 0), (0, 0), (padding, padding), (padding, padding)))
        H += 2 * padding
        W += 2 * padding
    Ho = (H - kh) // stride + 1
    Wo = (W - kw) // stride + 1
    cols = []
    for i in range(kh):
        for j in range(kw):
            cols.append(x[:, :,
                          i:i + stride * (Ho - 1) + 1:stride,
                          j:j + stride * (Wo - 1) + 1:stride])
    # (Cin, kh*kw, B, Ho, Wo) -> (Cin*kh*kw, B*Ho*Wo); K order = (cin, i, j)
    # which matches w.reshape(Cout, Cin*kh*kw).
    colT = jnp.stack(cols, axis=1).reshape(C * kh * kw, B * Ho * Wo)
    wmat = w.reshape(Cout, Cin * kh * kw)
    out = pallas_matmul(wmat, colT, activation=activation, out_dtype=out_dtype)
    return out.reshape(Cout, B, Ho, Wo)


# TODO(synk): replace zero-insertion with the stride^2 sub-pixel decomposition
# (phase filters) to avoid ~4x wasted MXU flops / im2col traffic on upsampling.
def conv_transpose2d_cm(x, w, stride, padding, output_padding,
                        out_dtype=jnp.bfloat16):
    """x: (Cin, B, H, W), w: (Cin, Cout, kh, kw) (PyTorch ConvTranspose2d)."""
    Cin, Cout, kh, kw = w.shape
    C, B, H, W = x.shape
    s = stride
    if s > 1:
        xd = jnp.zeros((C, B, (H - 1) * s + 1, (W - 1) * s + 1), x.dtype)
        xd = xd.at[:, :, ::s, ::s].set(x)
    else:
        xd = x
    pb_h, pa_h = kh - 1 - padding, kh - 1 - padding + output_padding
    pb_w, pa_w = kw - 1 - padding, kw - 1 - padding + output_padding
    xd = jnp.pad(xd, ((0, 0), (0, 0), (pb_h, pa_h), (pb_w, pa_w)))
    w_eq = jnp.flip(w, axis=(2, 3)).transpose(1, 0, 2, 3)   # (Cout, Cin, kh, kw)
    return conv2d_cm(xd, w_eq, stride=1, padding=0, out_dtype=out_dtype)


# ---------------------------------------------------------------------------
# Elementwise / normalization glue (training-mode BatchNorm, gamma=1, beta=0)
# TODO(synk): fuse bn2d + residual add into the GEMM epilogue via per-tile
# partial-sum side outputs (needs a cross-tile reduction / two-pass scheme).
# ---------------------------------------------------------------------------
def leaky_relu(x):
    return jnp.where(x >= 0, x, 0.01 * x)


def bn2d_cm(x, eps=1e-5):
    """x: (C, B, H, W); per-channel batch stats over (B, H, W), f32 math."""
    x32 = x.astype(jnp.float32)
    mean = jnp.mean(x32, axis=(1, 2, 3), keepdims=True)
    var = jnp.mean((x32 - mean) ** 2, axis=(1, 2, 3), keepdims=True)
    return ((x32 - mean) * lax.rsqrt(var + eps)).astype(x.dtype)


# ---------------------------------------------------------------------------
# Blocks (exact residual_op semantics of the PyTorch model)
# ---------------------------------------------------------------------------
def residual_block(x, p):
    ha = leaky_relu(bn2d_cm(conv2d_cm(x, p['conv1'], 1, 1)))
    ha = bn2d_cm(conv2d_cm(ha, p['conv2'], 1, 1))
    return leaky_relu(ha + x)


def downsample_block(x, p):
    ha = leaky_relu(bn2d_cm(conv2d_cm(x, p['conv1a'], 2, 1)))
    ha = bn2d_cm(conv2d_cm(ha, p['conv1b'], 1, 1))
    hb = bn2d_cm(conv2d_cm(x, p['conv2a'], 2, 0))
    return leaky_relu(ha + hb)


def upsample_block(x, p):
    ha = leaky_relu(bn2d_cm(conv_transpose2d_cm(x, p['conv1a'], 2, 2, 1)))
    ha = bn2d_cm(conv2d_cm(ha, p['conv1b'], 1, 1))
    hb = bn2d_cm(conv_transpose2d_cm(x, p['conv2a'], 2, 0, 1))
    return leaky_relu(ha + hb)


# ---------------------------------------------------------------------------
# Fused bottleneck kernel: enc fc1/fc2 + Estimator1D (pre-masked MFCs) +
# dec fc1/fc2 -- all weights VMEM-resident, BatchNorm1d batch statistics,
# LeakyReLU and Sigmoid computed in-kernel.  One launch instead of ~9 GEMMs.
# ---------------------------------------------------------------------------
def _make_bottleneck_kernel(n_est):
    def kernel(*refs):
        h_ref, wf1, bf1, wf2, bf2 = refs[:5]
        est = refs[5:5 + 2 * n_est]
        wd1, bd1, wd2, bd2 = refs[5 + 2 * n_est:9 + 2 * n_est]
        z_ref, zd_ref, d_ref = refs[9 + 2 * n_est:]

        def leaky(v):
            return jnp.where(v >= 0, v, 0.01 * v)

        def bn1d(v, eps=1e-5):
            m = jnp.mean(v, axis=0, keepdims=True)
            var = jnp.mean((v - m) ** 2, axis=0, keepdims=True)
            return (v - m) * lax.rsqrt(var + eps)

        def fc(v, w_ref, b_ref):
            return jnp.dot(v, w_ref[...],
                           preferred_element_type=jnp.float32) + b_ref[...]

        # ---- encoder fc ----
        h1 = leaky(bn1d(fc(h_ref[...], wf1, bf1)))
        z = 1.0 / (1.0 + jnp.exp(-fc(h1, wf2, bf2)))
        z_ref[...] = z

        # ---- Estimator1D (weights pre-masked; (l, c)-flat feature layout) ----
        e = z
        for li in range(n_est):
            e = fc(e, est[2 * li], est[2 * li + 1])
            if li < n_est - 1:
                e = leaky(e)
        zd_ref[...] = e

        # ---- decoder fc ----
        d1 = leaky(bn1d(fc(z, wd1, bd1)))
        d_ref[...] = leaky(bn1d(fc(d1, wd2, bd2)))
    return kernel


def bottleneck_forward(h_flat, enc_fc1, enc_fc2, est_params, dec_fc1, dec_fc2):
    """h_flat: (B, prod(deepest_shape)) -> (z, z_dist_flat, dec_features)."""
    B = h_flat.shape[0]
    n_est = len(est_params)
    ops = [h_flat.astype(jnp.float32)]

    def add(p):
        ops.append(p['w'].T.astype(jnp.float32))              # (in, out)
        ops.append(p['b'].reshape(1, -1).astype(jnp.float32))

    add(enc_fc1)
    add(enc_fc2)
    for p in est_params:
        add(p)
    add(dec_fc1)
    add(dec_fc2)

    code_len = enc_fc2['w'].shape[0]
    est_out = est_params[-1]['w'].shape[0]
    dec_out = dec_fc2['w'].shape[0]
    out_shape = (jax.ShapeDtypeStruct((B, code_len), jnp.float32),
                 jax.ShapeDtypeStruct((B, est_out), jnp.float32),
                 jax.ShapeDtypeStruct((B, dec_out), jnp.float32))
    # No grid / specs: every operand is a full-array VMEM block (all tiny).
    return pl.pallas_call(_make_bottleneck_kernel(n_est),
                          out_shape=out_shape)(*ops)


# ---------------------------------------------------------------------------
# Masked-FC mask (identical to the PyTorch MaskedFullyConnection buffer)
# ---------------------------------------------------------------------------
def build_mfc_mask(mask_type, in_channels, out_channels, in_features, out_features):
    mask = np.zeros((out_features, in_features), dtype=np.float32)
    start = 0 if mask_type == 'B' else 1
    for fidx in range(start, out_features // out_channels):
        sr, er = fidx * out_channels, (fidx + 1) * out_channels
        ec = fidx * in_channels if mask_type == 'A' else (fidx + 1) * in_channels
        if ec != 0:
            mask[sr:er, 0:ec] = 1.0
    return jnp.asarray(mask)


# ---------------------------------------------------------------------------
# Parameter init (deterministic, synthetic).  Masked-FC weights are
# pre-multiplied by their mask once here (never per forward).
# ---------------------------------------------------------------------------
def init_params(key, input_shape, code_length, cpd_channels, nf):
    c, h, w = input_shape
    hh, ww = h // 8, w // 8
    keys = iter(jax.random.split(key, 128))

    def nk():
        return next(keys)

    def conv_w(cout, cin, k):
        return 0.1 * jax.random.normal(nk(), (cout, cin, k, k), jnp.float32)

    def convT_w(cin, cout, k):
        return 0.1 * jax.random.normal(nk(), (cin, cout, k, k), jnp.float32)

    def lin(out_f, in_f):
        return {'w': 0.1 * jax.random.normal(nk(), (out_f, in_f), jnp.float32),
                'b': 0.01 * jax.random.normal(nk(), (out_f,), jnp.float32)}

    enc = {
        'conv0': conv_w(nf, c, 3),
        'res': {'conv1': conv_w(nf, nf, 3), 'conv2': conv_w(nf, nf, 3)},
        'down1': {'conv1a': conv_w(2 * nf, nf, 3), 'conv1b': conv_w(2 * nf, 2 * nf, 3),
                  'conv2a': conv_w(2 * nf, nf, 1)},
        'down2': {'conv1a': conv_w(4 * nf, 2 * nf, 3), 'conv1b': conv_w(4 * nf, 4 * nf, 3),
                  'conv2a': conv_w(4 * nf, 2 * nf, 1)},
        'down3': {'conv1a': conv_w(8 * nf, 4 * nf, 3), 'conv1b': conv_w(8 * nf, 8 * nf, 3),
                  'conv2a': conv_w(8 * nf, 4 * nf, 1)},
        'fc1': lin(8 * nf, 8 * nf * hh * ww),
        'fc2': lin(code_length, 8 * nf),
    }

    # Estimator1D: fm_list = [nf, nf, nf, nf], final out_channels = cpd_channels.
    est = []
    fm_in, mask_type = 1, 'A'
    for fm_out in [nf, nf, nf, nf]:
        in_f, out_f = fm_in * code_length, fm_out * code_length
        p = lin(out_f, in_f)
        p['w'] = p['w'] * build_mfc_mask(mask_type, fm_in, fm_out, in_f, out_f)
        est.append(p)
        mask_type, fm_in = 'B', fm_out
    in_f, out_f = fm_in * code_length, cpd_channels * code_length
    p = lin(out_f, in_f)
    p['w'] = p['w'] * build_mfc_mask('B', fm_in, cpd_channels, in_f, out_f)
    est.append(p)

    dec = {
        'fc1': lin(8 * nf, code_length),
        'fc2': lin(8 * nf * hh * ww, 8 * nf),
        'up1': {'conv1a': convT_w(8 * nf, 4 * nf, 5), 'conv1b': conv_w(4 * nf, 4 * nf, 3),
                'conv2a': convT_w(8 * nf, 4 * nf, 1)},
        'up2': {'conv1a': convT_w(4 * nf, 2 * nf, 5), 'conv1b': conv_w(2 * nf, 2 * nf, 3),
                'conv2a': convT_w(4 * nf, 2 * nf, 1)},
        'up3': {'conv1a': convT_w(2 * nf, nf, 5), 'conv1b': conv_w(nf, nf, 3),
                'conv2a': convT_w(2 * nf, nf, 1)},
        'res': {'conv1': conv_w(nf, nf, 3), 'conv2': conv_w(nf, nf, 3)},
        'final': conv_w(c, nf, 1),
    }
    return {'enc': enc, 'est': est, 'dec': dec}


# ---------------------------------------------------------------------------
# LSAMOOD forward (vae_mode=False, out_sigmoid=True)
# ---------------------------------------------------------------------------
def make_forward(input_shape, nf):
    c, hgt, wdt = input_shape
    hh, ww = hgt // 8, wdt // 8

    def forward(params, x):
        B = x.shape[0]
        enc, dec = params['enc'], params['dec']

        # ---- Encoder (channel-major activations, bf16 between layers) ----
        h = jnp.transpose(x, (1, 0, 2, 3)).astype(jnp.bfloat16)   # (C, B, H, W)
        h = conv2d_cm(h, enc['conv0'], 1, 0, activation='leaky_relu')
        h = residual_block(h, enc['res'])
        h = downsample_block(h, enc['down1'])
        h = downsample_block(h, enc['down2'])
        h = downsample_block(h, enc['down3'])                     # (8nf, B, hh, ww)

        # PyTorch flatten order (c, h, w) per sample.
        h_flat = jnp.transpose(h, (1, 0, 2, 3)).reshape(B, -1)

        # ---- Fused bottleneck: enc fc + estimator + dec fc (one kernel) ----
        z, zdist_flat, d_flat = bottleneck_forward(
            h_flat, enc['fc1'], enc['fc2'], params['est'],
            dec['fc1'], dec['fc2'])

        code_length = z.shape[1]
        cpd_channels = zdist_flat.shape[1] // code_length
        z_dist = zdist_flat.reshape(B, code_length, cpd_channels)
        z_dist = jnp.transpose(z_dist, (0, 2, 1))                 # (B, cpd, L)

        # ---- Decoder ----
        d = d_flat.reshape(B, 8 * nf, hh, ww)
        d = jnp.transpose(d, (1, 0, 2, 3)).astype(jnp.bfloat16)   # channel-major
        d = upsample_block(d, dec['up1'])
        d = upsample_block(d, dec['up2'])
        d = upsample_block(d, dec['up3'])
        d = residual_block(d, dec['res'])
        x_r = conv2d_cm(d, dec['final'], 1, 0, activation='sigmoid',
                        out_dtype=jnp.float32)                    # (c, B, H, W)
        x_r = jnp.transpose(x_r, (1, 0, 2, 3)).reshape(-1, c, hgt, wdt)
        return x_r, z, z_dist

    return jax.jit(forward)


# ---------------------------------------------------------------------------
if __name__ == "__main__":
    # Small, module-consistent shapes: CIFAR-like input 3x16x16, batch=2.
    input_shape = (3, 16, 16)
    code_length = 16
    cpd_channels = 8
    nf = 8          # n_starting_features
    batch = 2

    key = jax.random.PRNGKey(0)
    kp, kx = jax.random.split(key)
    params = init_params(kp, input_shape, code_length, cpd_channels, nf)
    x = jax.random.uniform(kx, (batch,) + input_shape, dtype=jnp.float32)

    fwd = make_forward(input_shape, nf)
    x_r, z, z_dist = fwd(params, x)
    jax.block_until_ready((x_r, z, z_dist))

    assert x_r.shape == (batch,) + input_shape
    assert z.shape == (batch, code_length)
    assert z_dist.shape == (batch, cpd_channels, code_length)
    assert bool(jnp.all(jnp.isfinite(x_r)))
    assert bool(jnp.all(jnp.isfinite(z)))
    assert bool(jnp.all(jnp.isfinite(z_dist)))
    print("KERNEL_OK")
</pallas_src>

<mosaic_0001>
module attributes {stable_mosaic.version = 11 : i64} {
  func.func @kernel(%arg0: i32, %arg1: i32, %arg2: memref<8x128xbf16, #tpu.memory_space<vmem>>, %arg3: memref<128x256xbf16, #tpu.memory_space<vmem>>, %arg4: memref<8x256xbf16, #tpu.memory_space<vmem>>) attributes {dimension_semantics = [#tpu.dimension_semantics<parallel>, #tpu.dimension_semantics<parallel>], iteration_bounds = array<i64: 1, 2>, scalar_prefetch = 0 : i64, scratch_operands = 0 : i64, tpu.core_type = #tpu.core_type<tc>, window_params = [{transform_indices = @transform_0, window_bounds = array<i64: 8, 128>}, {transform_indices = @transform_1, window_bounds = array<i64: 128, 256>}, {transform_indices = @transform_2, window_bounds = array<i64: 8, 256>}]} {
    %c0 = arith.constant 0 : index
    %c0_0 = arith.constant 0 : index
    %0 = vector.load %arg2[%c0, %c0_0] : memref<8x128xbf16, #tpu.memory_space<vmem>>, vector<8x128xbf16>
    %c0_1 = arith.constant 0 : index
    %c0_2 = arith.constant 0 : index
    %1 = vector.load %arg3[%c0_1, %c0_2] : memref<128x256xbf16, #tpu.memory_space<vmem>>, vector<128x256xbf16>
    %cst = arith.constant dense<0.000000e+00> : vector<8x256xf32>
    %2 = tpu.matmul %0, %1, %cst {dimension_numbers = #tpu.dot_dimension_numbers<[1], [0], [0], [1], [0, 0, 1, 1], [], []>} : vector<8x128xbf16>, vector<128x256xbf16>, vector<8x256xf32> -> vector<8x256xf32>
    %cst_3 = arith.constant 0.000000e+00 : f32
    %3 = vector.broadcast %cst_3 : f32 to vector<8x256xf32>
    %4 = arith.cmpf oge, %2, %3 : vector<8x256xf32>
    %cst_4 = arith.constant 0.00999999977 : f32
    %5 = vector.broadcast %cst_4 : f32 to vector<8x256xf32>
    %6 = arith.mulf %5, %2 : vector<8x256xf32>
    %7 = arith.select %4, %2, %6 : vector<8x256xi1>, vector<8x256xf32>
    %8 = arith.truncf %7 : vector<8x256xf32> to vector<8x256xbf16>
    %c0_5 = arith.constant 0 : index
    %c0_6 = arith.constant 0 : index
    %9 = vector.load %arg4[%c0_5, %c0_6] : memref<8x256xbf16, #tpu.memory_space<vmem>>, vector<8x256xbf16>
    tpu.vector_store %arg4[%c0_5, %c0_6], %8 {strides = array<i32>} : memref<8x256xbf16, #tpu.memory_space<vmem>>, vector<8x256xbf16>,
    return
  }
  func.func @transform_0(%arg0: i32, %arg1: i32) -> (i32, i32) {
    %c0_i32 = arith.constant 0 : i32
    %c0_i32_0 = arith.constant 0 : i32
    return %arg0, %c0_i32 : i32, i32
  }
  func.func @transform_1(%arg0: i32, %arg1: i32) -> (i32, i32) {
    %c0_i32 = arith.constant 0 : i32
    %c0_i32_0 = arith.constant 0 : i32
    return %c0_i32, %arg1 : i32, i32
  }
  func.func @transform_2(%arg0: i32, %arg1: i32) -> (i32, i32) {
    %c0_i32 = arith.constant 0 : i32
    return %arg0, %arg1 : i32, i32
  }
}

module attributes {stable_mosaic.version = 11 : i64} {
  func.func @kernel(%arg0: i32, %arg1: i32, %arg2: memref<8x128xbf16, #tpu.memory_space<vmem>>, %arg3: memref<128x256xbf16, #tpu.memory_space<vmem>>, %arg4: memref<8x256xbf16, #tpu.memory_space<vmem>>) attributes {dimension_semantics = [#tpu.dimension_semantics<parallel>, #tpu.dimension_semantics<parallel>], iteration_bounds = array<i64: 1, 2>, scalar_prefetch = 0 : i64, scratch_operands = 0 : i64, tpu.core_type = #tpu.core_type<tc>, window_params = [{transform_indices = @transform_0, window_bounds = array<i64: 8, 128>}, {transform_indices = @transform_1, window_bounds = array<i64: 128, 256>}, {transform_indices = @transform_2, window_bounds = array<i64: 8, 256>}]} {
    %c0 = arith.constant 0 : index
    %c0_0 = arith.constant 0 : index
    %0 = vector.load %arg2[%c0, %c0_0] : memref<8x128xbf16, #tpu.memory_space<vmem>>, vector<8x128xbf16>
    %c0_1 = arith.constant 0 : index
    %c0_2 = arith.constant 0 : index
    %1 = vector.load %arg3[%c0_1, %c0_2] : memref<128x256xbf16, #tpu.memory_space<vmem>>, vector<128x256xbf16>
    %cst = arith.constant dense<0.000000e+00> : vector<8x256xf32>
    %2 = tpu.matmul %0, %1, %cst {dimension_numbers = #tpu.dot_dimension_numbers<[1], [0], [0], [1], [0, 0, 1, 1], [], []>} : vector<8x128xbf16>, vector<128x256xbf16>, vector<8x256xf32> -> vector<8x256xf32>
    %3 = arith.truncf %2 : vector<8x256xf32> to vector<8x256xbf16>
    %c0_3 = arith.constant 0 : index
    %c0_4 = arith.constant 0 : index
    %4 = vector.load %arg4[%c0_3, %c0_4] : memref<8x256xbf16, #tpu.memory_space<vmem>>, vector<8x256xbf16>
    tpu.vector_store %arg4[%c0_3, %c0_4], %3 {strides = array<i32>} : memref<8x256xbf16, #tpu.memory_space<vmem>>, vector<8x256xbf16>,
    return
  }
  func.func @transform_0(%arg0: i32, %arg1: i32) -> (i32, i32) {
    %c0_i32 = arith.constant 0 : i32
    %c0_i32_0 = arith.constant 0 : i32
    return %arg0, %c0_i32 : i32, i32
  }
  func.func @transform_1(%arg0: i32, %arg1: i32) -> (i32, i32) {
    %c0_i32 = arith.constant 0 : i32
    %c0_i32_0 = arith.constant 0 : i32
    return %c0_i32, %arg1 : i32, i32
  }
  func.func @transform_2(%arg0: i32, %arg1: i32) -> (i32, i32) {
    %c0_i32 = arith.constant 0 : i32
    return %arg0, %arg1 : i32, i32
  }
}

module attributes {stable_mosaic.version = 11 : i64} {
  func.func @kernel(%arg0: i32, %arg1: i32, %arg2: memref<16x128xbf16, #tpu.memory_space<vmem>>, %arg3: memref<128x128xbf16, #tpu.memory_space<vmem>>, %arg4: memref<16x128xbf16, #tpu.memory_space<vmem>>) attributes {dimension_semantics = [#tpu.dimension_semantics<parallel>, #tpu.dimension_semantics<parallel>], iteration_bounds = array<i64: 1, 1>, scalar_prefetch = 0 : i64, scratch_operands = 0 : i64, tpu.core_type = #tpu.core_type<tc>, window_params = [{transform_indices = @transform_0, window_bounds = array<i64: 16, 128>}, {transform_indices = @transform_1, window_bounds = array<i64: 128, 128>}, {transform_indices = @transform_2, window_bounds = array<i64: 16, 128>}]} {
    %c0 = arith.constant 0 : index
    %c0_0 = arith.constant 0 : index
    %0 = vector.load %arg2[%c0, %c0_0] : memref<16x128xbf16, #tpu.memory_space<vmem>>, vector<16x128xbf16>
    %c0_1 = arith.constant 0 : index
    %c0_2 = arith.constant 0 : index
    %1 = vector.load %arg3[%c0_1, %c0_2] : memref<128x128xbf16, #tpu.memory_space<vmem>>, vector<128x128xbf16>
    %cst = arith.constant dense<0.000000e+00> : vector<16x128xf32>
    %2 = tpu.matmul %0, %1, %cst {dimension_numbers = #tpu.dot_dimension_numbers<[1], [0], [0], [1], [0, 0, 1, 1], [], []>} : vector<16x128xbf16>, vector<128x128xbf16>, vector<16x128xf32> -> vector<16x128xf32>
    %3 = arith.truncf %2 : vector<16x128xf32> to vector<16x128xbf16>
    %c0_3 = arith.constant 0 : index
    %c0_4 = arith.constant 0 : index
    %4 = vector.load %arg4[%c0_3, %c0_4] : memref<16x128xbf16, #tpu.memory_space<vmem>>, vector<16x128xbf16>
    tpu.vector_store %arg4[%c0_3, %c0_4], %3 {strides = array<i32>} : memref<16x128xbf16, #tpu.memory_space<vmem>>, vector<16x128xbf16>,
    return
  }
  func.func @transform_0(%arg0: i32, %arg1: i32) -> (i32, i32) {
    %c0_i32 = arith.constant 0 : i32
    %c0_i32_0 = arith.constant 0 : i32
    return %arg0, %c0_i32 : i32, i32
  }
  func.func @transform_1(%arg0: i32, %arg1: i32) -> (i32, i32) {
    %c0_i32 = arith.constant 0 : i32
    %c0_i32_0 = arith.constant 0 : i32
    return %c0_i32, %arg1 : i32, i32
  }
  func.func @transform_2(%arg0: i32, %arg1: i32) -> (i32, i32) {
    %c0_i32 = arith.constant 0 : i32
    return %arg0, %arg1 : i32, i32
  }
}

module attributes {stable_mosaic.version = 11 : i64} {
  func.func @kernel(%arg0: i32, %arg1: i32, %arg2: memref<16x256xbf16, #tpu.memory_space<vmem>>, %arg3: memref<256x128xbf16, #tpu.memory_space<vmem>>, %arg4: memref<16x128xbf16, #tpu.memory_space<vmem>>) attributes {dimension_semantics = [#tpu.dimension_semantics<parallel>, #tpu.dimension_semantics<parallel>], iteration_bounds = array<i64: 1, 1>, scalar_prefetch = 0 : i64, scratch_operands = 0 : i64, tpu.core_type = #tpu.core_type<tc>, window_params = [{transform_indices = @transform_0, window_bounds = array<i64: 16, 256>}, {transform_indices = @transform_1, window_bounds = array<i64: 256, 128>}, {transform_indices = @transform_2, window_bounds = array<i64: 16, 128>}]} {
    %c0 = arith.constant 0 : index
    %c0_0 = arith.constant 0 : index
    %0 = vector.load %arg2[%c0, %c0_0] : memref<16x256xbf16, #tpu.memory_space<vmem>>, vector<16x256xbf16>
    %c0_1 = arith.constant 0 : index
    %c0_2 = arith.constant 0 : index
    %1 = vector.load %arg3[%c0_1, %c0_2] : memref<256x128xbf16, #tpu.memory_space<vmem>>, vector<256x128xbf16>
    %cst = arith.constant dense<0.000000e+00> : vector<16x128xf32>
    %2 = tpu.matmul %0, %1, %cst {dimension_numbers = #tpu.dot_dimension_numbers<[1], [0], [0], [1], [0, 0, 1, 1], [], []>} : vector<16x256xbf16>, vector<256x128xbf16>, vector<16x128xf32> -> vector<16x128xf32>
    %3 = arith.truncf %2 : vector<16x128xf32> to vector<16x128xbf16>
    %c0_3 = arith.constant 0 : index
    %c0_4 = arith.constant 0 : index
    %4 = vector.load %arg4[%c0_3, %c0_4] : memref<16x128xbf16, #tpu.memory_space<vmem>>, vector<16x128xbf16>
    tpu.vector_store %arg4[%c0_3, %c0_4], %3 {strides = array<i32>} : memref<16x128xbf16, #tpu.memory_space<vmem>>, vector<16x128xbf16>,
    return
  }
  func.func @transform_0(%arg0: i32, %arg1: i32) -> (i32, i32) {
    %c0_i32 = arith.constant 0 : i32
    %c0_i32_0 = arith.constant 0 : i32
    return %arg0, %c0_i32 : i32, i32
  }
  func.func @transform_1(%arg0: i32, %arg1: i32) -> (i32, i32) {
    %c0_i32 = arith.constant 0 : i32
    %c0_i32_0 = arith.constant 0 : i32
    return %c0_i32, %arg1 : i32, i32
  }
  func.func @transform_2(%arg0: i32, %arg1: i32) -> (i32, i32) {
    %c0_i32 = arith.constant 0 : i32
    return %arg0, %arg1 : i32, i32
  }
}

module attributes {stable_mosaic.version = 11 : i64} {
  func.func @kernel(%arg0: i32, %arg1: i32, %arg2: memref<16x128xbf16, #tpu.memory_space<vmem>>, %arg3: memref<128x128xbf16, #tpu.memory_space<vmem>>, %arg4: memref<16x128xbf16, #tpu.memory_space<vmem>>) attributes {dimension_semantics = [#tpu.dimension_semantics<parallel>, #tpu.dimension_semantics<parallel>], iteration_bounds = array<i64: 1, 1>, scalar_prefetch = 0 : i64, scratch_operands = 0 : i64, tpu.core_type = #tpu.core_type<tc>, window_params = [{transform_indices = @transform_0, window_bounds = array<i64: 16, 128>}, {transform_indices = @transform_1, window_bounds = array<i64: 128, 128>}, {transform_indices = @transform_2, window_bounds = array<i64: 16, 128>}]} {
    %c0 = arith.constant 0 : index
    %c0_0 = arith.constant 0 : index
    %0 = vector.load %arg2[%c0, %c0_0] : memref<16x128xbf16, #tpu.memory_space<vmem>>, vector<16x128xbf16>
    %c0_1 = arith.constant 0 : index
    %c0_2 = arith.constant 0 : index
    %1 = vector.load %arg3[%c0_1, %c0_2] : memref<128x128xbf16, #tpu.memory_space<vmem>>, vector<128x128xbf16>
    %cst = arith.constant dense<0.000000e+00> : vector<16x128xf32>
    %2 = tpu.matmul %0, %1, %cst {dimension_numbers = #tpu.dot_dimension_numbers<[1], [0], [0], [1], [0, 0, 1, 1], [], []>} : vector<16x128xbf16>, vector<128x128xbf16>, vector<16x128xf32> -> vector<16x128xf32>
    %3 = arith.truncf %2 : vector<16x128xf32> to vector<16x128xbf16>
    %c0_3 = arith.constant 0 : index
    %c0_4 = arith.constant 0 : index
    %4 = vector.load %arg4[%c0_3, %c0_4] : memref<16x128xbf16, #tpu.memory_space<vmem>>, vector<16x128xbf16>
    tpu.vector_store %arg4[%c0_3, %c0_4], %3 {strides = array<i32>} : memref<16x128xbf16, #tpu.memory_space<vmem>>, vector<16x128xbf16>,
    return
  }
  func.func @transform_0(%arg0: i32, %arg1: i32) -> (i32, i32) {
    %c0_i32 = arith.constant 0 : i32
    %c0_i32_0 = arith.constant 0 : i32
    return %arg0, %c0_i32 : i32, i32
  }
  func.func @transform_1(%arg0: i32, %arg1: i32) -> (i32, i32) {
    %c0_i32 = arith.constant 0 : i32
    %c0_i32_0 = arith.constant 0 : i32
    return %c0_i32, %arg1 : i32, i32
  }
  func.func @transform_2(%arg0: i32, %arg1: i32) -> (i32, i32) {
    %c0_i32 = arith.constant 0 : i32
    return %arg0, %arg1 : i32, i32
  }
}

module attributes {stable_mosaic.version = 11 : i64} {
  func.func @kernel(%arg0: i32, %arg1: i32, %arg2: memref<32x256xbf16, #tpu.memory_space<vmem>>, %arg3: memref<256x128xbf16, #tpu.memory_space<vmem>>, %arg4: memref<32x128xbf16, #tpu.memory_space<vmem>>) attributes {dimension_semantics = [#tpu.dimension_semantics<parallel>, #tpu.dimension_semantics<parallel>], iteration_bounds = array<i64: 1, 1>, scalar_prefetch = 0 : i64, scratch_operands = 0 : i64, tpu.core_type = #tpu.core_type<tc>, window_params = [{transform_indices = @transform_0, window_bounds = array<i64: 32, 256>}, {transform_indices = @transform_1, window_bounds = array<i64: 256, 128>}, {transform_indices = @transform_2, window_bounds = array<i64: 32, 128>}]} {
    %c0 = arith.constant 0 : index
    %c0_0 = arith.constant 0 : index
    %0 = vector.load %arg2[%c0, %c0_0] : memref<32x256xbf16, #tpu.memory_space<vmem>>, vector<32x256xbf16>
    %c0_1 = arith.constant 0 : index
    %c0_2 = arith.constant 0 : index
    %1 = vector.load %arg3[%c0_1, %c0_2] : memref<256x128xbf16, #tpu.memory_space<vmem>>, vector<256x128xbf16>
    %cst = arith.constant dense<0.000000e+00> : vector<32x128xf32>
    %2 = tpu.matmul %0, %1, %cst {dimension_numbers = #tpu.dot_dimension_numbers<[1], [0], [0], [1], [0, 0, 1, 1], [], []>} : vector<32x256xbf16>, vector<256x128xbf16>, vector<32x128xf32> -> vector<32x128xf32>
    %3 = arith.truncf %2 : vector<32x128xf32> to vector<32x128xbf16>
    %c0_3 = arith.constant 0 : index
    %c0_4 = arith.constant 0 : index
    %4 = vector.load %arg4[%c0_3, %c0_4] : memref<32x128xbf16, #tpu.memory_space<vmem>>, vector<32x128xbf16>
    tpu.vector_store %arg4[%c0_3, %c0_4], %3 {strides = array<i32>} : memref<32x128xbf16, #tpu.memory_space<vmem>>, vector<32x128xbf16>,
    return
  }
  func.func @transform_0(%arg0: i32, %arg1: i32) -> (i32, i32) {
    %c0_i32 = arith.constant 0 : i32
    %c0_i32_0 = arith.constant 0 : i32
    return %arg0, %c0_i32 : i32, i32
  }
  func.func @transform_1(%arg0: i32, %arg1: i32) -> (i32, i32) {
    %c0_i32 = arith.constant 0 : i32
    %c0_i32_0 = arith.constant 0 : i32
    return %c0_i32, %arg1 : i32, i32
  }
  func.func @transform_2(%arg0: i32, %arg1: i32) -> (i32, i32) {
    %c0_i32 = arith.constant 0 : i32
    return %arg0, %arg1 : i32, i32
  }
}

module attributes {stable_mosaic.version = 11 : i64} {
  func.func @kernel(%arg0: i32, %arg1: i32, %arg2: memref<32x128xbf16, #tpu.memory_space<vmem>>, %arg3: memref<128x128xbf16, #tpu.memory_space<vmem>>, %arg4: memref<32x128xbf16, #tpu.memory_space<vmem>>) attributes {dimension_semantics = [#tpu.dimension_semantics<parallel>, #tpu.dimension_semantics<parallel>], iteration_bounds = array<i64: 1, 1>, scalar_prefetch = 0 : i64, scratch_operands = 0 : i64, tpu.core_type = #tpu.core_type<tc>, window_params = [{transform_indices = @transform_0, window_bounds = array<i64: 32, 128>}, {transform_indices = @transform_1, window_bounds = array<i64: 128, 128>}, {transform_indices = @transform_2, window_bounds = array<i64: 32, 128>}]} {
    %c0 = arith.constant 0 : index
    %c0_0 = arith.constant 0 : index
    %0 = vector.load %arg2[%c0, %c0_0] : memref<32x128xbf16, #tpu.memory_space<vmem>>, vector<32x128xbf16>
    %c0_1 = arith.constant 0 : index
    %c0_2 = arith.constant 0 : index
    %1 = vector.load %arg3[%c0_1, %c0_2] : memref<128x128xbf16, #tpu.memory_space<vmem>>, vector<128x128xbf16>
    %cst = arith.constant dense<0.000000e+00> : vector<32x128xf32>
    %2 = tpu.matmul %0, %1, %cst {dimension_numbers = #tpu.dot_dimension_numbers<[1], [0], [0], [1], [0, 0, 1, 1], [], []>} : vector<32x128xbf16>, vector<128x128xbf16>, vector<32x128xf32> -> vector<32x128xf32>
    %3 = arith.truncf %2 : vector<32x128xf32> to vector<32x128xbf16>
    %c0_3 = arith.constant 0 : index
    %c0_4 = arith.constant 0 : index
    %4 = vector.load %arg4[%c0_3, %c0_4] : memref<32x128xbf16, #tpu.memory_space<vmem>>, vector<32x128xbf16>
    tpu.vector_store %arg4[%c0_3, %c0_4], %3 {strides = array<i32>} : memref<32x128xbf16, #tpu.memory_space<vmem>>, vector<32x128xbf16>,
    return
  }
  func.func @transform_0(%arg0: i32, %arg1: i32) -> (i32, i32) {
    %c0_i32 = arith.constant 0 : i32
    %c0_i32_0 = arith.constant 0 : i32
    return %arg0, %c0_i32 : i32, i32
  }
  func.func @transform_1(%arg0: i32, %arg1: i32) -> (i32, i32) {
    %c0_i32 = arith.constant 0 : i32
    %c0_i32_0 = arith.constant 0 : i32
    return %c0_i32, %arg1 : i32, i32
  }
  func.func @transform_2(%arg0: i32, %arg1: i32) -> (i32, i32) {
    %c0_i32 = arith.constant 0 : i32
    return %arg0, %arg1 : i32, i32
  }
}

module attributes {stable_mosaic.version = 11 : i64} {
  func.func @kernel(%arg0: i32, %arg1: i32, %arg2: memref<32x384xbf16, #tpu.memory_space<vmem>>, %arg3: memref<384x128xbf16, #tpu.memory_space<vmem>>, %arg4: memref<32x128xbf16, #tpu.memory_space<vmem>>) attributes {dimension_semantics = [#tpu.dimension_semantics<parallel>, #tpu.dimension_semantics<parallel>], iteration_bounds = array<i64: 1, 1>, scalar_prefetch = 0 : i64, scratch_operands = 0 : i64, tpu.core_type = #tpu.core_type<tc>, window_params = [{transform_indices = @transform_0, window_bounds = array<i64: 32, 384>}, {transform_indices = @transform_1, window_bounds = array<i64: 384, 128>}, {transform_indices = @transform_2, window_bounds = array<i64: 32, 128>}]} {
    %c0 = arith.constant 0 : index
    %c0_0 = arith.constant 0 : index
    %0 = vector.load %arg2[%c0, %c0_0] : memref<32x384xbf16, #tpu.memory_space<vmem>>, vector<32x384xbf16>
    %c0_1 = arith.constant 0 : index
    %c0_2 = arith.constant 0 : index
    %1 = vector.load %arg3[%c0_1, %c0_2] : memref<384x128xbf16, #tpu.memory_space<vmem>>, vector<384x128xbf16>
    %cst = arith.constant dense<0.000000e+00> : vector<32x128xf32>
    %2 = tpu.matmul %0, %1, %cst {dimension_numbers = #tpu.dot_dimension_numbers<[1], [0], [0], [1], [0, 0, 1, 1], [], []>} : vector<32x384xbf16>, vector<384x128xbf16>, vector<32x128xf32> -> vector<32x128xf32>
    %3 = arith.truncf %2 : vector<32x128xf32> to vector<32x128xbf16>
    %c0_3 = arith.constant 0 : index
    %c0_4 = arith.constant 0 : index
    %4 = vector.load %arg4[%c0_3, %c0_4] : memref<32x128xbf16, #tpu.memory_space<vmem>>, vector<32x128xbf16>
    tpu.vector_store %arg4[%c0_3, %c0_4], %3 {strides = array<i32>} : memref<32x128xbf16, #tpu.memory_space<vmem>>, vector<32x128xbf16>,
    return
  }
  func.func @transform_0(%arg0: i32, %arg1: i32) -> (i32, i32) {
    %c0_i32 = arith.constant 0 : i32
    %c0_i32_0 = arith.constant 0 : i32
    return %arg0, %c0_i32 : i32, i32
  }
  func.func @transform_1(%arg0: i32, %arg1: i32) -> (i32, i32) {
    %c0_i32 = arith.constant 0 : i32
    %c0_i32_0 = arith.constant 0 : i32
    return %c0_i32, %arg1 : i32, i32
  }
  func.func @transform_2(%arg0: i32, %arg1: i32) -> (i32, i32) {
    %c0_i32 = arith.constant 0 : i32
    return %arg0, %arg1 : i32, i32
  }
}

module attributes {stable_mosaic.version = 11 : i64} {
  func.func @kernel(%arg0: i32, %arg1: i32, %arg2: memref<64x384xbf16, #tpu.memory_space<vmem>>, %arg3: memref<384x128xbf16, #tpu.memory_space<vmem>>, %arg4: memref<64x128xbf16, #tpu.memory_space<vmem>>) attributes {dimension_semantics = [#tpu.dimension_semantics<parallel>, #tpu.dimension_semantics<parallel>], iteration_bounds = array<i64: 1, 1>, scalar_prefetch = 0 : i64, scratch_operands = 0 : i64, tpu.core_type = #tpu.core_type<tc>, window_params = [{transform_indices = @transform_0, window_bounds = array<i64: 64, 384>}, {transform_indices = @transform_1, window_bounds = array<i64: 384, 128>}, {transform_indices = @transform_2, window_bounds = array<i64: 64, 128>}]} {
    %c0 = arith.constant 0 : index
    %c0_0 = arith.constant 0 : index
    %0 = vector.load %arg2[%c0, %c0_0] : memref<64x384xbf16, #tpu.memory_space<vmem>>, vector<64x384xbf16>
    %c0_1 = arith.constant 0 : index
    %c0_2 = arith.constant 0 : index
    %1 = vector.load %arg3[%c0_1, %c0_2] : memref<384x128xbf16, #tpu.memory_space<vmem>>, vector<384x128xbf16>
    %cst = arith.constant dense<0.000000e+00> : vector<64x128xf32>
    %2 = tpu.matmul %0, %1, %cst {dimension_numbers = #tpu.dot_dimension_numbers<[1], [0], [0], [1], [0, 0, 1, 1], [], []>} : vector<64x384xbf16>, vector<384x128xbf16>, vector<64x128xf32> -> vector<64x128xf32>
    %3 = arith.truncf %2 : vector<64x128xf32> to vector<64x128xbf16>
    %c0_3 = arith.constant 0 : index
    %c0_4 = arith.constant 0 : index
    %4 = vector.load %arg4[%c0_3, %c0_4] : memref<64x128xbf16, #tpu.memory_space<vmem>>, vector<64x128xbf16>
    tpu.vector_store %arg4[%c0_3, %c0_4], %3 {strides = array<i32>} : memref<64x128xbf16, #tpu.memory_space<vmem>>, vector<64x128xbf16>,
    return
  }
  func.func @transform_0(%arg0: i32, %arg1: i32) -> (i32, i32) {
    %c0_i32 = arith.constant 0 : i32
    %c0_i32_0 = arith.constant 0 : i32
    return %arg0, %c0_i32 : i32, i32
  }
  func.func @transform_1(%arg0: i32, %arg1: i32) -> (i32, i32) {
    %c0_i32 = arith.constant 0 : i32
    %c0_i32_0 = arith.constant 0 : i32
    return %c0_i32, %arg1 : i32, i32
  }
  func.func @transform_2(%arg0: i32, %arg1: i32) -> (i32, i32) {
    %c0_i32 = arith.constant 0 : i32
    return %arg0, %arg1 : i32, i32
  }
}

module attributes {stable_mosaic.version = 11 : i64} {
  func.func @kernel(%arg0: i32, %arg1: i32, %arg2: memref<64x640xbf16, #tpu.memory_space<vmem>>, %arg3: memref<640x128xbf16, #tpu.memory_space<vmem>>, %arg4: memref<64x128xbf16, #tpu.memory_space<vmem>>) attributes {dimension_semantics = [#tpu.dimension_semantics<parallel>, #tpu.dimension_semantics<parallel>], iteration_bounds = array<i64: 1, 1>, scalar_prefetch = 0 : i64, scratch_operands = 0 : i64, tpu.core_type = #tpu.core_type<tc>, window_params = [{transform_indices = @transform_0, window_bounds = array<i64: 64, 640>}, {transform_indices = @transform_1, window_bounds = array<i64: 640, 128>}, {transform_indices = @transform_2, window_bounds = array<i64: 64, 128>}]} {
    %c0 = arith.constant 0 : index
    %c0_0 = arith.constant 0 : index
    %0 = vector.load %arg2[%c0, %c0_0] : memref<64x640xbf16, #tpu.memory_space<vmem>>, vector<64x640xbf16>
    %c0_1 = arith.constant 0 : index
    %c0_2 = arith.constant 0 : index
    %1 = vector.load %arg3[%c0_1, %c0_2] : memref<640x128xbf16, #tpu.memory_space<vmem>>, vector<640x128xbf16>
    %cst = arith.constant dense<0.000000e+00> : vector<64x128xf32>
    %2 = tpu.matmul %0, %1, %cst {dimension_numbers = #tpu.dot_dimension_numbers<[1], [0], [0], [1], [0, 0, 1, 1], [], []>} : vector<64x640xbf16>, vector<640x128xbf16>, vector<64x128xf32> -> vector<64x128xf32>
    %3 = arith.truncf %2 : vector<64x128xf32> to vector<64x128xbf16>
    %c0_3 = arith.constant 0 : index
    %c0_4 = arith.constant 0 : index
    %4 = vector.load %arg4[%c0_3, %c0_4] : memref<64x128xbf16, #tpu.memory_space<vmem>>, vector<64x128xbf16>
    tpu.vector_store %arg4[%c0_3, %c0_4], %3 {strides = array<i32>} : memref<64x128xbf16, #tpu.memory_space<vmem>>, vector<64x128xbf16>,
    return
  }
  func.func @transform_0(%arg0: i32, %arg1: i32) -> (i32, i32) {
    %c0_i32 = arith.constant 0 : i32
    %c0_i32_0 = arith.constant 0 : i32
    return %arg0, %c0_i32 : i32, i32
  }
  func.func @transform_1(%arg0: i32, %arg1: i32) -> (i32, i32) {
    %c0_i32 = arith.constant 0 : i32
    %c0_i32_0 = arith.constant 0 : i32
    return %c0_i32, %arg1 : i32, i32
  }
  func.func @transform_2(%arg0: i32, %arg1: i32) -> (i32, i32) {
    %c0_i32 = arith.constant 0 : i32
    return %arg0, %arg1 : i32, i32
  }
}

module attributes {stable_mosaic.version = 11 : i64} {
  func.func @kernel(%arg0: i32, %arg1: i32, %arg2: memref<64x128xbf16, #tpu.memory_space<vmem>>, %arg3: memref<128x128xbf16, #tpu.memory_space<vmem>>, %arg4: memref<64x128xbf16, #tpu.memory_space<vmem>>) attributes {dimension_semantics = [#tpu.dimension_semantics<parallel>, #tpu.dimension_semantics<parallel>], iteration_bounds = array<i64: 1, 1>, scalar_prefetch = 0 : i64, scratch_operands = 0 : i64, tpu.core_type = #tpu.core_type<tc>, window_params = [{transform_indices = @transform_0, window_bounds = array<i64: 64, 128>}, {transform_indices = @transform_1, window_bounds = array<i64: 128, 128>}, {transform_indices = @transform_2, window_bounds = array<i64: 64, 128>}]} {
    %c0 = arith.constant 0 : index
    %c0_0 = arith.constant 0 : index
    %0 = vector.load %arg2[%c0, %c0_0] : memref<64x128xbf16, #tpu.memory_space<vmem>>, vector<64x128xbf16>
    %c0_1 = arith.constant 0 : index
    %c0_2 = arith.constant 0 : index
    %1 = vector.load %arg3[%c0_1, %c0_2] : memref<128x128xbf16, #tpu.memory_space<vmem>>, vector<128x128xbf16>
    %cst = arith.constant dense<0.000000e+00> : vector<64x128xf32>
    %2 = tpu.matmul %0, %1, %cst {dimension_numbers = #tpu.dot_dimension_numbers<[1], [0], [0], [1], [0, 0, 1, 1], [], []>} : vector<64x128xbf16>, vector<128x128xbf16>, vector<64x128xf32> -> vector<64x128xf32>
    %3 = arith.truncf %2 : vector<64x128xf32> to vector<64x128xbf16>
    %c0_3 = arith.constant 0 : index
    %c0_4 = arith.constant 0 : index
    %4 = vector.load %arg4[%c0_3, %c0_4] : memref<64x128xbf16, #tpu.memory_space<vmem>>, vector<64x128xbf16>
    tpu.vector_store %arg4[%c0_3, %c0_4], %3 {strides = array<i32>} : memref<64x128xbf16, #tpu.memory_space<vmem>>, vector<64x128xbf16>,
    return
  }
  func.func @transform_0(%arg0: i32, %arg1: i32) -> (i32, i32) {
    %c0_i32 = arith.constant 0 : i32
    %c0_i32_0 = arith.constant 0 : i32
    return %arg0, %c0_i32 : i32, i32
  }
  func.func @transform_1(%arg0: i32, %arg1: i32) -> (i32, i32) {
    %c0_i32 = arith.constant 0 : i32
    %c0_i32_0 = arith.constant 0 : i32
    return %c0_i32, %arg1 : i32, i32
  }
  func.func @transform_2(%arg0: i32, %arg1: i32) -> (i32, i32) {
    %c0_i32 = arith.constant 0 : i32
    return %arg0, %arg1 : i32, i32
  }
}

module attributes {stable_mosaic.version = 11 : i64} {
  func.func @kernel(%arg0: memref<2x256xf32, #tpu.memory_space<vmem>>, %arg1: memref<256x64xf32, #tpu.memory_space<vmem>>, %arg2: memref<1x64xf32, #tpu.memory_space<vmem>>, %arg3: memref<64x16xf32, #tpu.memory_space<vmem>>, %arg4: memref<1x16xf32, #tpu.memory_space<vmem>>, %arg5: memref<16x128xf32, #tpu.memory_space<vmem>>, %arg6: memref<1x128xf32, #tpu.memory_space<vmem>>, %arg7: memref<128x128xf32, #tpu.memory_space<vmem>>, %arg8: memref<1x128xf32, #tpu.memory_space<vmem>>, %arg9: memref<128x128xf32, #tpu.memory_space<vmem>>, %arg10: memref<1x128xf32, #tpu.memory_space<vmem>>, %arg11: memref<128x128xf32, #tpu.memory_space<vmem>>, %arg12: memref<1x128xf32, #tpu.memory_space<vmem>>, %arg13: memref<128x128xf32, #tpu.memory_space<vmem>>, %arg14: memref<1x128xf32, #tpu.memory_space<vmem>>, %arg15: memref<16x64xf32, #tpu.memory_space<vmem>>, %arg16: memref<1x64xf32, #tpu.memory_space<vmem>>, %arg17: memref<64x256xf32, #tpu.memory_space<vmem>>, %arg18: memref<1x256xf32, #tpu.memory_space<vmem>>, %arg19: memref<2x16xf32, #tpu.memory_space<vmem>>, %arg20: memref<2x128xf32, #tpu.memory_space<vmem>>, %arg21: memref<2x256xf32, #tpu.memory_space<vmem>>) attributes {dimension_semantics = [], scalar_prefetch = 0 : i64, scratch_operands = 0 : i64, tpu.core_type = #tpu.core_type<tc>} {
    %c0 = arith.constant 0 : index
    %c0_0 = arith.constant 0 : index
    %0 = vector.load %arg0[%c0, %c0_0] : memref<2x256xf32, #tpu.memory_space<vmem>>, vector<2x256xf32>
    %c0_1 = arith.constant 0 : index
    %c0_2 = arith.constant 0 : index
    %1 = vector.load %arg1[%c0_1, %c0_2] : memref<256x64xf32, #tpu.memory_space<vmem>>, vector<256x64xf32>
    %cst = arith.constant dense<0.000000e+00> : vector<2x64xf32>
    %2 = tpu.matmul %0, %1, %cst {dimension_numbers = #tpu.dot_dimension_numbers<[1], [0], [0], [1], [0, 0, 1, 1], [], []>} : vector<2x256xf32>, vector<256x64xf32>, vector<2x64xf32> -> vector<2x64xf32>
    %c0_3 = arith.constant 0 : index
    %c0_4 = arith.constant 0 : index
    %3 = vector.load %arg2[%c0_3, %c0_4] : memref<1x64xf32, #tpu.memory_space<vmem>>, vector<1x64xf32>
    %4 = vector.broadcast %3 : vector<1x64xf32> to vector<2x64xf32>
    %5 = arith.addf %2, %4 : vector<2x64xf32>
    %cst_5 = arith.constant dense<0.000000e+00> : vector<64xf32>
    %6 = vector.multi_reduction <add>, %5, %cst_5 [0] : vector<2x64xf32> to vector<64xf32>
    %7 = vector.shape_cast %6 : vector<64xf32> to vector<1x64xf32>
    %cst_6 = arith.constant 2.000000e+00 : f32
    %8 = vector.broadcast %cst_6 : f32 to vector<1x64xf32>
    %9 = arith.divf %7, %8 : vector<1x64xf32>
    %10 = vector.broadcast %9 : vector<1x64xf32> to vector<2x64xf32>
    %11 = arith.subf %5, %10 : vector<2x64xf32>
    %12 = arith.mulf %11, %11 : vector<2x64xf32>
    %cst_7 = arith.constant dense<0.000000e+00> : vector<64xf32>
    %13 = vector.multi_reduction <add>, %12, %cst_7 [0] : vector<2x64xf32> to vector<64xf32>
    %14 = vector.shape_cast %13 : vector<64xf32> to vector<1x64xf32>
    %cst_8 = arith.constant 2.000000e+00 : f32
    %15 = vector.broadcast %cst_8 : f32 to vector<1x64xf32>
    %16 = arith.divf %14, %15 : vector<1x64xf32>
    %17 = vector.broadcast %9 : vector<1x64xf32> to vector<2x64xf32>
    %18 = arith.subf %5, %17 : vector<2x64xf32>
    %cst_9 = arith.constant 9.99999974E-6 : f32
    %19 = vector.broadcast %cst_9 : f32 to vector<1x64xf32>
    %20 = arith.addf %16, %19 : vector<1x64xf32>
    %21 = math.rsqrt %20 : vector<1x64xf32>
    %22 = vector.broadcast %21 : vector<1x64xf32> to vector<2x64xf32>
    %23 = arith.mulf %18, %22 : vector<2x64xf32>
    %cst_10 = arith.constant 0.000000e+00 : f32
    %24 = vector.broadcast %cst_10 : f32 to vector<2x64xf32>
    %25 = arith.cmpf oge, %23, %24 : vector<2x64xf32>
    %cst_11 = arith.constant 0.00999999977 : f32
    %26 = vector.broadcast %cst_11 : f32 to vector<2x64xf32>
    %27 = arith.mulf %26, %23 : vector<2x64xf32>
    %28 = arith.select %25, %23, %27 : vector<2x64xi1>, vector<2x64xf32>
    %c0_12 = arith.constant 0 : index
    %c0_13 = arith.constant 0 : index
    %29 = vector.load %arg3[%c0_12, %c0_13] : memref<64x16xf32, #tpu.memory_space<vmem>>, vector<64x16xf32>
    %cst_14 = arith.constant dense<0.000000e+00> : vector<2x16xf32>
    %30 = tpu.matmul %28, %29, %cst_14 {dimension_numbers = #tpu.dot_dimension_numbers<[1], [0], [0], [1], [0, 0, 1, 1], [], []>} : vector<2x64xf32>, vector<64x16xf32>, vector<2x16xf32> -> vector<2x16xf32>
    %c0_15 = arith.constant 0 : index
    %c0_16 = arith.constant 0 : index
    %31 = vector.load %arg4[%c0_15, %c0_16] : memref<1x16xf32, #tpu.memory_space<vmem>>, vector<1x16xf32>
    %32 = vector.broadcast %31 : vector<1x16xf32> to vector<2x16xf32>
    %33 = arith.addf %30, %32 : vector<2x16xf32>
    %cst_17 = arith.constant 0.000000e+00 : f32
    %34 = vector.broadcast %cst_17 : f32 to vector<2x16xf32>
    %35 = arith.subf %34, %33 : vector<2x16xf32>
    %36 = math.exp %35 : vector<2x16xf32>
    %cst_18 = arith.constant 1.000000e+00 : f32
    %37 = vector.broadcast %cst_18 : f32 to vector<2x16xf32>
    %38 = arith.addf %37, %36 : vector<2x16xf32>
    %cst_19 = arith.constant 1.000000e+00 : f32
    %39 = vector.broadcast %cst_19 : f32 to vector<2x16xf32>
    %40 = arith.divf %39, %38 : vector<2x16xf32>
    %c0_20 = arith.constant 0 : index
    %c0_21 = arith.constant 0 : index
    %41 = vector.load %arg19[%c0_20, %c0_21] : memref<2x16xf32, #tpu.memory_space<vmem>>, vector<2x16xf32>
    tpu.vector_store %arg19[%c0_20, %c0_21], %40 {strides = array<i32>} : memref<2x16xf32, #tpu.memory_space<vmem>>, vector<2x16xf32>,
    %c0_22 = arith.constant 0 : index
    %c0_23 = arith.constant 0 : index
    %42 = vector.load %arg5[%c0_22, %c0_23] : memref<16x128xf32, #tpu.memory_space<vmem>>, vector<16x128xf32>
    %cst_24 = arith.constant dense<0.000000e+00> : vector<2x128xf32>
    %43 = tpu.matmul %40, %42, %cst_24 {dimension_numbers = #tpu.dot_dimension_numbers<[1], [0], [0], [1], [0, 0, 1, 1], [], []>} : vector<2x16xf32>, vector<16x128xf32>, vector<2x128xf32> -> vector<2x128xf32>
    %c0_25 = arith.constant 0 : index
    %c0_26 = arith.constant 0 : index
    %44 = vector.load %arg6[%c0_25, %c0_26] : memref<1x128xf32, #tpu.memory_space<vmem>>, vector<1x128xf32>
    %45 = vector.broadcast %44 : vector<1x128xf32> to vector<2x128xf32>
    %46 = arith.addf %43, %45 : vector<2x128xf32>
    %cst_27 = arith.constant 0.000000e+00 : f32
    %47 = vector.broadcast %cst_27 : f32 to vector<2x128xf32>
    %48 = arith.cmpf oge, %46, %47 : vector<2x128xf32>
    %cst_28 = arith.constant 0.00999999977 : f32
    %49 = vector.broadcast %cst_28 : f32 to vector<2x128xf32>
    %50 = arith.mulf %49, %46 : vector<2x128xf32>
    %51 = arith.select %48, %46, %50 : vector<2x128xi1>, vector<2x128xf32>
    %c0_29 = arith.constant 0 : index
    %c0_30 = arith.constant 0 : index
    %52 = vector.load %arg7[%c0_29, %c0_30] : memref<128x128xf32, #tpu.memory_space<vmem>>, vector<128x128xf32>
    %cst_31 = arith.constant dense<0.000000e+00> : vector<2x128xf32>
    %53 = tpu.matmul %51, %52, %cst_31 {dimension_numbers = #tpu.dot_dimension_numbers<[1], [0], [0], [1], [0, 0, 1, 1], [], []>} : vector<2x128xf32>, vector<128x128xf32>, vector<2x128xf32> -> vector<2x128xf32>
    %c0_32 = arith.constant 0 : index
    %c0_33 = arith.constant 0 : index
    %54 = vector.load %arg8[%c0_32, %c0_33] : memref<1x128xf32, #tpu.memory_space<vmem>>, vector<1x128xf32>
    %55 = vector.broadcast %54 : vector<1x128xf32> to vector<2x128xf32>
    %56 = arith.addf %53, %55 : vector<2x128xf32>
    %cst_34 = arith.constant 0.000000e+00 : f32
    %57 = vector.broadcast %cst_34 : f32 to vector<2x128xf32>
    %58 = arith.cmpf oge, %56, %57 : vector<2x128xf32>
    %cst_35 = arith.constant 0.00999999977 : f32
    %59 = vector.broadcast %cst_35 : f32 to vector<2x128xf32>
    %60 = arith.mulf %59, %56 : vector<2x128xf32>
    %61 = arith.select %58, %56, %60 : vector<2x128xi1>, vector<2x128xf32>
    %c0_36 = arith.constant 0 : index
    %c0_37 = arith.constant 0 : index
    %62 = vector.load %arg9[%c0_36, %c0_37] : memref<128x128xf32, #tpu.memory_space<vmem>>, vector<128x128xf32>
    %cst_38 = arith.constant dense<0.000000e+00> : vector<2x128xf32>
    %63 = tpu.matmul %61, %62, %cst_38 {dimension_numbers = #tpu.dot_dimension_numbers<[1], [0], [0], [1], [0, 0, 1, 1], [], []>} : vector<2x128xf32>, vector<128x128xf32>, vector<2x128xf32> -> vector<2x128xf32>
    %c0_39 = arith.constant 0 : index
    %c0_40 = arith.constant 0 : index
    %64 = vector.load %arg10[%c0_39, %c0_40] : memref<1x128xf32, #tpu.memory_space<vmem>>, vector<1x128xf32>
    %65 = vector.broadcast %64 : vector<1x128xf32> to vector<2x128xf32>
    %66 = arith.addf %63, %65 : vector<2x128xf32>
    %cst_41 = arith.constant 0.000000e+00 : f32
    %67 = vector.broadcast %cst_41 : f32 to vector<2x128xf32>
    %68 = arith.cmpf oge, %66, %67 : vector<2x128xf32>
    %cst_42 = arith.constant 0.00999999977 : f32
    %69 = vector.broadcast %cst_42 : f32 to vector<2x128xf32>
    %70 = arith.mulf %69, %66 : vector<2x128xf32>
    %71 = arith.select %68, %66, %70 : vector<2x128xi1>, vector<2x128xf32>
    %c0_43 = arith.constant 0 : index
    %c0_44 = arith.constant 0 : index
    %72 = vector.load %arg11[%c0_43, %c0_44] : memref<128x128xf32, #tpu.memory_space<vmem>>, vector<128x128xf32>
    %cst_45 = arith.constant dense<0.000000e+00> : vector<2x128xf32>
    %73 = tpu.matmul %71, %72, %cst_45 {dimension_numbers = #tpu.dot_dimension_numbers<[1], [0], [0], [1], [0, 0, 1, 1], [], []>} : vector<2x128xf32>, vector<128x128xf32>, vector<2x128xf32> -> vector<2x128xf32>
    %c0_46 = arith.constant 0 : index
    %c0_47 = arith.constant 0 : index
    %74 = vector.load %arg12[%c0_46, %c0_47] : memref<1x128xf32, #tpu.memory_space<vmem>>, vector<1x128xf32>
    %75 = vector.broadcast %74 : vector<1x128xf32> to vector<2x128xf32>
    %76 = arith.addf %73, %75 : vector<2x128xf32>
    %cst_48 = arith.constant 0.000000e+00 : f32
    %77 = vector.broadcast %cst_48 : f32 to vector<2x128xf32>
    %78 = arith.cmpf oge, %76, %77 : vector<2x128xf32>
    %cst_49 = arith.constant 0.00999999977 : f32
    %79 = vector.broadcast %cst_49 : f32 to vector<2x128xf32>
    %80 = arith.mulf %79, %76 : vector<2x128xf32>
    %81 = arith.select %78, %76, %80 : vector<2x128xi1>, vector<2x128xf32>
    %c0_50 = arith.constant 0 : index
    %c0_51 = arith.constant 0 : index
    %82 = vector.load %arg13[%c0_50, %c0_51] : memref<128x128xf32, #tpu.memory_space<vmem>>, vector<128x128xf32>
    %cst_52 = arith.constant dense<0.000000e+00> : vector<2x128xf32>
    %83 = tpu.matmul %81, %82, %cst_52 {dimension_numbers = #tpu.dot_dimension_numbers<[1], [0], [0], [1], [0, 0, 1, 1], [], []>} : vector<2x128xf32>, vector<128x128xf32>, vector<2x128xf32> -> vector<2x128xf32>
    %c0_53 = arith.constant 0 : index
    %c0_54 = arith.constant 0 : index
    %84 = vector.load %arg14[%c0_53, %c0_54] : memref<1x128xf32, #tpu.memory_space<vmem>>, vector<1x128xf32>
    %85 = vector.broadcast %84 : vector<1x128xf32> to vector<2x128xf32>
    %86 = arith.addf %83, %85 : vector<2x128xf32>
    %c0_55 = arith.constant 0 : index
    %c0_56 = arith.constant 0 : index
    %87 = vector.load %arg20[%c0_55, %c0_56] : memref<2x128xf32, #tpu.memory_space<vmem>>, vector<2x128xf32>
    tpu.vector_store %arg20[%c0_55, %c0_56], %86 {strides = array<i32>} : memref<2x128xf32, #tpu.memory_space<vmem>>, vector<2x128xf32>,
    %c0_57 = arith.constant 0 : index
    %c0_58 = arith.constant 0 : index
    %88 = vector.load %arg15[%c0_57, %c0_58] : memref<16x64xf32, #tpu.memory_space<vmem>>, vector<16x64xf32>
    %cst_59 = arith.constant dense<0.000000e+00> : vector<2x64xf32>
    %89 = tpu.matmul %40, %88, %cst_59 {dimension_numbers = #tpu.dot_dimension_numbers<[1], [0], [0], [1], [0, 0, 1, 1], [], []>} : vector<2x16xf32>, vector<16x64xf32>, vector<2x64xf32> -> vector<2x64xf32>
    %c0_60 = arith.constant 0 : index
    %c0_61 = arith.constant 0 : index
    %90 = vector.load %arg16[%c0_60, %c0_61] : memref<1x64xf32, #tpu.memory_space<vmem>>, vector<1x64xf32>
    %91 = vector.broadcast %90 : vector<1x64xf32> to vector<2x64xf32>
    %92 = arith.addf %89, %91 : vector<2x64xf32>
    %cst_62 = arith.constant dense<0.000000e+00> : vector<64xf32>
    %93 = vector.multi_reduction <add>, %92, %cst_62 [0] : vector<2x64xf32> to vector<64xf32>
    %94 = vector.shape_cast %93 : vector<64xf32> to vector<1x64xf32>
    %cst_63 = arith.constant 2.000000e+00 : f32
    %95 = vector.broadcast %cst_63 : f32 to vector<1x64xf32>
    %96 = arith.divf %94, %95 : vector<1x64xf32>
    %97 = vector.broadcast %96 : vector<1x64xf32> to vector<2x64xf32>
    %98 = arith.subf %92, %97 : vector<2x64xf32>
    %99 = arith.mulf %98, %98 : vector<2x64xf32>
    %cst_64 = arith.constant dense<0.000000e+00> : vector<64xf32>
    %100 = vector.multi_reduction <add>, %99, %cst_64 [0] : vector<2x64xf32> to vector<64xf32>
    %101 = vector.shape_cast %100 : vector<64xf32> to vector<1x64xf32>
    %cst_65 = arith.constant 2.000000e+00 : f32
    %102 = vector.broadcast %cst_65 : f32 to vector<1x64xf32>
    %103 = arith.divf %101, %102 : vector<1x64xf32>
    %104 = vector.broadcast %96 : vector<1x64xf32> to vector<2x64xf32>
    %105 = arith.subf %92, %104 : vector<2x64xf32>
    %cst_66 = arith.constant 9.99999974E-6 : f32
    %106 = vector.broadcast %cst_66 : f32 to vector<1x64xf32>
    %107 = arith.addf %103, %106 : vector<1x64xf32>
    %108 = math.rsqrt %107 : vector<1x64xf32>
    %109 = vector.broadcast %108 : vector<1x64xf32> to vector<2x64xf32>
    %110 = arith.mulf %105, %109 : vector<2x64xf32>
    %cst_67 = arith.constant 0.000000e+00 : f32
    %111 = vector.broadcast %cst_67 : f32 to vector<2x64xf32>
    %112 = arith.cmpf oge, %110, %111 : vector<2x64xf32>
    %cst_68 = arith.constant 0.00999999977 : f32
    %113 = vector.broadcast %cst_68 : f32 to vector<2x64xf32>
    %114 = arith.mulf %113, %110 : vector<2x64xf32>
    %115 = arith.select %112, %110, %114 : vector<2x64xi1>, vector<2x64xf32>
    %c0_69 = arith.constant 0 : index
    %c0_70 = arith.constant 0 : index
    %116 = vector.load %arg17[%c0_69, %c0_70] : memref<64x256xf32, #tpu.memory_space<vmem>>, vector<64x256xf32>
    %cst_71 = arith.constant dense<0.000000e+00> : vector<2x256xf32>
    %117 = tpu.matmul %115, %116, %cst_71 {dimension_numbers = #tpu.dot_dimension_numbers<[1], [0], [0], [1], [0, 0, 1, 1], [], []>} : vector<2x64xf32>, vector<64x256xf32>, vector<2x256xf32> -> vector<2x256xf32>
    %c0_72 = arith.constant 0 : index
    %c0_73 = arith.constant 0 : index
    %118 = vector.load %arg18[%c0_72, %c0_73] : memref<1x256xf32, #tpu.memory_space<vmem>>, vector<1x256xf32>
    %119 = vector.broadcast %118 : vector<1x256xf32> to vector<2x256xf32>
    %120 = arith.addf %117, %119 : vector<2x256xf32>
    %cst_74 = arith.constant dense<0.000000e+00> : vector<256xf32>
    %121 = vector.multi_reduction <add>, %120, %cst_74 [0] : vector<2x256xf32> to vector<256xf32>
    %122 = vector.shape_cast %121 : vector<256xf32> to vector<1x256xf32>
    %cst_75 = arith.constant 2.000000e+00 : f32
    %123 = vector.broadcast %cst_75 : f32 to vector<1x256xf32>
    %124 = arith.divf %122, %123 : vector<1x256xf32>
    %125 = vector.broadcast %124 : vector<1x256xf32> to vector<2x256xf32>
    %126 = arith.subf %120, %125 : vector<2x256xf32>
    %127 = arith.mulf %126, %126 : vector<2x256xf32>
    %cst_76 = arith.constant dense<0.000000e+00> : vector<256xf32>
    %128 = vector.multi_reduction <add>, %127, %cst_76 [0] : vector<2x256xf32> to vector<256xf32>
    %129 = vector.shape_cast %128 : vector<256xf32> to vector<1x256xf32>
    %cst_77 = arith.constant 2.000000e+00 : f32
    %130 = vector.broadcast %cst_77 : f32 to vector<1x256xf32>
    %131 = arith.divf %129, %130 : vector<1x256xf32>
    %132 = vector.broadcast %124 : vector<1x256xf32> to vector<2x256xf32>
    %133 = arith.subf %120, %132 : vector<2x256xf32>
    %cst_78 = arith.constant 9.99999974E-6 : f32
    %134 = vector.broadcast %cst_78 : f32 to vector<1x256xf32>
    %135 = arith.addf %131, %134 : vector<1x256xf32>
    %136 = math.rsqrt %135 : vector<1x256xf32>
    %137 = vector.broadcast %136 : vector<1x256xf32> to vector<2x256xf32>
    %138 = arith.mulf %133, %137 : vector<2x256xf32>
    %cst_79 = arith.constant 0.000000e+00 : f32
    %139 = vector.broadcast %cst_79 : f32 to vector<2x256xf32>
    %140 = arith.cmpf oge, %138, %139 : vector<2x256xf32>
    %cst_80 = arith.constant 0.00999999977 : f32
    %141 = vector.broadcast %cst_80 : f32 to vector<2x256xf32>
    %142 = arith.mulf %141, %138 : vector<2x256xf32>
    %143 = arith.select %140, %138, %142 : vector<2x256xi1>, vector<2x256xf32>
    %c0_81 = arith.constant 0 : index
    %c0_82 = arith.constant 0 : index
    %144 = vector.load %arg21[%c0_81, %c0_82] : memref<2x256xf32, #tpu.memory_space<vmem>>, vector<2x256xf32>
    tpu.vector_store %arg21[%c0_81, %c0_82], %143 {strides = array<i32>} : memref<2x256xf32, #tpu.memory_space<vmem>>, vector<2x256xf32>,
    return
  }
}

module attributes {stable_mosaic.version = 11 : i64} {
  func.func @kernel(%arg0: i32, %arg1: i32, %arg2: memref<32x1664xbf16, #tpu.memory_space<vmem>>, %arg3: memref<1664x128xbf16, #tpu.memory_space<vmem>>, %arg4: memref<32x128xbf16, #tpu.memory_space<vmem>>) attributes {dimension_semantics = [#tpu.dimension_semantics<parallel>, #tpu.dimension_semantics<parallel>], iteration_bounds = array<i64: 1, 1>, scalar_prefetch = 0 : i64, scratch_operands = 0 : i64, tpu.core_type = #tpu.core_type<tc>, window_params = [{transform_indices = @transform_0, window_bounds = array<i64: 32, 1664>}, {transform_indices = @transform_1, window_bounds = array<i64: 1664, 128>}, {transform_indices = @transform_2, window_bounds = array<i64: 32, 128>}]} {
    %c0 = arith.constant 0 : index
    %c0_0 = arith.constant 0 : index
    %0 = vector.load %arg2[%c0, %c0_0] : memref<32x1664xbf16, #tpu.memory_space<vmem>>, vector<32x1664xbf16>
    %c0_1 = arith.constant 0 : index
    %c0_2 = arith.constant 0 : index
    %1 = vector.load %arg3[%c0_1, %c0_2] : memref<1664x128xbf16, #tpu.memory_space<vmem>>, vector<1664x128xbf16>
    %cst = arith.constant dense<0.000000e+00> : vector<32x128xf32>
    %2 = tpu.matmul %0, %1, %cst {dimension_numbers = #tpu.dot_dimension_numbers<[1], [0], [0], [1], [0, 0, 1, 1], [], []>} : vector<32x1664xbf16>, vector<1664x128xbf16>, vector<32x128xf32> -> vector<32x128xf32>
    %3 = arith.truncf %2 : vector<32x128xf32> to vector<32x128xbf16>
    %c0_3 = arith.constant 0 : index
    %c0_4 = arith.constant 0 : index
    %4 = vector.load %arg4[%c0_3, %c0_4] : memref<32x128xbf16, #tpu.memory_space<vmem>>, vector<32x128xbf16>
    tpu.vector_store %arg4[%c0_3, %c0_4], %3 {strides = array<i32>} : memref<32x128xbf16, #tpu.memory_space<vmem>>, vector<32x128xbf16>,
    return
  }
  func.func @transform_0(%arg0: i32, %arg1: i32) -> (i32, i32) {
    %c0_i32 = arith.constant 0 : i32
    %c0_i32_0 = arith.constant 0 : i32
    return %arg0, %c0_i32 : i32, i32
  }
  func.func @transform_1(%arg0: i32, %arg1: i32) -> (i32, i32) {
    %c0_i32 = arith.constant 0 : i32
    %c0_i32_0 = arith.constant 0 : i32
    return %c0_i32, %arg1 : i32, i32
  }
  func.func @transform_2(%arg0: i32, %arg1: i32) -> (i32, i32) {
    %c0_i32 = arith.constant 0 : i32
    return %arg0, %arg1 : i32, i32
  }
}

module attributes {stable_mosaic.version = 11 : i64} {
  func.func @kernel(%arg0: i32, %arg1: i32, %arg2: memref<32x128xbf16, #tpu.memory_space<vmem>>, %arg3: memref<128x128xbf16, #tpu.memory_space<vmem>>, %arg4: memref<32x128xbf16, #tpu.memory_space<vmem>>) attributes {dimension_semantics = [#tpu.dimension_semantics<parallel>, #tpu.dimension_semantics<parallel>], iteration_bounds = array<i64: 1, 1>, scalar_prefetch = 0 : i64, scratch_operands = 0 : i64, tpu.core_type = #tpu.core_type<tc>, window_params = [{transform_indices = @transform_0, window_bounds = array<i64: 32, 128>}, {transform_indices = @transform_1, window_bounds = array<i64: 128, 128>}, {transform_indices = @transform_2, window_bounds = array<i64: 32, 128>}]} {
    %c0 = arith.constant 0 : index
    %c0_0 = arith.constant 0 : index
    %0 = vector.load %arg2[%c0, %c0_0] : memref<32x128xbf16, #tpu.memory_space<vmem>>, vector<32x128xbf16>
    %c0_1 = arith.constant 0 : index
    %c0_2 = arith.constant 0 : index
    %1 = vector.load %arg3[%c0_1, %c0_2] : memref<128x128xbf16, #tpu.memory_space<vmem>>, vector<128x128xbf16>
    %cst = arith.constant dense<0.000000e+00> : vector<32x128xf32>
    %2 = tpu.matmul %0, %1, %cst {dimension_numbers = #tpu.dot_dimension_numbers<[1], [0], [0], [1], [0, 0, 1, 1], [], []>} : vector<32x128xbf16>, vector<128x128xbf16>, vector<32x128xf32> -> vector<32x128xf32>
    %3 = arith.truncf %2 : vector<32x128xf32> to vector<32x128xbf16>
    %c0_3 = arith.constant 0 : index
    %c0_4 = arith.constant 0 : index
    %4 = vector.load %arg4[%c0_3, %c0_4] : memref<32x128xbf16, #tpu.memory_space<vmem>>, vector<32x128xbf16>
    tpu.vector_store %arg4[%c0_3, %c0_4], %3 {strides = array<i32>} : memref<32x128xbf16, #tpu.memory_space<vmem>>, vector<32x128xbf16>,
    return
  }
  func.func @transform_0(%arg0: i32, %arg1: i32) -> (i32, i32) {
    %c0_i32 = arith.constant 0 : i32
    %c0_i32_0 = arith.constant 0 : i32
    return %arg0, %c0_i32 : i32, i32
  }
  func.func @transform_1(%arg0: i32, %arg1: i32) -> (i32, i32) {
    %c0_i32 = arith.constant 0 : i32
    %c0_i32_0 = arith.constant 0 : i32
    return %c0_i32, %arg1 : i32, i32
  }
  func.func @transform_2(%arg0: i32, %arg1: i32) -> (i32, i32) {
    %c0_i32 = arith.constant 0 : i32
    return %arg0, %arg1 : i32, i32
  }
}

module attributes {stable_mosaic.version = 11 : i64} {
  func.func @kernel(%arg0: i32, %arg1: i32, %arg2: memref<16x896xbf16, #tpu.memory_space<vmem>>, %arg3: memref<896x128xbf16, #tpu.memory_space<vmem>>, %arg4: memref<16x128xbf16, #tpu.memory_space<vmem>>) attributes {dimension_semantics = [#tpu.dimension_semantics<parallel>, #tpu.dimension_semantics<parallel>], iteration_bounds = array<i64: 1, 1>, scalar_prefetch = 0 : i64, scratch_operands = 0 : i64, tpu.core_type = #tpu.core_type<tc>, window_params = [{transform_indices = @transform_0, window_bounds = array<i64: 16, 896>}, {transform_indices = @transform_1, window_bounds = array<i64: 896, 128>}, {transform_indices = @transform_2, window_bounds = array<i64: 16, 128>}]} {
    %c0 = arith.constant 0 : index
    %c0_0 = arith.constant 0 : index
    %0 = vector.load %arg2[%c0, %c0_0] : memref<16x896xbf16, #tpu.memory_space<vmem>>, vector<16x896xbf16>
    %c0_1 = arith.constant 0 : index
    %c0_2 = arith.constant 0 : index
    %1 = vector.load %arg3[%c0_1, %c0_2] : memref<896x128xbf16, #tpu.memory_space<vmem>>, vector<896x128xbf16>
    %cst = arith.constant dense<0.000000e+00> : vector<16x128xf32>
    %2 = tpu.matmul %0, %1, %cst {dimension_numbers = #tpu.dot_dimension_numbers<[1], [0], [0], [1], [0, 0, 1, 1], [], []>} : vector<16x896xbf16>, vector<896x128xbf16>, vector<16x128xf32> -> vector<16x128xf32>
    %3 = arith.truncf %2 : vector<16x128xf32> to vector<16x128xbf16>
    %c0_3 = arith.constant 0 : index
    %c0_4 = arith.constant 0 : index
    %4 = vector.load %arg4[%c0_3, %c0_4] : memref<16x128xbf16, #tpu.memory_space<vmem>>, vector<16x128xbf16>
    tpu.vector_store %arg4[%c0_3, %c0_4], %3 {strides = array<i32>} : memref<16x128xbf16, #tpu.memory_space<vmem>>, vector<16x128xbf16>,
    return
  }
  func.func @transform_0(%arg0: i32, %arg1: i32) -> (i32, i32) {
    %c0_i32 = arith.constant 0 : i32
    %c0_i32_0 = arith.constant 0 : i32
    return %arg0, %c0_i32 : i32, i32
  }
  func.func @transform_1(%arg0: i32, %arg1: i32) -> (i32, i32) {
    %c0_i32 = arith.constant 0 : i32
    %c0_i32_0 = arith.constant 0 : i32
    return %c0_i32, %arg1 : i32, i32
  }
  func.func @transform_2(%arg0: i32, %arg1: i32) -> (i32, i32) {
    %c0_i32 = arith.constant 0 : i32
    return %arg0, %arg1 : i32, i32
  }
}

module attributes {stable_mosaic.version = 11 : i64} {
  func.func @kernel(%arg0: i32, %arg1: i32, %arg2: memref<16x256xbf16, #tpu.memory_space<vmem>>, %arg3: memref<256x128xbf16, #tpu.memory_space<vmem>>, %arg4: memref<16x128xbf16, #tpu.memory_space<vmem>>) attributes {dimension_semantics = [#tpu.dimension_semantics<parallel>, #tpu.dimension_semantics<parallel>], iteration_bounds = array<i64: 1, 1>, scalar_prefetch = 0 : i64, scratch_operands = 0 : i64, tpu.core_type = #tpu.core_type<tc>, window_params = [{transform_indices = @transform_0, window_bounds = array<i64: 16, 256>}, {transform_indices = @transform_1, window_bounds = array<i64: 256, 128>}, {transform_indices = @transform_2, window_bounds = array<i64: 16, 128>}]} {
    %c0 = arith.constant 0 : index
    %c0_0 = arith.constant 0 : index
    %0 = vector.load %arg2[%c0, %c0_0] : memref<16x256xbf16, #tpu.memory_space<vmem>>, vector<16x256xbf16>
    %c0_1 = arith.constant 0 : index
    %c0_2 = arith.constant 0 : index
    %1 = vector.load %arg3[%c0_1, %c0_2] : memref<256x128xbf16, #tpu.memory_space<vmem>>, vector<256x128xbf16>
    %cst = arith.constant dense<0.000000e+00> : vector<16x128xf32>
    %2 = tpu.matmul %0, %1, %cst {dimension_numbers = #tpu.dot_dimension_numbers<[1], [0], [0], [1], [0, 0, 1, 1], [], []>} : vector<16x256xbf16>, vector<256x128xbf16>, vector<16x128xf32> -> vector<16x128xf32>
    %3 = arith.truncf %2 : vector<16x128xf32> to vector<16x128xbf16>
    %c0_3 = arith.constant 0 : index
    %c0_4 = arith.constant 0 : index
    %4 = vector.load %arg4[%c0_3, %c0_4] : memref<16x128xbf16, #tpu.memory_space<vmem>>, vector<16x128xbf16>
    tpu.vector_store %arg4[%c0_3, %c0_4], %3 {strides = array<i32>} : memref<16x128xbf16, #tpu.memory_space<vmem>>, vector<16x128xbf16>,
    return
  }
  func.func @transform_0(%arg0: i32, %arg1: i32) -> (i32, i32) {
    %c0_i32 = arith.constant 0 : i32
    %c0_i32_0 = arith.constant 0 : i32
    return %arg0, %c0_i32 : i32, i32
  }
  func.func @transform_1(%arg0: i32, %arg1: i32) -> (i32, i32) {
    %c0_i32 = arith.constant 0 : i32
    %c0_i32_0 = arith.constant 0 : i32
    return %c0_i32, %arg1 : i32, i32
  }
  func.func @transform_2(%arg0: i32, %arg1: i32) -> (i32, i32) {
    %c0_i32 = arith.constant 0 : i32
    return %arg0, %arg1 : i32, i32
  }
}

module attributes {stable_mosaic.version = 11 : i64} {
  func.func @kernel(%arg0: i32, %arg1: i32, %arg2: memref<16x128xbf16, #tpu.memory_space<vmem>>, %arg3: memref<128x128xbf16, #tpu.memory_space<vmem>>, %arg4: memref<16x128xbf16, #tpu.memory_space<vmem>>) attributes {dimension_semantics = [#tpu.dimension_semantics<parallel>, #tpu.dimension_semantics<parallel>], iteration_bounds = array<i64: 1, 1>, scalar_prefetch = 0 : i64, scratch_operands = 0 : i64, tpu.core_type = #tpu.core_type<tc>, window_params = [{transform_indices = @transform_0, window_bounds = array<i64: 16, 128>}, {transform_indices = @transform_1, window_bounds = array<i64: 128, 128>}, {transform_indices = @transform_2, window_bounds = array<i64: 16, 128>}]} {
    %c0 = arith.constant 0 : index
    %c0_0 = arith.constant 0 : index
    %0 = vector.load %arg2[%c0, %c0_0] : memref<16x128xbf16, #tpu.memory_space<vmem>>, vector<16x128xbf16>
    %c0_1 = arith.constant 0 : index
    %c0_2 = arith.constant 0 : index
    %1 = vector.load %arg3[%c0_1, %c0_2] : memref<128x128xbf16, #tpu.memory_space<vmem>>, vector<128x128xbf16>
    %cst = arith.constant dense<0.000000e+00> : vector<16x128xf32>
    %2 = tpu.matmul %0, %1, %cst {dimension_numbers = #tpu.dot_dimension_numbers<[1], [0], [0], [1], [0, 0, 1, 1], [], []>} : vector<16x128xbf16>, vector<128x128xbf16>, vector<16x128xf32> -> vector<16x128xf32>
    %3 = arith.truncf %2 : vector<16x128xf32> to vector<16x128xbf16>
    %c0_3 = arith.constant 0 : index
    %c0_4 = arith.constant 0 : index
    %4 = vector.load %arg4[%c0_3, %c0_4] : memref<16x128xbf16, #tpu.memory_space<vmem>>, vector<16x128xbf16>
    tpu.vector_store %arg4[%c0_3, %c0_4], %3 {strides = array<i32>} : memref<16x128xbf16, #tpu.memory_space<vmem>>, vector<16x128xbf16>,
    return
  }
  func.func @transform_0(%arg0: i32, %arg1: i32) -> (i32, i32) {
    %c0_i32 = arith.constant 0 : i32
    %c0_i32_0 = arith.constant 0 : i32
    return %arg0, %c0_i32 : i32, i32
  }
  func.func @transform_1(%arg0: i32, %arg1: i32) -> (i32, i32) {
    %c0_i32 = arith.constant 0 : i32
    %c0_i32_0 = arith.constant 0 : i32
    return %c0_i32, %arg1 : i32, i32
  }
  func.func @transform_2(%arg0: i32, %arg1: i32) -> (i32, i32) {
    %c0_i32 = arith.constant 0 : i32
    return %arg0, %arg1 : i32, i32
  }
}

module attributes {stable_mosaic.version = 11 : i64} {
  func.func @kernel(%arg0: i32, %arg1: i32, %arg2: memref<8x512xbf16, #tpu.memory_space<vmem>>, %arg3: memref<512x256xbf16, #tpu.memory_space<vmem>>, %arg4: memref<8x256xbf16, #tpu.memory_space<vmem>>) attributes {dimension_semantics = [#tpu.dimension_semantics<parallel>, #tpu.dimension_semantics<parallel>], iteration_bounds = array<i64: 1, 2>, scalar_prefetch = 0 : i64, scratch_operands = 0 : i64, tpu.core_type = #tpu.core_type<tc>, window_params = [{transform_indices = @transform_0, window_bounds = array<i64: 8, 512>}, {transform_indices = @transform_1, window_bounds = array<i64: 512, 256>}, {transform_indices = @transform_2, window_bounds = array<i64: 8, 256>}]} {
    %c0 = arith.constant 0 : index
    %c0_0 = arith.constant 0 : index
    %0 = vector.load %arg2[%c0, %c0_0] : memref<8x512xbf16, #tpu.memory_space<vmem>>, vector<8x512xbf16>
    %c0_1 = arith.constant 0 : index
    %c0_2 = arith.constant 0 : index
    %1 = vector.load %arg3[%c0_1, %c0_2] : memref<512x256xbf16, #tpu.memory_space<vmem>>, vector<512x256xbf16>
    %cst = arith.constant dense<0.000000e+00> : vector<8x256xf32>
    %2 = tpu.matmul %0, %1, %cst {dimension_numbers = #tpu.dot_dimension_numbers<[1], [0], [0], [1], [0, 0, 1, 1], [], []>} : vector<8x512xbf16>, vector<512x256xbf16>, vector<8x256xf32> -> vector<8x256xf32>
    %3 = arith.truncf %2 : vector<8x256xf32> to vector<8x256xbf16>
    %c0_3 = arith.constant 0 : index
    %c0_4 = arith.constant 0 : index
    %4 = vector.load %arg4[%c0_3, %c0_4] : memref<8x256xbf16, #tpu.memory_space<vmem>>, vector<8x256xbf16>
    tpu.vector_store %arg4[%c0_3, %c0_4], %3 {strides = array<i32>} : memref<8x256xbf16, #tpu.memory_space<vmem>>, vector<8x256xbf16>,
    return
  }
  func.func @transform_0(%arg0: i32, %arg1: i32) -> (i32, i32) {
    %c0_i32 = arith.constant 0 : i32
    %c0_i32_0 = arith.constant 0 : i32
    return %arg0, %c0_i32 : i32, i32
  }
  func.func @transform_1(%arg0: i32, %arg1: i32) -> (i32, i32) {
    %c0_i32 = arith.constant 0 : i32
    %c0_i32_0 = arith.constant 0 : i32
    return %c0_i32, %arg1 : i32, i32
  }
  func.func @transform_2(%arg0: i32, %arg1: i32) -> (i32, i32) {
    %c0_i32 = arith.constant 0 : i32
    return %arg0, %arg1 : i32, i32
  }
}

module attributes {stable_mosaic.version = 11 : i64} {
  func.func @kernel(%arg0: i32, %arg1: i32, %arg2: memref<8x128xbf16, #tpu.memory_space<vmem>>, %arg3: memref<128x256xbf16, #tpu.memory_space<vmem>>, %arg4: memref<8x256xbf16, #tpu.memory_space<vmem>>) attributes {dimension_semantics = [#tpu.dimension_semantics<parallel>, #tpu.dimension_semantics<parallel>], iteration_bounds = array<i64: 1, 2>, scalar_prefetch = 0 : i64, scratch_operands = 0 : i64, tpu.core_type = #tpu.core_type<tc>, window_params = [{transform_indices = @transform_0, window_bounds = array<i64: 8, 128>}, {transform_indices = @transform_1, window_bounds = array<i64: 128, 256>}, {transform_indices = @transform_2, window_bounds = array<i64: 8, 256>}]} {
    %c0 = arith.constant 0 : index
    %c0_0 = arith.constant 0 : index
    %0 = vector.load %arg2[%c0, %c0_0] : memref<8x128xbf16, #tpu.memory_space<vmem>>, vector<8x128xbf16>
    %c0_1 = arith.constant 0 : index
    %c0_2 = arith.constant 0 : index
    %1 = vector.load %arg3[%c0_1, %c0_2] : memref<128x256xbf16, #tpu.memory_space<vmem>>, vector<128x256xbf16>
    %cst = arith.constant dense<0.000000e+00> : vector<8x256xf32>
    %2 = tpu.matmul %0, %1, %cst {dimension_numbers = #tpu.dot_dimension_numbers<[1], [0], [0], [1], [0, 0, 1, 1], [], []>} : vector<8x128xbf16>, vector<128x256xbf16>, vector<8x256xf32> -> vector<8x256xf32>
    %3 = arith.truncf %2 : vector<8x256xf32> to vector<8x256xbf16>
    %c0_3 = arith.constant 0 : index
    %c0_4 = arith.constant 0 : index
    %4 = vector.load %arg4[%c0_3, %c0_4] : memref<8x256xbf16, #tpu.memory_space<vmem>>, vector<8x256xbf16>
    tpu.vector_store %arg4[%c0_3, %c0_4], %3 {strides = array<i32>} : memref<8x256xbf16, #tpu.memory_space<vmem>>, vector<8x256xbf16>,
    return
  }
  func.func @transform_0(%arg0: i32, %arg1: i32) -> (i32, i32) {
    %c0_i32 = arith.constant 0 : i32
    %c0_i32_0 = arith.constant 0 : i32
    return %arg0, %c0_i32 : i32, i32
  }
  func.func @transform_1(%arg0: i32, %arg1: i32) -> (i32, i32) {
    %c0_i32 = arith.constant 0 : i32
    %c0_i32_0 = arith.constant 0 : i32
    return %c0_i32, %arg1 : i32, i32
  }
  func.func @transform_2(%arg0: i32, %arg1: i32) -> (i32, i32) {
    %c0_i32 = arith.constant 0 : i32
    return %arg0, %arg1 : i32, i32
  }
}

module attributes {stable_mosaic.version = 11 : i64} {
  func.func @kernel(%arg0: i32, %arg1: i32, %arg2: memref<8x128xbf16, #tpu.memory_space<vmem>>, %arg3: memref<128x256xbf16, #tpu.memory_space<vmem>>, %arg4: memref<8x256xbf16, #tpu.memory_space<vmem>>) attributes {dimension_semantics = [#tpu.dimension_semantics<parallel>, #tpu.dimension_semantics<parallel>], iteration_bounds = array<i64: 1, 2>, scalar_prefetch = 0 : i64, scratch_operands = 0 : i64, tpu.core_type = #tpu.core_type<tc>, window_params = [{transform_indices = @transform_0, window_bounds = array<i64: 8, 128>}, {transform_indices = @transform_1, window_bounds = array<i64: 128, 256>}, {transform_indices = @transform_2, window_bounds = array<i64: 8, 256>}]} {
    %c0 = arith.constant 0 : index
    %c0_0 = arith.constant 0 : index
    %0 = vector.load %arg2[%c0, %c0_0] : memref<8x128xbf16, #tpu.memory_space<vmem>>, vector<8x128xbf16>
    %c0_1 = arith.constant 0 : index
    %c0_2 = arith.constant 0 : index
    %1 = vector.load %arg3[%c0_1, %c0_2] : memref<128x256xbf16, #tpu.memory_space<vmem>>, vector<128x256xbf16>
    %cst = arith.constant dense<0.000000e+00> : vector<8x256xf32>
    %2 = tpu.matmul %0, %1, %cst {dimension_numbers = #tpu.dot_dimension_numbers<[1], [0], [0], [1], [0, 0, 1, 1], [], []>} : vector<8x128xbf16>, vector<128x256xbf16>, vector<8x256xf32> -> vector<8x256xf32>
    %3 = arith.truncf %2 : vector<8x256xf32> to vector<8x256xbf16>
    %c0_3 = arith.constant 0 : index
    %c0_4 = arith.constant 0 : index
    %4 = vector.load %arg4[%c0_3, %c0_4] : memref<8x256xbf16, #tpu.memory_space<vmem>>, vector<8x256xbf16>
    tpu.vector_store %arg4[%c0_3, %c0_4], %3 {strides = array<i32>} : memref<8x256xbf16, #tpu.memory_space<vmem>>, vector<8x256xbf16>,
    return
  }
  func.func @transform_0(%arg0: i32, %arg1: i32) -> (i32, i32) {
    %c0_i32 = arith.constant 0 : i32
    %c0_i32_0 = arith.constant 0 : i32
    return %arg0, %c0_i32 : i32, i32
  }
  func.func @transform_1(%arg0: i32, %arg1: i32) -> (i32, i32) {
    %c0_i32 = arith.constant 0 : i32
    %c0_i32_0 = arith.constant 0 : i32
    return %c0_i32, %arg1 : i32, i32
  }
  func.func @transform_2(%arg0: i32, %arg1: i32) -> (i32, i32) {
    %c0_i32 = arith.constant 0 : i32
    return %arg0, %arg1 : i32, i32
  }
}

module attributes {stable_mosaic.version = 11 : i64} {
  func.func @kernel(%arg0: i32, %arg1: i32, %arg2: memref<8x128xbf16, #tpu.memory_space<vmem>>, %arg3: memref<128x256xbf16, #tpu.memory_space<vmem>>, %arg4: memref<8x256xf32, #tpu.memory_space<vmem>>) attributes {dimension_semantics = [#tpu.dimension_semantics<parallel>, #tpu.dimension_semantics<parallel>], iteration_bounds = array<i64: 1, 2>, scalar_prefetch = 0 : i64, scratch_operands = 0 : i64, tpu.core_type = #tpu.core_type<tc>, window_params = [{transform_indices = @transform_0, window_bounds = array<i64: 8, 128>}, {transform_indices = @transform_1, window_bounds = array<i64: 128, 256>}, {transform_indices = @transform_2, window_bounds = array<i64: 8, 256>}]} {
    %c0 = arith.constant 0 : index
    %c0_0 = arith.constant 0 : index
    %0 = vector.load %arg2[%c0, %c0_0] : memref<8x128xbf16, #tpu.memory_space<vmem>>, vector<8x128xbf16>
    %c0_1 = arith.constant 0 : index
    %c0_2 = arith.constant 0 : index
    %1 = vector.load %arg3[%c0_1, %c0_2] : memref<128x256xbf16, #tpu.memory_space<vmem>>, vector<128x256xbf16>
    %cst = arith.constant dense<0.000000e+00> : vector<8x256xf32>
    %2 = tpu.matmul %0, %1, %cst {dimension_numbers = #tpu.dot_dimension_numbers<[1], [0], [0], [1], [0, 0, 1, 1], [], []>} : vector<8x128xbf16>, vector<128x256xbf16>, vector<8x256xf32> -> vector<8x256xf32>
    %cst_3 = arith.constant 0.000000e+00 : f32
    %3 = vector.broadcast %cst_3 : f32 to vector<8x256xf32>
    %4 = arith.subf %3, %2 : vector<8x256xf32>
    %5 = math.exp %4 : vector<8x256xf32>
    %cst_4 = arith.constant 1.000000e+00 : f32
    %6 = vector.broadcast %cst_4 : f32 to vector<8x256xf32>
    %7 = arith.addf %6, %5 : vector<8x256xf32>
    %cst_5 = arith.constant 1.000000e+00 : f32
    %8 = vector.broadcast %cst_5 : f32 to vector<8x256xf32>
    %9 = arith.divf %8, %7 : vector<8x256xf32>
    %c0_6 = arith.constant 0 : index
    %c0_7 = arith.constant 0 : index
    %10 = vector.load %arg4[%c0_6, %c0_7] : memref<8x256xf32, #tpu.memory_space<vmem>>, vector<8x256xf32>
    tpu.vector_store %arg4[%c0_6, %c0_7], %9 {strides = array<i32>} : memref<8x256xf32, #tpu.memory_space<vmem>>, vector<8x256xf32>,
    return
  }
  func.func @transform_0(%arg0: i32, %arg1: i32) -> (i32, i32) {
    %c0_i32 = arith.constant 0 : i32
    %c0_i32_0 = arith.constant 0 : i32
    return %arg0, %c0_i32 : i32, i32
  }
  func.func @transform_1(%arg0: i32, %arg1: i32) -> (i32, i32) {
    %c0_i32 = arith.constant 0 : i32
    %c0_i32_0 = arith.constant 0 : i32
    return %c0_i32, %arg1 : i32, i32
  }
  func.func @transform_2(%arg0: i32, %arg1: i32) -> (i32, i32) {
    %c0_i32 = arith.constant 0 : i32
    return %arg0, %arg1 : i32, i32
  }
}

</mosaic_0001>

<bundles_post_ra>
// kernel: forward.25
= control target key start
LH: loop header
LB: loop body
LE: loop exit
PB: predicated region body
PF: predicated region fallthrough
CT: control target
= control target key end

     0   :  { %s691_s9 = smov 0   ;;  %s693_s10 = smov 0   ;;  %s777_s0 = inlined_call_operand.vmem [shape: bf16[8,128], index: 0, kind: input, shape index: {}]   ;;  %s778_s1 = inlined_call_operand.vmem [shape: bf16[128,512], index: 1, kind: input, shape index: {}]   ;;  %s779_s2 = inlined_call_operand.vmem [shape: bf16[8,512], index: 2, kind: output, shape index: {}]  }
   0x1   :  { %s695_s11 = smov 0   ;;  %s697_s12 = smov 0  }
   0x2   :  { %s699_s13 = smov 0  }
   0x3 LB: > { %s21_s14 = sadd.s32 1, %s669_s12  ;;  %p64_p1 = scmp.ne.s32.totalorder %s661_s10, %s657_s9  ;;  %s673_s13 = sphi %s699_s13, %s12_s13   ;;  %s669_s12 = sphi %s697_s12, %s783_s12   ;;  %s665_s11 = sphi %s695_s11, %s782_s11   ;;  %s661_s10 = sphi %s693_s10, %s781_s10   ;;  %s657_s9 = sphi %s691_s9, %s780_s9  }
   0x4   : > { %p22_p0 = scmp.ge.s32.totalorder %s21_s14, 2  ;;  %p65_p2 = scmp.eq.s32.totalorder %s673_s13, 0 }
   0x5   : > { %s57_s16 = sadd.s32 1, %s661_s10  ;;  %p541_p5 = scmp.ge.s32.totalorder %s673_s13, 2 }
   0x6   : > { %s785_s14 = smov (%p22_p0, %s21_s14), 0  ;;  %p66_p3 = por %p65_p2, %p64_p1 }
   0x7   : > { %s54_s15 = ssub.s32 %s669_s12, %s785_s14  ;;  %125 = sbr.rel (%p541_p5) target bundleno = 24 (0x18), region = 20 }
   0x8   : > { %p55_p4 = scmp.eq.s32.totalorder %s54_s15, 0 }
   0xa   : > { %s726_s17 = scalar_select %p55_p4, %s661_s10, %s57_s16  }
   0xc   : > { %128 = sbr.rel (!%p66_p3) target bundleno = 24 (0x18), region = 24  ;;  %s130_s18 = sand.u32 (%p66_p3), 1, %s661_s10  }
   0xd   : > { %s568_s19 = sshll.u32 (%p66_p3), %s669_s12, 3  ;;  %s542_s20 = sshll.u32 (%p66_p3), %s130_s18, 7 }
   0xe   : > { %s734_s23 = scalar_lea.vmem (%p66_p3), %s778_s1, %s568_s19  ;;  %s132_s24 = scalar_lea.vmem (%p66_p3), [#allocation2], %s542_s20 }
   0xf   : > { %v194_v0 = vld [vmem:[%s734_s23] sm:$0xff] (%p66_p3)  ;;  %v196_v1 = vld [vmem:[%s734_s23 + $0x10] sm:$0xff] (%p66_p3) }
  0x10   : > { %v198_v2 = vld [vmem:[%s734_s23 + $0x20] sm:$0xff] (%p66_p3)  ;;  %195 = vst [vmem:[%s132_s24] sm:$0xff] (%p66_p3), %v194_v0  ;;  %197 = vst [vmem:[%s132_s24 + $0x8] sm:$0xff] (%p66_p3), %v196_v1  ;;  %v200_v3 = vld [vmem:[%s734_s23 + $0x30] sm:$0xff] (%p66_p3) }
  0x11   : > { %199 = vst [vmem:[%s132_s24 + $0x10] sm:$0xff] %v198_v2  ;;  %v202_v4 = vld [vmem:[%s734_s23 + $0x40] sm:$0xff]  ;;  %v204_v5 = vld [vmem:[%s734_s23 + $0x50] sm:$0xff]  ;;  %201 = vst [vmem:[%s132_s24 + $0x18] sm:$0xff] %v200_v3 }
  0x12   : > { %203 = vst [vmem:[%s132_s24 + $0x20] sm:$0xff] %v202_v4  ;;  %205 = vst [vmem:[%s132_s24 + $0x28] sm:$0xff] %v204_v5  ;;  %v206_v6 = vld [vmem:[%s734_s23 + $0x60] sm:$0xff]  ;;  %v208_v7 = vld [vmem:[%s734_s23 + $0x70] sm:$0xff] }
  0x13   : > { %v210_v8 = vld [vmem:[%s734_s23 + $0x80] sm:$0xff]  ;;  %207 = vst [vmem:[%s132_s24 + $0x30] sm:$0xff] %v206_v6  ;;  %209 = vst [vmem:[%s132_s24 + $0x38] sm:$0xff] %v208_v7  ;;  %v212_v9 = vld [vmem:[%s734_s23 + $0x90] sm:$0xff] }
  0x14   : > { %211 = vst [vmem:[%s132_s24 + $0x40] sm:$0xff] %v210_v8  ;;  %v214_v10 = vld [vmem:[%s734_s23 + $0xa0] sm:$0xff]  ;;  %v216_v11 = vld [vmem:[%s734_s23 + $0xb0] sm:$0xff]  ;;  %213 = vst [vmem:[%s132_s24 + $0x48] sm:$0xff] %v212_v9 }
  0x15   : > { %215 = vst [vmem:[%s132_s24 + $0x50] sm:$0xff] %v214_v10  ;;  %217 = vst [vmem:[%s132_s24 + $0x58] sm:$0xff] %v216_v11  ;;  %v218_v12 = vld [vmem:[%s734_s23 + $0xc0] sm:$0xff]  ;;  %v220_v13 = vld [vmem:[%s734_s23 + $0xd0] sm:$0xff] }
  0x16   : > { %v222_v14 = vld [vmem:[%s734_s23 + $0xe0] sm:$0xff]  ;;  %219 = vst [vmem:[%s132_s24 + $0x60] sm:$0xff] %v218_v12  ;;  %221 = vst [vmem:[%s132_s24 + $0x68] sm:$0xff] %v220_v13  ;;  %v224_v15 = vld [vmem:[%s734_s23 + $0xf0] sm:$0xff] }
  0x17   : > { %223 = vst [vmem:[%s132_s24 + $0x70] sm:$0xff] %v222_v14  ;;  %225 = vst [vmem:[%s132_s24 + $0x78] sm:$0xff] %v224_v15 }
  0x18 PF: > { %p545_p6 = scmp.ge.s32.totalorder %s673_s13, 1  ;;  %p230_p7 = scmp.lt.s32.totalorder %s673_s13, 3 }
  0x1a   : > { %p231_p8 = pnand %p545_p6, %p230_p7 }
  0x1b   : > { %s237_s25 = sand.u32 (!%p231_p8), 1, %s657_s9   ;;  %s547_s30 = sshll.u32 (!%p231_p8), %s665_s11, 1 }
  0x1c   : > { %234 = sbr.rel (%p231_p8) target bundleno = 267 (0x10b), region = 62  ;;  %s546_s26 = sshll.u32 (!%p231_p8), %s237_s25, 7 }
  0x1d   : > { %s239_s27 = scalar_lea.vmem (!%p231_p8), [#allocation2], %s546_s26  ;;  %p274_p9 = scmp.lt.s32.totalorder (!%p231_p8), %s547_s30, 3 }
  0x21   : > { %v675_v16 = vmov 0   ;;  %v611_v17 = vld [vmem:[%s239_s27 + $0x74] ss:$8 sps:$4 sm:$0xff]   ;;  %v613_v18 = vld [vmem:[%s239_s27 + $0x70] ss:$8 sps:$4 sm:$0xff]   ;;  %s787_s30 = smov (!%p274_p9, %s547_s30), 3 }
  0x22   : > { %411 = vmatprep.mubr.bf16.mxu0 %v675_v16  ;;  %379 = vmatprep.subr.bf16.mxu0 %v611_v17  ;;  %v614_v19 = vld [vmem:[%s239_s27 + $0x64] ss:$8 sps:$4 sm:$0xff]   ;;  %v616_v20 = vld [vmem:[%s239_s27 + $0x60] ss:$8 sps:$4 sm:$0xff]   ;;  %v617_v21 = vld [vmem:[%s239_s27 + $0x54] ss:$8 sps:$4 sm:$0xff]  }
  0x23   : > { %380 = vmatpush1.bf16.msra.mxu0 %v613_v18  ;;  %v619_v22 = vld [vmem:[%s239_s27 + $0x50] ss:$8 sps:$4 sm:$0xff]   ;;  %v620_v23 = vld [vmem:[%s239_s27 + $0x44] ss:$8 sps:$4 sm:$0xff]   ;;  %v622_v24 = vld [vmem:[%s239_s27 + $0x40] ss:$8 sps:$4 sm:$0xff]  }
  0x24   : > { %381 = vmatprep.subr.bf16.mxu0 %v614_v19  ;;  %v623_v25 = vld [vmem:[%s239_s27 + $0x34] ss:$8 sps:$4 sm:$0xff]   ;;  %v625_v26 = vld [vmem:[%s239_s27 + $0x30] ss:$8 sps:$4 sm:$0xff]   ;;  %v626_v27 = vld [vmem:[%s239_s27 + $0x24] ss:$8 sps:$4 sm:$0xff]  }
  0x25   : > { %v628_v28 = vld [vmem:[%s239_s27 + $0x20] ss:$8 sps:$4 sm:$0xff]   ;;  %v629_v29 = vld [vmem:[%s239_s27 + $0x14] ss:$8 sps:$4 sm:$0xff]   ;;  %v631_v30 = vld [vmem:[%s239_s27 + $0x10] ss:$8 sps:$4 sm:$0xff]  }
  0x26   : > { %v632_v31 = vld [vmem:[%s239_s27 + $0x4] ss:$8 sps:$4 sm:$0xff]   ;;  %v634_v32 = vld [vmem:[%s239_s27] ss:$8 sps:$4 sm:$0xff]   ;;  %s548_s3 = sshll.u32 %s787_s30, 2 }
  0x27   : > { %382 = vmatpush1.bf16.msra.mxu0 %v616_v20  ;;  %v282_v33 = vld [vmem:[%s777_s0] sm:$0xf]  ;;  %s279_s6 = scalar_lea.vmem %s779_s2, %s548_s3 }
  0x28   : > { %383 = vmatprep.subr.bf16.mxu0 %v617_v21 }
  0x2b   : > { %384 = vmatpush1.bf16.msra.mxu0 %v619_v22 }
  0x2c   : > { %385 = vmatprep.subr.bf16.mxu0 %v620_v23 }
  0x2f   : > { %386 = vmatpush1.bf16.msra.mxu0 %v622_v24 }
  0x30   : > { %387 = vmatprep.subr.bf16.mxu0 %v623_v25 }
  0x33   : > { %388 = vmatpush1.bf16.msra.mxu0 %v625_v26 }
  0x34   : > { %389 = vmatprep.subr.bf16.mxu0 %v626_v27 }
  0x37   : > { %390 = vmatpush1.bf16.msra.mxu0 %v628_v28 }
  0x38   : > { %391 = vmatprep.subr.bf16.mxu0 %v629_v29 }
  0x3b   : > { %392 = vmatpush1.bf16.msra.mxu0 %v631_v30 }
  0x3c   : > { %393 = vmatprep.subr.bf16.mxu0 %v632_v31 }
  0x3f   : > { %394 = vmatpush1.bf16.msra.mxu0 %v634_v32 }
  0x42   : > { %412 = vmatmul.mubr.bf16.vlgmr.msra.gmra.mxu0 %v282_v33 }
 0x102   : > { %v413_v34 = vpop.f32.mrf.mxu0 }
 0x103   : > { %v422_v35 = vmul.f32 0.01, %v413_v34  ;;  %vm420_vm0 = vcmp.ge.f32.partialorder %v413_v34, 0.0 }
 0x104   : > { %v415_v36 = vpop.f32.mrf.mxu0 }
 0x105   : > { %vm421_vm1 = vcmp.ge.f32.partialorder %v415_v36, 0.0  ;;  %v423_v37 = vmul.f32 0.01, %v415_v36  ;;  %v424_v39 = vsel %vm420_vm0, %v413_v34, %v422_v35 }
 0x106   : > { %v417_v38 = vpop.f32.mrf.mxu0 }
 0x107   : > { %v425_v40 = vsel %vm421_vm1, %v415_v36, %v423_v37 }
 0x108   : > { %v569_v41 = vpack.c.bf16 %v425_v40, %v424_v39  ;;  %v418_v42 = vpop.f32.mrf.mxu0 }
 0x10a   : > { %434 = vst [vmem:[%s279_s6] sm:$0xff] %v569_v41 }
 0x10b PF: > { %s12_s13 = sadd.s32 1, %s673_s13   ;;  %s780_s9 = smov %s661_s10 }
 0x10c   : > { %p9_p10 = scmp.ge.s32.totalorder %s12_s13, 4   ;;  %s781_s10 = smov %s726_s17 }
 0x10d   : > { %s782_s11 = smov %s669_s12  ;;  %s783_s12 = smov %s785_s14 }
 0x10e   :  { %11 = sbr.rel (!%p9_p10) target bundleno = 3 (0x3), region = 104 }

// kernel: forward.26
= control target key start
LH: loop header
LB: loop body
LE: loop exit
PB: predicated region body
PF: predicated region fallthrough
CT: control target
= control target key end

     0   :  { %s685_s9 = smov 0   ;;  %s687_s10 = smov 0   ;;  %s771_s0 = inlined_call_operand.vmem [shape: bf16[8,128], index: 0, kind: input, shape index: {}]   ;;  %s772_s1 = inlined_call_operand.vmem [shape: bf16[128,512], index: 1, kind: input, shape index: {}]   ;;  %s773_s2 = inlined_call_operand.vmem [shape: bf16[8,512], index: 2, kind: output, shape index: {}]  }
   0x1   :  { %s689_s11 = smov 0   ;;  %s691_s12 = smov 0  }
   0x2   :  { %s693_s13 = smov 0  }
   0x3 LB: > { %s21_s14 = sadd.s32 1, %s663_s12  ;;  %p64_p1 = scmp.ne.s32.totalorder %s655_s10, %s651_s9  ;;  %s667_s13 = sphi %s693_s13, %s12_s13   ;;  %s663_s12 = sphi %s691_s12, %s777_s12   ;;  %s659_s11 = sphi %s689_s11, %s776_s11   ;;  %s655_s10 = sphi %s687_s10, %s775_s10   ;;  %s651_s9 = sphi %s685_s9, %s774_s9  }
   0x4   : > { %p22_p0 = scmp.ge.s32.totalorder %s21_s14, 2  ;;  %p65_p2 = scmp.eq.s32.totalorder %s667_s13, 0 }
   0x5   : > { %s57_s16 = sadd.s32 1, %s655_s10  ;;  %p535_p5 = scmp.ge.s32.totalorder %s667_s13, 2 }
   0x6   : > { %s779_s14 = smov (%p22_p0, %s21_s14), 0  ;;  %p66_p3 = por %p65_p2, %p64_p1 }
   0x7   : > { %s54_s15 = ssub.s32 %s663_s12, %s779_s14  ;;  %125 = sbr.rel (%p535_p5) target bundleno = 24 (0x18), region = 20 }
   0x8   : > { %p55_p4 = scmp.eq.s32.totalorder %s54_s15, 0 }
   0xa   : > { %s720_s17 = scalar_select %p55_p4, %s655_s10, %s57_s16  }
   0xc   : > { %128 = sbr.rel (!%p66_p3) target bundleno = 24 (0x18), region = 24  ;;  %s130_s18 = sand.u32 (%p66_p3), 1, %s655_s10  }
   0xd   : > { %s562_s19 = sshll.u32 (%p66_p3), %s663_s12, 3  ;;  %s536_s20 = sshll.u32 (%p66_p3), %s130_s18, 7 }
   0xe   : > { %s728_s23 = scalar_lea.vmem (%p66_p3), %s772_s1, %s562_s19  ;;  %s132_s24 = scalar_lea.vmem (%p66_p3), [#allocation2], %s536_s20 }
   0xf   : > { %v194_v0 = vld [vmem:[%s728_s23] sm:$0xff] (%p66_p3)  ;;  %v196_v1 = vld [vmem:[%s728_s23 + $0x10] sm:$0xff] (%p66_p3) }
  0x10   : > { %v198_v2 = vld [vmem:[%s728_s23 + $0x20] sm:$0xff] (%p66_p3)  ;;  %195 = vst [vmem:[%s132_s24] sm:$0xff] (%p66_p3), %v194_v0  ;;  %197 = vst [vmem:[%s132_s24 + $0x8] sm:$0xff] (%p66_p3), %v196_v1  ;;  %v200_v3 = vld [vmem:[%s728_s23 + $0x30] sm:$0xff] (%p66_p3) }
  0x11   : > { %199 = vst [vmem:[%s132_s24 + $0x10] sm:$0xff] %v198_v2  ;;  %v202_v4 = vld [vmem:[%s728_s23 + $0x40] sm:$0xff]  ;;  %v204_v5 = vld [vmem:[%s728_s23 + $0x50] sm:$0xff]  ;;  %201 = vst [vmem:[%s132_s24 + $0x18] sm:$0xff] %v200_v3 }
  0x12   : > { %203 = vst [vmem:[%s132_s24 + $0x20] sm:$0xff] %v202_v4  ;;  %205 = vst [vmem:[%s132_s24 + $0x28] sm:$0xff] %v204_v5  ;;  %v206_v6 = vld [vmem:[%s728_s23 + $0x60] sm:$0xff]  ;;  %v208_v7 = vld [vmem:[%s728_s23 + $0x70] sm:$0xff] }
  0x13   : > { %v210_v8 = vld [vmem:[%s728_s23 + $0x80] sm:$0xff]  ;;  %207 = vst [vmem:[%s132_s24 + $0x30] sm:$0xff] %v206_v6  ;;  %209 = vst [vmem:[%s132_s24 + $0x38] sm:$0xff] %v208_v7  ;;  %v212_v9 = vld [vmem:[%s728_s23 + $0x90] sm:$0xff] }
  0x14   : > { %211 = vst [vmem:[%s132_s24 + $0x40] sm:$0xff] %v210_v8  ;;  %v214_v10 = vld [vmem:[%s728_s23 + $0xa0] sm:$0xff]  ;;  %v216_v11 = vld [vmem:[%s728_s23 + $0xb0] sm:$0xff]  ;;  %213 = vst [vmem:[%s132_s24 + $0x48] sm:$0xff] %v212_v9 }
  0x15   : > { %215 = vst [vmem:[%s132_s24 + $0x50] sm:$0xff] %v214_v10  ;;  %217 = vst [vmem:[%s132_s24 + $0x58] sm:$0xff] %v216_v11  ;;  %v218_v12 = vld [vmem:[%s728_s23 + $0xc0] sm:$0xff]  ;;  %v220_v13 = vld [vmem:[%s728_s23 + $0xd0] sm:$0xff] }
  0x16   : > { %v222_v14 = vld [vmem:[%s728_s23 + $0xe0] sm:$0xff]  ;;  %219 = vst [vmem:[%s132_s24 + $0x60] sm:$0xff] %v218_v12  ;;  %221 = vst [vmem:[%s132_s24 + $0x68] sm:$0xff] %v220_v13  ;;  %v224_v15 = vld [vmem:[%s728_s23 + $0xf0] sm:$0xff] }
  0x17   : > { %223 = vst [vmem:[%s132_s24 + $0x70] sm:$0xff] %v222_v14  ;;  %225 = vst [vmem:[%s132_s24 + $0x78] sm:$0xff] %v224_v15 }
  0x18 PF: > { %p539_p6 = scmp.ge.s32.totalorder %s667_s13, 1  ;;  %p230_p7 = scmp.lt.s32.totalorder %s667_s13, 3 }
  0x1a   : > { %p231_p8 = pnand %p539_p6, %p230_p7 }
  0x1b   : > { %s237_s25 = sand.u32 (!%p231_p8), 1, %s651_s9   ;;  %s541_s30 = sshll.u32 (!%p231_p8), %s659_s11, 1 }
  0x1c   : > { %234 = sbr.rel (%p231_p8) target bundleno = 265 (0x109), region = 62  ;;  %s540_s26 = sshll.u32 (!%p231_p8), %s237_s25, 7 }
  0x1d   : > { %s239_s27 = scalar_lea.vmem (!%p231_p8), [#allocation2], %s540_s26  ;;  %p274_p9 = scmp.lt.s32.totalorder (!%p231_p8), %s541_s30, 3 }
  0x21   : > { %v669_v16 = vmov 0   ;;  %v605_v17 = vld [vmem:[%s239_s27 + $0x74] ss:$8 sps:$4 sm:$0xff]   ;;  %v607_v18 = vld [vmem:[%s239_s27 + $0x70] ss:$8 sps:$4 sm:$0xff]   ;;  %s781_s30 = smov (!%p274_p9, %s541_s30), 3 }
  0x22   : > { %411 = vmatprep.mubr.bf16.mxu0 %v669_v16  ;;  %379 = vmatprep.subr.bf16.mxu0 %v605_v17  ;;  %v608_v19 = vld [vmem:[%s239_s27 + $0x64] ss:$8 sps:$4 sm:$0xff]   ;;  %v610_v20 = vld [vmem:[%s239_s27 + $0x60] ss:$8 sps:$4 sm:$0xff]   ;;  %v611_v21 = vld [vmem:[%s239_s27 + $0x54] ss:$8 sps:$4 sm:$0xff]  }
  0x23   : > { %380 = vmatpush1.bf16.msra.mxu0 %v607_v18  ;;  %v613_v22 = vld [vmem:[%s239_s27 + $0x50] ss:$8 sps:$4 sm:$0xff]   ;;  %v614_v23 = vld [vmem:[%s239_s27 + $0x44] ss:$8 sps:$4 sm:$0xff]   ;;  %v616_v24 = vld [vmem:[%s239_s27 + $0x40] ss:$8 sps:$4 sm:$0xff]  }
  0x24   : > { %381 = vmatprep.subr.bf16.mxu0 %v608_v19  ;;  %v617_v25 = vld [vmem:[%s239_s27 + $0x34] ss:$8 sps:$4 sm:$0xff]   ;;  %v619_v26 = vld [vmem:[%s239_s27 + $0x30] ss:$8 sps:$4 sm:$0xff]   ;;  %v620_v27 = vld [vmem:[%s239_s27 + $0x24] ss:$8 sps:$4 sm:$0xff]  }
  0x25   : > { %v622_v28 = vld [vmem:[%s239_s27 + $0x20] ss:$8 sps:$4 sm:$0xff]   ;;  %v623_v29 = vld [vmem:[%s239_s27 + $0x14] ss:$8 sps:$4 sm:$0xff]   ;;  %v625_v30 = vld [vmem:[%s239_s27 + $0x10] ss:$8 sps:$4 sm:$0xff]  }
  0x26   : > { %v626_v31 = vld [vmem:[%s239_s27 + $0x4] ss:$8 sps:$4 sm:$0xff]   ;;  %v628_v32 = vld [vmem:[%s239_s27] ss:$8 sps:$4 sm:$0xff]   ;;  %s542_s3 = sshll.u32 %s781_s30, 2 }
  0x27   : > { %382 = vmatpush1.bf16.msra.mxu0 %v610_v20  ;;  %v282_v33 = vld [vmem:[%s771_s0] sm:$0xf]  ;;  %s279_s6 = scalar_lea.vmem %s773_s2, %s542_s3 }
  0x28   : > { %383 = vmatprep.subr.bf16.mxu0 %v611_v21 }
  0x2b   : > { %384 = vmatpush1.bf16.msra.mxu0 %v613_v22 }
  0x2c   : > { %385 = vmatprep.subr.bf16.mxu0 %v614_v23 }
  0x2f   : > { %386 = vmatpush1.bf16.msra.mxu0 %v616_v24 }
  0x30   : > { %387 = vmatprep.subr.bf16.mxu0 %v617_v25 }
  0x33   : > { %388 = vmatpush1.bf16.msra.mxu0 %v619_v26 }
  0x34   : > { %389 = vmatprep.subr.bf16.mxu0 %v620_v27 }
  0x37   : > { %390 = vmatpush1.bf16.msra.mxu0 %v622_v28 }
  0x38   : > { %391 = vmatprep.subr.bf16.mxu0 %v623_v29 }
  0x3b   : > { %392 = vmatpush1.bf16.msra.mxu0 %v625_v30 }
  0x3c   : > { %393 = vmatprep.subr.bf16.mxu0 %v626_v31 }
  0x3f   : > { %394 = vmatpush1.bf16.msra.mxu0 %v628_v32 }
  0x42   : > { %412 = vmatmul.mubr.bf16.vlgmr.msra.gmra.mxu0 %v282_v33 }
 0x102   : > { %v413_v34 = vpop.f32.mrf.mxu0 }
 0x104   : > { %v415_v35 = vpop.f32.mrf.mxu0 }
 0x105   : > { %v563_v36 = vpack.c.bf16 %v415_v35, %v413_v34 }
 0x106   : > { %v417_v37 = vpop.f32.mrf.mxu0 }
 0x107   : > { %428 = vst [vmem:[%s279_s6] sm:$0xff] %v563_v36 }
 0x108   : > { %v418_v38 = vpop.f32.mrf.mxu0 }
 0x109 PF: > { %s12_s13 = sadd.s32 1, %s667_s13   ;;  %s774_s9 = smov %s655_s10 }
 0x10a   : > { %p9_p10 = scmp.ge.s32.totalorder %s12_s13, 4   ;;  %s775_s10 = smov %s720_s17 }
 0x10b   : > { %s776_s11 = smov %s663_s12  ;;  %s777_s12 = smov %s779_s14 }
 0x10c   :  { %11 = sbr.rel (!%p9_p10) target bundleno = 3 (0x3), region = 104 }

// kernel: forward.28
= control target key start
LH: loop header
LB: loop body
LE: loop exit
PB: predicated region body
PF: predicated region fallthrough
CT: control target
= control target key end

     0   :  { %v197_v0 = vmov 0.0   ;;  %vm198_vm0 = vmmov 0   ;;  %s244_s1 = inlined_call_operand.vmem [shape: bf16[128,128], index: 1, kind: input, shape index: {}]   ;;  %s245_s0 = inlined_call_operand.vmem [shape: bf16[16,128], index: 0, kind: input, shape index: {}]   ;;  %s246_s2 = inlined_call_operand.vmem [shape: bf16[16,128], index: 2, kind: output, shape index: {}]  }
   0x1   :  { %166 = vmatprep.subr.bf16.mxu0 %v197_v0  ;;  %v188_v1 = vld [vmem:[%s244_s1 + $0x38] sm:$0xff]   ;;  %182 = vmatprep.mubr.msk.bf16.mxu0 %vm198_vm0, %v197_v0  ;;  %v189_v2 = vld [vmem:[%s244_s1 + $0x30] sm:$0xff]   ;;  %v190_v3 = vld [vmem:[%s244_s1 + $0x28] sm:$0xff]  }
   0x2   :  { %167 = vmatpush3.bf16.msra.mxu0 %v188_v1  ;;  %v191_v4 = vld [vmem:[%s244_s1 + $0x20] sm:$0xff]   ;;  %v192_v5 = vld [vmem:[%s244_s1 + $0x18] sm:$0xff]   ;;  %v193_v6 = vld [vmem:[%s244_s1 + $0x10] sm:$0xff]  }
   0x3   :  { %168 = vmatprep.subr.bf16.mxu0 %v197_v0  ;;  %v194_v7 = vld [vmem:[%s244_s1 + $0x8] sm:$0xff]   ;;  %v195_v8 = vld [vmem:[%s244_s1] sm:$0xff]  }
   0x4   :  { %v196_v9 = vld [vmem:[%s245_s0] sm:$0xff]  }
   0x6   :  { %169 = vmatpush3.bf16.msra.mxu0 %v189_v2 }
   0x7   :  { %170 = vmatprep.subr.bf16.mxu0 %v197_v0 }
   0xa   :  { %171 = vmatpush3.bf16.msra.mxu0 %v190_v3 }
   0xb   :  { %172 = vmatprep.subr.bf16.mxu0 %v197_v0 }
   0xe   :  { %173 = vmatpush3.bf16.msra.mxu0 %v191_v4 }
   0xf   :  { %174 = vmatprep.subr.bf16.mxu0 %v197_v0 }
  0x12   :  { %175 = vmatpush3.bf16.msra.mxu0 %v192_v5 }
  0x13   :  { %176 = vmatprep.subr.bf16.mxu0 %v197_v0 }
  0x16   :  { %177 = vmatpush3.bf16.msra.mxu0 %v193_v6 }
  0x17   :  { %178 = vmatprep.subr.bf16.mxu0 %v197_v0 }
  0x1a   :  { %179 = vmatpush3.bf16.msra.mxu0 %v194_v7 }
  0x1b   :  { %180 = vmatprep.subr.bf16.mxu0 %v197_v0 }
  0x1e   :  { %181 = vmatpush3.bf16.msra.mxu0 %v195_v8 }
  0x21   :  { %183 = vmatmul.mubr.bf16.vlgmr.msra.gmra.mxu0 %v196_v9 }
  0xe1   :  { %v118_v10 = vpop.f32.mrf.mxu0 }
  0xe3   :  { %v184_v11 = vpop.f32.mrf.mxu0 }
  0xe5   :  { %v121_v12 = vpop.f32.mrf.mxu0 }
  0xe6   :  { %v155_v13 = vpack.c.bf16 %v121_v12, %v118_v10 }
  0xe7   :  { %v185_v14 = vpop.f32.mrf.mxu0 }
  0xe8   :  { %156 = vst [vmem:[%s246_s2] sm:$0xff] %v155_v13  }

// kernel: forward.29
= control target key start
LH: loop header
LB: loop body
LE: loop exit
PB: predicated region body
PF: predicated region fallthrough
CT: control target
= control target key end

     0   :  { %s347_s1 = inlined_call_operand.vmem [shape: bf16[256,128], index: 1, kind: input, shape index: {}]   ;;  %s348_s0 = inlined_call_operand.vmem [shape: bf16[16,256], index: 0, kind: input, shape index: {}]   ;;  %s349_s2 = inlined_call_operand.vmem [shape: bf16[16,128], index: 2, kind: output, shape index: {}]  }
   0x1   :  { %v256_v0 = vld [vmem:[%s347_s1 + $0x78] sm:$0xff]   ;;  %v258_v2 = vld [vmem:[%s347_s1 + $0x70] sm:$0xff]   ;;  %v260_v4 = vld [vmem:[%s347_s1 + $0x68] sm:$0xff]  }
   0x2   :  { %v257_v1 = vld [vmem:[%s347_s1 + $0x38] sm:$0xff]   ;;  %234 = vmatprep.subr.bf16.mxu0 %v256_v0  ;;  %v259_v3 = vld [vmem:[%s347_s1 + $0x30] sm:$0xff]   ;;  %v261_v5 = vld [vmem:[%s347_s1 + $0x28] sm:$0xff]  }
   0x3   :  { %235 = vmatpush3.bf16.msra.mxu0 %v257_v1  ;;  %v262_v6 = vld [vmem:[%s347_s1 + $0x60] sm:$0xff]   ;;  %v264_v8 = vld [vmem:[%s347_s1 + $0x58] sm:$0xff]   ;;  %v266_v10 = vld [vmem:[%s347_s1 + $0x50] sm:$0xff]  }
   0x4   :  { %236 = vmatprep.subr.bf16.mxu0 %v258_v2  ;;  %v263_v7 = vld [vmem:[%s347_s1 + $0x20] sm:$0xff]   ;;  %v265_v9 = vld [vmem:[%s347_s1 + $0x18] sm:$0xff]   ;;  %v267_v12 = vld [vmem:[%s347_s1 + $0x10] sm:$0xff]  }
   0x5   :  { %v274_v11 = vld [vmem:[%s348_s0 + $0x4] ss:$8 sps:$4 sm:$0xff]   ;;  %v272_v17 = vld [vmem:[%s348_s0] ss:$8 sps:$4 sm:$0xff]  }
   0x6   :  { %184 = vmatprep.mubr.bf16.mxu0 %v274_v11  ;;  %v268_v13 = vld [vmem:[%s347_s1 + $0x48] sm:$0xff]   ;;  %v270_v15 = vld [vmem:[%s347_s1 + $0x40] sm:$0xff]  }
   0x7   :  { %237 = vmatpush3.bf16.msra.mxu0 %v259_v3  ;;  %v269_v14 = vld [vmem:[%s347_s1 + $0x8] sm:$0xff]   ;;  %v271_v16 = vld [vmem:[%s347_s1] sm:$0xff]  }
   0x8   :  { %238 = vmatprep.subr.bf16.mxu0 %v260_v4 }
   0xb   :  { %239 = vmatpush3.bf16.msra.mxu0 %v261_v5 }
   0xc   :  { %240 = vmatprep.subr.bf16.mxu0 %v262_v6 }
   0xf   :  { %241 = vmatpush3.bf16.msra.mxu0 %v263_v7 }
  0x10   :  { %242 = vmatprep.subr.bf16.mxu0 %v264_v8 }
  0x13   :  { %243 = vmatpush3.bf16.msra.mxu0 %v265_v9 }
  0x14   :  { %244 = vmatprep.subr.bf16.mxu0 %v266_v10 }
  0x17   :  { %245 = vmatpush3.bf16.msra.mxu0 %v267_v12 }
  0x18   :  { %246 = vmatprep.subr.bf16.mxu0 %v268_v13 }
  0x1b   :  { %247 = vmatpush3.bf16.msra.mxu0 %v269_v14 }
  0x1c   :  { %248 = vmatprep.subr.bf16.mxu0 %v270_v15 }
  0x1f   :  { %249 = vmatpush3.bf16.msra.mxu0 %v271_v16 }
  0x22   :  { %185 = vmatmul.mubr.bf16.vlgmr.msra.gmra.mxu0 %v272_v17 }
  0xe2   :  { %v250_v18 = vpop.f32.mrf.mxu0 }
  0xe4   :  { %v251_v19 = vpop.f32.mrf.mxu0 }
  0xe5   :  { %v252_v22 = vadd.f32 %v251_v19, %v250_v18 }
  0xe6   :  { %v253_v20 = vpop.f32.mrf.mxu0 }
  0xe8   :  { %v254_v21 = vpop.f32.mrf.mxu0 }
  0xe9   :  { %v255_v23 = vadd.f32 %v254_v21, %v253_v20 }
  0xeb   :  { %v232_v24 = vpack.c.bf16 %v255_v23, %v252_v22 }
  0xed   :  { %233 = vst [vmem:[%s349_s2] sm:$0xff] %v232_v24  }

// kernel: forward.30
= control target key start
LH: loop header
LB: loop body
LE: loop exit
PB: predicated region body
PF: predicated region fallthrough
CT: control target
= control target key end

     0   :  { %v197_v0 = vmov 0.0   ;;  %vm198_vm0 = vmmov 0   ;;  %s244_s1 = inlined_call_operand.vmem [shape: bf16[128,128], index: 1, kind: input, shape index: {}]   ;;  %s245_s0 = inlined_call_operand.vmem [shape: bf16[16,128], index: 0, kind: input, shape index: {}]   ;;  %s246_s2 = inlined_call_operand.vmem [shape: bf16[16,128], index: 2, kind: output, shape index: {}]  }
   0x1   :  { %166 = vmatprep.subr.bf16.mxu0 %v197_v0  ;;  %v188_v1 = vld [vmem:[%s244_s1 + $0x38] sm:$0xff]   ;;  %182 = vmatprep.mubr.msk.bf16.mxu0 %vm198_vm0, %v197_v0  ;;  %v189_v2 = vld [vmem:[%s244_s1 + $0x30] sm:$0xff]   ;;  %v190_v3 = vld [vmem:[%s244_s1 + $0x28] sm:$0xff]  }
   0x2   :  { %167 = vmatpush3.bf16.msra.mxu0 %v188_v1  ;;  %v191_v4 = vld [vmem:[%s244_s1 + $0x20] sm:$0xff]   ;;  %v192_v5 = vld [vmem:[%s244_s1 + $0x18] sm:$0xff]   ;;  %v193_v6 = vld [vmem:[%s244_s1 + $0x10] sm:$0xff]  }
   0x3   :  { %168 = vmatprep.subr.bf16.mxu0 %v197_v0  ;;  %v194_v7 = vld [vmem:[%s244_s1 + $0x8] sm:$0xff]   ;;  %v195_v8 = vld [vmem:[%s244_s1] sm:$0xff]  }
   0x4   :  { %v196_v9 = vld [vmem:[%s245_s0] sm:$0xff]  }
   0x6   :  { %169 = vmatpush3.bf16.msra.mxu0 %v189_v2 }
   0x7   :  { %170 = vmatprep.subr.bf16.mxu0 %v197_v0 }
   0xa   :  { %171 = vmatpush3.bf16.msra.mxu0 %v190_v3 }
   0xb   :  { %172 = vmatprep.subr.bf16.mxu0 %v197_v0 }
   0xe   :  { %173 = vmatpush3.bf16.msra.mxu0 %v191_v4 }
   0xf   :  { %174 = vmatprep.subr.bf16.mxu0 %v197_v0 }
  0x12   :  { %175 = vmatpush3.bf16.msra.mxu0 %v192_v5 }
  0x13   :  { %176 = vmatprep.subr.bf16.mxu0 %v197_v0 }
  0x16   :  { %177 = vmatpush3.bf16.msra.mxu0 %v193_v6 }
  0x17   :  { %178 = vmatprep.subr.bf16.mxu0 %v197_v0 }
  0x1a   :  { %179 = vmatpush3.bf16.msra.mxu0 %v194_v7 }
  0x1b   :  { %180 = vmatprep.subr.bf16.mxu0 %v197_v0 }
  0x1e   :  { %181 = vmatpush3.bf16.msra.mxu0 %v195_v8 }
  0x21   :  { %183 = vmatmul.mubr.bf16.vlgmr.msra.gmra.mxu0 %v196_v9 }
  0xe1   :  { %v118_v10 = vpop.f32.mrf.mxu0 }
  0xe3   :  { %v184_v11 = vpop.f32.mrf.mxu0 }
  0xe5   :  { %v121_v12 = vpop.f32.mrf.mxu0 }
  0xe6   :  { %v155_v13 = vpack.c.bf16 %v121_v12, %v118_v10 }
  0xe7   :  { %v185_v14 = vpop.f32.mrf.mxu0 }
  0xe8   :  { %156 = vst [vmem:[%s246_s2] sm:$0xff] %v155_v13  }

// kernel: forward.31
= control target key start
LH: loop header
LB: loop body
LE: loop exit
PB: predicated region body
PF: predicated region fallthrough
CT: control target
= control target key end

     0   :  { %s423_s1 = inlined_call_operand.vmem [shape: bf16[256,128], index: 1, kind: input, shape index: {}]   ;;  %s424_s0 = inlined_call_operand.vmem [shape: bf16[32,256], index: 0, kind: input, shape index: {}]   ;;  %s425_s2 = inlined_call_operand.vmem [shape: bf16[32,128], index: 2, kind: output, shape index: {}]  }
   0x1   :  { %v320_v0 = vld [vmem:[%s423_s1 + $0x78] sm:$0xff]   ;;  %v322_v2 = vld [vmem:[%s423_s1 + $0x70] sm:$0xff]   ;;  %v324_v4 = vld [vmem:[%s423_s1 + $0x68] sm:$0xff]  }
   0x2   :  { %v321_v1 = vld [vmem:[%s423_s1 + $0x38] sm:$0xff]   ;;  %276 = vmatprep.subr.bf16.mxu0 %v320_v0  ;;  %304 = vmatprep.subr.bf16.mxu1 %v320_v0  ;;  %v323_v3 = vld [vmem:[%s423_s1 + $0x30] sm:$0xff]   ;;  %v325_v5 = vld [vmem:[%s423_s1 + $0x28] sm:$0xff]  }
   0x3   :  { %277 = vmatpush3.bf16.msra.mxu0 %v321_v1  ;;  %312 = vmatpush3.bf16.msra.mxu1 %v321_v1  ;;  %v326_v6 = vld [vmem:[%s423_s1 + $0x60] sm:$0xff]   ;;  %v328_v8 = vld [vmem:[%s423_s1 + $0x58] sm:$0xff]   ;;  %v330_v10 = vld [vmem:[%s423_s1 + $0x50] sm:$0xff]  }
   0x4   :  { %278 = vmatprep.subr.bf16.mxu0 %v322_v2  ;;  %305 = vmatprep.subr.bf16.mxu1 %v322_v2  ;;  %v327_v7 = vld [vmem:[%s423_s1 + $0x20] sm:$0xff]   ;;  %v329_v9 = vld [vmem:[%s423_s1 + $0x18] sm:$0xff]   ;;  %v331_v13 = vld [vmem:[%s423_s1 + $0x10] sm:$0xff]  }
   0x5   :  { %v338_v11 = vld [vmem:[%s424_s0 + $0x4] ss:$8 sps:$4 sm:$0xff]   ;;  %v341_v12 = vld [vmem:[%s424_s0 + $0x14] ss:$8 sps:$4 sm:$0xff]   ;;  %v336_v18 = vld [vmem:[%s424_s0] ss:$8 sps:$4 sm:$0xff]  }
   0x6   :  { %v332_v14 = vld [vmem:[%s423_s1 + $0x48] sm:$0xff]   ;;  %196 = vmatprep.mubr.bf16.mxu0 %v338_v11  ;;  %204 = vmatprep.mubr.bf16.mxu1 %v341_v12  ;;  %v334_v16 = vld [vmem:[%s423_s1 + $0x40] sm:$0xff]   ;;  %v339_v19 = vld [vmem:[%s424_s0 + $0x10] ss:$8 sps:$4 sm:$0xff]  }
   0x7   :  { %279 = vmatpush3.bf16.msra.mxu0 %v323_v3  ;;  %313 = vmatpush3.bf16.msra.mxu1 %v323_v3  ;;  %v333_v15 = vld [vmem:[%s423_s1 + $0x8] sm:$0xff]   ;;  %v335_v17 = vld [vmem:[%s423_s1] sm:$0xff]  }
   0x8   :  { %280 = vmatprep.subr.bf16.mxu0 %v324_v4  ;;  %306 = vmatprep.subr.bf16.mxu1 %v324_v4 }
   0xb   :  { %281 = vmatpush3.bf16.msra.mxu0 %v325_v5  ;;  %314 = vmatpush3.bf16.msra.mxu1 %v325_v5 }
   0xc   :  { %282 = vmatprep.subr.bf16.mxu0 %v326_v6  ;;  %307 = vmatprep.subr.bf16.mxu1 %v326_v6 }
   0xf   :  { %283 = vmatpush3.bf16.msra.mxu0 %v327_v7  ;;  %315 = vmatpush3.bf16.msra.mxu1 %v327_v7 }
  0x10   :  { %284 = vmatprep.subr.bf16.mxu0 %v328_v8  ;;  %308 = vmatprep.subr.bf16.mxu1 %v328_v8 }
  0x13   :  { %285 = vmatpush3.bf16.msra.mxu0 %v329_v9  ;;  %316 = vmatpush3.bf16.msra.mxu1 %v329_v9 }
  0x14   :  { %286 = vmatprep.subr.bf16.mxu0 %v330_v10  ;;  %309 = vmatprep.subr.bf16.mxu1 %v330_v10 }
  0x17   :  { %287 = vmatpush3.bf16.msra.mxu0 %v331_v13  ;;  %317 = vmatpush3.bf16.msra.mxu1 %v331_v13 }
  0x18   :  { %288 = vmatprep.subr.bf16.mxu0 %v332_v14  ;;  %310 = vmatprep.subr.bf16.mxu1 %v332_v14 }
  0x1b   :  { %289 = vmatpush3.bf16.msra.mxu0 %v333_v15  ;;  %318 = vmatpush3.bf16.msra.mxu1 %v333_v15 }
  0x1c   :  { %290 = vmatprep.subr.bf16.mxu0 %v334_v16  ;;  %311 = vmatprep.subr.bf16.mxu1 %v334_v16 }
  0x1f   :  { %291 = vmatpush3.bf16.msra.mxu0 %v335_v17  ;;  %319 = vmatpush3.bf16.msra.mxu1 %v335_v17 }
  0x22   :  { %197 = vmatmul.mubr.bf16.vlgmr.msra.gmra.mxu0 %v336_v18  ;;  %205 = vmatmul.mubr.bf16.vlgmr.msra.gmra.mxu1 %v339_v19 }
  0xe2   :  { %v292_v20 = vpop.f32.mrf.mxu0  ;;  %v298_v21 = vpop.f32.mrf.mxu1 }
  0xe4   :  { %v293_v22 = vpop.f32.mrf.mxu0  ;;  %v299_v23 = vpop.f32.mrf.mxu1 }
  0xe5   :  { %v294_v28 = vadd.f32 %v293_v22, %v292_v20  ;;  %v300_v29 = vadd.f32 %v299_v23, %v298_v21 }
  0xe6   :  { %v295_v24 = vpop.f32.mrf.mxu0  ;;  %v301_v25 = vpop.f32.mrf.mxu1 }
  0xe8   :  { %v296_v26 = vpop.f32.mrf.mxu0  ;;  %v302_v27 = vpop.f32.mrf.mxu1 }
  0xe9   :  { %v297_v30 = vadd.f32 %v296_v26, %v295_v24  ;;  %v303_v31 = vadd.f32 %v302_v27, %v301_v25 }
  0xeb   :  { %v268_v32 = vpack.c.bf16 %v297_v30, %v294_v28  ;;  %v273_v33 = vpack.c.bf16 %v303_v31, %v300_v29 }
  0xed   :  { %269 = vst [vmem:[%s425_s2] sm:$0xff] %v268_v32   ;;  %275 = vst [vmem:[%s425_s2 + $0x8] sm:$0xff] %v273_v33  }

// kernel: forward.33
= control target key start
LH: loop header
LB: loop body
LE: loop exit
PB: predicated region body
PF: predicated region fallthrough
CT: control target
= control target key end

     0   :  { %s285_s1 = inlined_call_operand.vmem [shape: bf16[128,128], index: 1, kind: input, shape index: {}]   ;;  %s286_s0 = inlined_call_operand.vmem [shape: bf16[32,128], index: 0, kind: input, shape index: {}]   ;;  %s287_s2 = inlined_call_operand.vmem [shape: bf16[32,128], index: 2, kind: output, shape index: {}]  }
   0x1   :  { %v224_v0 = vld [vmem:[%s285_s1 + $0x38] sm:$0xff]   ;;  %v225_v1 = vld [vmem:[%s285_s1 + $0x30] sm:$0xff]   ;;  %v226_v2 = vld [vmem:[%s285_s1 + $0x28] sm:$0xff]  }
   0x2   :  { %204 = vmatprep.subr.bf16.mxu0 %v224_v0  ;;  %v227_v3 = vld [vmem:[%s285_s1 + $0x20] sm:$0xff]   ;;  %v228_v5 = vld [vmem:[%s285_s1 + $0x18] sm:$0xff]   ;;  %v229_v6 = vld [vmem:[%s285_s1 + $0x10] sm:$0xff]  }
   0x3   :  { %205 = vmatpush3.bf16.msra.mxu0 %v224_v0  ;;  %v232_v4 = vld [vmem:[%s286_s0] sm:$0xff]   ;;  %v230_v7 = vld [vmem:[%s285_s1 + $0x8] sm:$0xff]  }
   0x4   :  { %206 = vmatprep.subr.bf16.mxu0 %v225_v1  ;;  %220 = vmatprep.mubr.bf16.mxu0 %v232_v4  ;;  %v231_v8 = vld [vmem:[%s285_s1] sm:$0xff]   ;;  %v233_v9 = vld [vmem:[%s286_s0 + $0x8] sm:$0xff]  }
   0x7   :  { %207 = vmatpush3.bf16.msra.mxu0 %v225_v1 }
   0x8   :  { %208 = vmatprep.subr.bf16.mxu0 %v226_v2 }
   0xb   :  { %209 = vmatpush3.bf16.msra.mxu0 %v226_v2 }
   0xc   :  { %210 = vmatprep.subr.bf16.mxu0 %v227_v3 }
   0xf   :  { %211 = vmatpush3.bf16.msra.mxu0 %v227_v3 }
  0x10   :  { %212 = vmatprep.subr.bf16.mxu0 %v228_v5 }
  0x13   :  { %213 = vmatpush3.bf16.msra.mxu0 %v228_v5 }
  0x14   :  { %214 = vmatprep.subr.bf16.mxu0 %v229_v6 }
  0x17   :  { %215 = vmatpush3.bf16.msra.mxu0 %v229_v6 }
  0x18   :  { %216 = vmatprep.subr.bf16.mxu0 %v230_v7 }
  0x1b   :  { %217 = vmatpush3.bf16.msra.mxu0 %v230_v7 }
  0x1c   :  { %218 = vmatprep.subr.bf16.mxu0 %v231_v8 }
  0x1f   :  { %219 = vmatpush3.bf16.msra.mxu0 %v231_v8 }
  0x22   :  { %221 = vmatmul.mubr.bf16.vlgmr.msra.gmra.mxu0 %v233_v9 }
  0xe2   :  { %v222_v10 = vpop.f32.mrf.mxu0 }
  0xe4   :  { %v126_v11 = vpop.f32.mrf.mxu0 }
  0xe6   :  { %v223_v12 = vpop.f32.mrf.mxu0 }
  0xe7   :  { %v191_v13 = vpack.c.bf16 %v223_v12, %v222_v10 }
  0xe8   :  { %v129_v14 = vpop.f32.mrf.mxu0 }
  0xe9   :  { %193 = vst [vmem:[%s287_s2 + $0x8] sm:$0xff] %v191_v13   ;;  %v186_v15 = vpack.c.bf16 %v129_v14, %v126_v11 }
  0xeb   :  { %187 = vst [vmem:[%s287_s2] sm:$0xff] %v186_v15  }

// kernel: forward.32
= control target key start
LH: loop header
LB: loop body
LE: loop exit
PB: predicated region body
PF: predicated region fallthrough
CT: control target
= control target key end

     0   :  { %s616_s1 = inlined_call_operand.vmem [shape: bf16[384,128], index: 1, kind: input, shape index: {}]   ;;  %s617_s0 = inlined_call_operand.vmem [shape: bf16[32,384], index: 0, kind: input, shape index: {}]   ;;  %s618_s2 = inlined_call_operand.vmem [shape: bf16[32,128], index: 2, kind: output, shape index: {}]  }
   0x1   :  { %v473_v0 = vld [vmem:[%s616_s1 + $0x78] sm:$0xff]   ;;  %v476_v3 = vld [vmem:[%s616_s1 + $0x70] sm:$0xff]   ;;  %v479_v6 = vld [vmem:[%s616_s1 + $0x68] sm:$0xff]  }
   0x2   :  { %v474_v1 = vld [vmem:[%s616_s1 + $0x38] sm:$0xff]   ;;  %415 = vmatprep.subr.bf16.mxu0 %v473_v0  ;;  %v477_v4 = vld [vmem:[%s616_s1 + $0x30] sm:$0xff]   ;;  %v480_v7 = vld [vmem:[%s616_s1 + $0x28] sm:$0xff]  }
   0x3   :  { %v475_v2 = vld [vmem:[%s616_s1 + $0xb8] sm:$0xff]   ;;  %416 = vmatpush3.bf16.msra.mxu0 %v474_v1  ;;  %v478_v5 = vld [vmem:[%s616_s1 + $0xb0] sm:$0xff]   ;;  %v481_v8 = vld [vmem:[%s616_s1 + $0xa8] sm:$0xff]  }
   0x4   :  { %453 = vmatprep.subr.bf16.mxu1 %v475_v2  ;;  %417 = vmatprep.subr.bf16.mxu0 %v476_v3  ;;  %v482_v9 = vld [vmem:[%s616_s1 + $0x60] sm:$0xff]   ;;  %v485_v12 = vld [vmem:[%s616_s1 + $0x58] sm:$0xff]   ;;  %v488_v15 = vld [vmem:[%s616_s1 + $0x50] sm:$0xff]  }
   0x5   :  { %454 = vmatpush3.bf16.msra.mxu1 %v475_v2  ;;  %v483_v10 = vld [vmem:[%s616_s1 + $0x20] sm:$0xff]   ;;  %v487_v13 = vld [vmem:[%s616_s1 + $0x98] sm:$0xff]   ;;  %v490_v16 = vld [vmem:[%s616_s1 + $0x90] sm:$0xff]  }
   0x6   :  { %455 = vmatprep.subr.bf16.mxu1 %v478_v5  ;;  %v484_v11 = vld [vmem:[%s616_s1 + $0xa0] sm:$0xff]   ;;  %v486_v14 = vld [vmem:[%s616_s1 + $0x18] sm:$0xff]   ;;  %v489_v17 = vld [vmem:[%s616_s1 + $0x10] sm:$0xff]  }
   0x7   :  { %418 = vmatpush3.bf16.msra.mxu0 %v477_v4  ;;  %v491_v18 = vld [vmem:[%s616_s1 + $0x48] sm:$0xff]   ;;  %v494_v21 = vld [vmem:[%s616_s1 + $0x40] sm:$0xff]  }
   0x8   :  { %419 = vmatprep.subr.bf16.mxu0 %v479_v6  ;;  %v492_v19 = vld [vmem:[%s616_s1 + $0x8] sm:$0xff]   ;;  %v496_v22 = vld [vmem:[%s616_s1 + $0x80] sm:$0xff]  }
   0x9   :  { %456 = vmatpush3.bf16.msra.mxu1 %v478_v5  ;;  %v493_v20 = vld [vmem:[%s616_s1 + $0x88] sm:$0xff]   ;;  %v499_v23 = vld [vmem:[%s617_s0 + $0x4] ss:$12 sps:$4 sm:$0xff]  }
   0xa   :  { %457 = vmatprep.subr.bf16.mxu1 %v481_v8  ;;  %v500_v24 = vld [vmem:[%s617_s0 + $0x8] ss:$12 sps:$4 sm:$0xff]   ;;  %v495_v25 = vld [vmem:[%s616_s1] sm:$0xff]   ;;  %276 = vmatprep.mubr.bf16.mxu0 %v499_v23 }
   0xb   :  { %420 = vmatpush3.bf16.msra.mxu0 %v480_v7  ;;  %469 = vmatprep.mubr.bf16.mxu1 %v500_v24  ;;  %v497_v26 = vld [vmem:[%s617_s0] ss:$12 sps:$4 sm:$0xff]   ;;  %v502_v27 = vld [vmem:[%s617_s0 + $0x1c] ss:$12 sps:$4 sm:$0xff]   ;;  %v504_v29 = vld [vmem:[%s617_s0 + $0x18] ss:$12 sps:$4 sm:$0xff]  }
   0xc   :  { %421 = vmatprep.subr.bf16.mxu0 %v482_v9  ;;  %v501_v28 = vld [vmem:[%s617_s0 + $0x20] ss:$12 sps:$4 sm:$0xff]  }
   0xd   :  { %458 = vmatpush3.bf16.msra.mxu1 %v481_v8 }
   0xe   :  { %459 = vmatprep.subr.bf16.mxu1 %v484_v11 }
   0xf   :  { %422 = vmatpush3.bf16.msra.mxu0 %v483_v10 }
  0x10   :  { %423 = vmatprep.subr.bf16.mxu0 %v485_v12 }
  0x11   :  { %460 = vmatpush3.bf16.msra.mxu1 %v484_v11 }
  0x12   :  { %461 = vmatprep.subr.bf16.mxu1 %v487_v13 }
  0x13   :  { %424 = vmatpush3.bf16.msra.mxu0 %v486_v14 }
  0x14   :  { %425 = vmatprep.subr.bf16.mxu0 %v488_v15 }
  0x15   :  { %462 = vmatpush3.bf16.msra.mxu1 %v487_v13 }
  0x16   :  { %463 = vmatprep.subr.bf16.mxu1 %v490_v16 }
  0x17   :  { %426 = vmatpush3.bf16.msra.mxu0 %v489_v17 }
  0x18   :  { %427 = vmatprep.subr.bf16.mxu0 %v491_v18 }
  0x19   :  { %464 = vmatpush3.bf16.msra.mxu1 %v490_v16 }
  0x1a   :  { %465 = vmatprep.subr.bf16.mxu1 %v493_v20 }
  0x1b   :  { %428 = vmatpush3.bf16.msra.mxu0 %v492_v19 }
  0x1c   :  { %429 = vmatprep.subr.bf16.mxu0 %v494_v21 }
  0x1d   :  { %466 = vmatpush3.bf16.msra.mxu1 %v493_v20 }
  0x1e   :  { %467 = vmatprep.subr.bf16.mxu1 %v496_v22 }
  0x1f   :  { %430 = vmatpush3.bf16.msra.mxu0 %v495_v25 }
  0x21   :  { %468 = vmatpush3.bf16.msra.mxu1 %v496_v22 }
  0x22   :  { %277 = vmatmul.mubr.bf16.vlgmr.msra.gmra.mxu0 %v497_v26 }
  0x23   :  { %284 = vmatprep.mubr.bf16.mxu0 %v502_v27 }
  0x24   :  { %470 = vmatmul.mubr.bf16.vlgmr.msra.gmra.mxu1 %v501_v28 }
  0x2a   :  { %285 = vmatmul.mubr.bf16.gmra.mxu0 %v504_v29 }
  0xe2   :  { %v431_v30 = vpop.f32.mrf.mxu0 }
  0xe4   :  { %v432_v31 = vpop.f32.mrf.mxu0  ;;  %v471_v32 = vpop.f32.mrf.mxu1 }
  0xe5   :  { %v433_v35 = vadd.f32 %v432_v31, %v431_v30 }
  0xe6   :  { %v434_v33 = vpop.f32.mrf.mxu0  ;;  %v327_v34 = vpop.f32.mrf.mxu1 }
  0xe7   :  { %v328_v41 = vadd.f32 %v433_v35, %v327_v34 }
  0xe8   :  { %v435_v36 = vpop.f32.mrf.mxu0  ;;  %v472_v37 = vpop.f32.mrf.mxu1 }
  0xe9   :  { %v436_v38 = vadd.f32 %v435_v36, %v434_v33 }
  0xea   :  { %v437_v39 = vpop.f32.mrf.mxu0  ;;  %v330_v40 = vpop.f32.mrf.mxu1 }
  0xeb   :  { %v331_v42 = vadd.f32 %v436_v38, %v330_v40 }
  0xec   :  { %v438_v43 = vpop.f32.mrf.mxu0 }
  0xed   :  { %v407_v44 = vpack.c.bf16 %v331_v42, %v328_v41  ;;  %v439_v46 = vadd.f32 %v438_v43, %v437_v39 }
  0xee   :  { %v440_v45 = vpop.f32.mrf.mxu0 }
  0xef   :  { %408 = vst [vmem:[%s618_s2] sm:$0xff] %v407_v44   ;;  %v336_v49 = vadd.f32 %v471_v32, %v439_v46 }
  0xf0   :  { %v441_v47 = vpop.f32.mrf.mxu0 }
  0xf1   :  { %v442_v48 = vadd.f32 %v441_v47, %v440_v45 }
  0xf3   :  { %v339_v50 = vadd.f32 %v472_v37, %v442_v48 }
  0xf5   :  { %v412_v51 = vpack.c.bf16 %v339_v50, %v336_v49 }
  0xf7   :  { %414 = vst [vmem:[%s618_s2 + $0x8] sm:$0xff] %v412_v51  }

// kernel: forward.34
= control target key start
LH: loop header
LB: loop body
LE: loop exit
PB: predicated region body
PF: predicated region fallthrough
CT: control target
= control target key end

     0   :  { %s784_s1 = inlined_call_operand.vmem [shape: bf16[384,128], index: 1, kind: input, shape index: {}]   ;;  %s785_s0 = inlined_call_operand.vmem [shape: bf16[64,384], index: 0, kind: input, shape index: {}]   ;;  %s786_s2 = inlined_call_operand.vmem [shape: bf16[64,128], index: 2, kind: output, shape index: {}]  }
   0x1   :  { %v609_v0 = vld [vmem:[%s784_s1 + $0x78] sm:$0xff]   ;;  %v612_v3 = vld [vmem:[%s784_s1 + $0x70] sm:$0xff]   ;;  %v615_v6 = vld [vmem:[%s784_s1 + $0x68] sm:$0xff]  }
   0x2   :  { %v610_v1 = vld [vmem:[%s784_s1 + $0x38] sm:$0xff]   ;;  %533 = vmatprep.subr.bf16.mxu0 %v609_v0  ;;  %v613_v4 = vld [vmem:[%s784_s1 + $0x30] sm:$0xff]   ;;  %v616_v7 = vld [vmem:[%s784_s1 + $0x28] sm:$0xff]  }
   0x3   :  { %v611_v2 = vld [vmem:[%s784_s1 + $0xb8] sm:$0xff]   ;;  %534 = vmatpush3.bf16.msra.mxu0 %v610_v1  ;;  %v614_v5 = vld [vmem:[%s784_s1 + $0xb0] sm:$0xff]   ;;  %v617_v8 = vld [vmem:[%s784_s1 + $0xa8] sm:$0xff]  }
   0x4   :  { %585 = vmatprep.subr.bf16.mxu1 %v611_v2  ;;  %535 = vmatprep.subr.bf16.mxu0 %v612_v3  ;;  %v618_v9 = vld [vmem:[%s784_s1 + $0x60] sm:$0xff]   ;;  %v621_v12 = vld [vmem:[%s784_s1 + $0x58] sm:$0xff]   ;;  %v624_v15 = vld [vmem:[%s784_s1 + $0x50] sm:$0xff]  }
   0x5   :  { %586 = vmatpush3.bf16.msra.mxu1 %v611_v2  ;;  %v619_v10 = vld [vmem:[%s784_s1 + $0x20] sm:$0xff]   ;;  %v623_v13 = vld [vmem:[%s784_s1 + $0x98] sm:$0xff]   ;;  %v626_v16 = vld [vmem:[%s784_s1 + $0x90] sm:$0xff]  }
   0x6   :  { %587 = vmatprep.subr.bf16.mxu1 %v614_v5  ;;  %v620_v11 = vld [vmem:[%s784_s1 + $0xa0] sm:$0xff]   ;;  %v622_v14 = vld [vmem:[%s784_s1 + $0x18] sm:$0xff]   ;;  %v625_v17 = vld [vmem:[%s784_s1 + $0x10] sm:$0xff]  }
   0x7   :  { %536 = vmatpush3.bf16.msra.mxu0 %v613_v4  ;;  %v627_v18 = vld [vmem:[%s784_s1 + $0x48] sm:$0xff]   ;;  %v630_v21 = vld [vmem:[%s784_s1 + $0x40] sm:$0xff]   ;;  %v645_v32 = vld [vmem:[%s785_s0 + $0x50] ss:$12 sps:$4 sm:$0xff]  }
   0x8   :  { %537 = vmatprep.subr.bf16.mxu0 %v615_v6  ;;  %v628_v19 = vld [vmem:[%s784_s1 + $0x8] sm:$0xff]   ;;  %v632_v22 = vld [vmem:[%s784_s1 + $0x80] sm:$0xff]   ;;  %v643_v33 = vld [vmem:[%s785_s0 + $0x30] ss:$12 sps:$4 sm:$0xff]  }
   0x9   :  { %588 = vmatpush3.bf16.msra.mxu1 %v614_v5  ;;  %v629_v20 = vld [vmem:[%s784_s1 + $0x88] sm:$0xff]   ;;  %v635_v23 = vld [vmem:[%s785_s0 + $0x4] ss:$12 sps:$4 sm:$0xff]   ;;  %v641_v31 = vld [vmem:[%s785_s0 + $0x34] ss:$12 sps:$4 sm:$0xff]  }
   0xa   :  { %589 = vmatprep.subr.bf16.mxu1 %v617_v8  ;;  %v636_v24 = vld [vmem:[%s785_s0 + $0x8] ss:$12 sps:$4 sm:$0xff]   ;;  %v631_v25 = vld [vmem:[%s784_s1] sm:$0xff]   ;;  %316 = vmatprep.mubr.bf16.mxu0 %v635_v23  ;;  %v646_v34 = vld [vmem:[%s785_s0 + $0x4c] ss:$12 sps:$4 sm:$0xff]  }
   0xb   :  { %538 = vmatpush3.bf16.msra.mxu0 %v616_v7  ;;  %601 = vmatprep.mubr.bf16.mxu1 %v636_v24  ;;  %v633_v26 = vld [vmem:[%s785_s0] ss:$12 sps:$4 sm:$0xff]   ;;  %v638_v27 = vld [vmem:[%s785_s0 + $0x1c] ss:$12 sps:$4 sm:$0xff]   ;;  %v644_v29 = vld [vmem:[%s785_s0 + $0x38] ss:$12 sps:$4 sm:$0xff]  }
   0xc   :  { %539 = vmatprep.subr.bf16.mxu0 %v618_v9  ;;  %v637_v28 = vld [vmem:[%s785_s0 + $0x20] ss:$12 sps:$4 sm:$0xff]   ;;  %v640_v30 = vld [vmem:[%s785_s0 + $0x18] ss:$12 sps:$4 sm:$0xff]   ;;  %v648_v35 = vld [vmem:[%s785_s0 + $0x48] ss:$12 sps:$4 sm:$0xff]  }
   0xd   :  { %590 = vmatpush3.bf16.msra.mxu1 %v617_v8 }
   0xe   :  { %591 = vmatprep.subr.bf16.mxu1 %v620_v11 }
   0xf   :  { %540 = vmatpush3.bf16.msra.mxu0 %v619_v10 }
  0x10   :  { %541 = vmatprep.subr.bf16.mxu0 %v621_v12 }
  0x11   :  { %592 = vmatpush3.bf16.msra.mxu1 %v620_v11 }
  0x12   :  { %593 = vmatprep.subr.bf16.mxu1 %v623_v13 }
  0x13   :  { %542 = vmatpush3.bf16.msra.mxu0 %v622_v14 }
  0x14   :  { %543 = vmatprep.subr.bf16.mxu0 %v624_v15 }
  0x15   :  { %594 = vmatpush3.bf16.msra.mxu1 %v623_v13 }
  0x16   :  { %595 = vmatprep.subr.bf16.mxu1 %v626_v16 }
  0x17   :  { %544 = vmatpush3.bf16.msra.mxu0 %v625_v17 }
  0x18   :  { %545 = vmatprep.subr.bf16.mxu0 %v627_v18 }
  0x19   :  { %596 = vmatpush3.bf16.msra.mxu1 %v626_v16 }
  0x1a   :  { %597 = vmatprep.subr.bf16.mxu1 %v629_v20 }
  0x1b   :  { %546 = vmatpush3.bf16.msra.mxu0 %v628_v19 }
  0x1c   :  { %547 = vmatprep.subr.bf16.mxu0 %v630_v21 }
  0x1d   :  { %598 = vmatpush3.bf16.msra.mxu1 %v629_v20 }
  0x1e   :  { %599 = vmatprep.subr.bf16.mxu1 %v632_v22 }
  0x1f   :  { %548 = vmatpush3.bf16.msra.mxu0 %v631_v25 }
  0x21   :  { %600 = vmatpush3.bf16.msra.mxu1 %v632_v22 }
  0x22   :  { %317 = vmatmul.mubr.bf16.vlgmr.msra.gmra.mxu0 %v633_v26 }
  0x23   :  { %324 = vmatprep.mubr.bf16.mxu0 %v638_v27 }
  0x24   :  { %602 = vmatmul.mubr.bf16.vlgmr.msra.gmra.mxu1 %v637_v28 }
  0x25   :  { %605 = vmatprep.mubr.bf16.mxu1 %v644_v29 }
  0x2a   :  { %325 = vmatmul.mubr.bf16.gmra.mxu0 %v640_v30 }
  0x2b   :  { %332 = vmatprep.mubr.bf16.mxu0 %v641_v31 }
  0x2c   :  { %606 = vmatmul.mubr.bf16.gmra.mxu1 %v645_v32 }
  0x32   :  { %333 = vmatmul.mubr.bf16.gmra.mxu0 %v643_v33 }
  0x33   :  { %340 = vmatprep.mubr.bf16.mxu0 %v646_v34 }
  0x3a   :  { %341 = vmatmul.mubr.bf16.gmra.mxu0 %v648_v35 }
  0xe2   :  { %v549_v36 = vpop.f32.mrf.mxu0 }
  0xe4   :  { %v550_v37 = vpop.f32.mrf.mxu0  ;;  %v603_v38 = vpop.f32.mrf.mxu1 }
  0xe5   :  { %v551_v41 = vadd.f32 %v550_v37, %v549_v36 }
  0xe6   :  { %v552_v39 = vpop.f32.mrf.mxu0  ;;  %v383_v40 = vpop.f32.mrf.mxu1 }
  0xe7   :  { %v384_v47 = vadd.f32 %v551_v41, %v383_v40 }
  0xe8   :  { %v553_v42 = vpop.f32.mrf.mxu0  ;;  %v604_v43 = vpop.f32.mrf.mxu1 }
  0xe9   :  { %v554_v44 = vadd.f32 %v553_v42, %v552_v39 }
  0xea   :  { %v555_v45 = vpop.f32.mrf.mxu0  ;;  %v386_v46 = vpop.f32.mrf.mxu1 }
  0xeb   :  { %v387_v48 = vadd.f32 %v554_v44, %v386_v46 }
  0xec   :  { %v556_v49 = vpop.f32.mrf.mxu0  ;;  %v607_v50 = vpop.f32.mrf.mxu1 }
  0xed   :  { %v513_v51 = vpack.c.bf16 %v387_v48, %v384_v47  ;;  %v557_v53 = vadd.f32 %v556_v49, %v555_v45 }
  0xee   :  { %v558_v52 = vpop.f32.mrf.mxu0  ;;  %v399_v55 = vpop.f32.mrf.mxu1 }
  0xef   :  { %514 = vst [vmem:[%s786_s2] sm:$0xff] %v513_v51   ;;  %v392_v58 = vadd.f32 %v603_v38, %v557_v53 }
  0xf0   :  { %v559_v54 = vpop.f32.mrf.mxu0  ;;  %v608_v61 = vpop.f32.mrf.mxu1 }
  0xf1   :  { %v560_v56 = vadd.f32 %v559_v54, %v558_v52 }
  0xf2   :  { %v561_v57 = vpop.f32.mrf.mxu0  ;;  %v402_v2 = vpop.f32.mrf.mxu1 }
  0xf3   :  { %v395_v59 = vadd.f32 %v604_v43, %v560_v56 }
  0xf4   :  { %v562_v60 = vpop.f32.mrf.mxu0 }
  0xf5   :  { %v518_v62 = vpack.c.bf16 %v395_v59, %v392_v58  ;;  %v563_v0 = vadd.f32 %v562_v60, %v561_v57 }
  0xf6   :  { %v564_v63 = vpop.f32.mrf.mxu0 }
  0xf7   :  { %530 = vst [vmem:[%s786_s2 + $0x8] sm:$0xff] %v518_v62   ;;  %v400_v5 = vadd.f32 %v563_v0, %v399_v55 }
  0xf8   :  { %v565_v1 = vpop.f32.mrf.mxu0 }
  0xf9   :  { %v566_v3 = vadd.f32 %v565_v1, %v564_v63 }
  0xfa   :  { %v567_v4 = vpop.f32.mrf.mxu0 }
  0xfb   :  { %v403_v6 = vadd.f32 %v566_v3, %v402_v2 }
  0xfc   :  { %v568_v7 = vpop.f32.mrf.mxu0 }
  0xfd   :  { %v523_v8 = vpack.c.bf16 %v403_v6, %v400_v5  ;;  %v569_v10 = vadd.f32 %v568_v7, %v567_v4 }
  0xfe   :  { %v570_v9 = vpop.f32.mrf.mxu0 }
  0xff   :  { %531 = vst [vmem:[%s786_s2 + $0x10] sm:$0xff] %v523_v8   ;;  %v408_v13 = vadd.f32 %v607_v50, %v569_v10 }
 0x100   :  { %v571_v11 = vpop.f32.mrf.mxu0 }
 0x101   :  { %v572_v12 = vadd.f32 %v571_v11, %v570_v9 }
 0x103   :  { %v411_v14 = vadd.f32 %v608_v61, %v572_v12 }
 0x105   :  { %v528_v15 = vpack.c.bf16 %v411_v14, %v408_v13 }
 0x107   :  { %532 = vst [vmem:[%s786_s2 + $0x18] sm:$0xff] %v528_v15  }

// kernel: forward.36
= control target key start
LH: loop header
LB: loop body
LE: loop exit
PB: predicated region body
PF: predicated region fallthrough
CT: control target
= control target key end

     0   :  { %s395_s1 = inlined_call_operand.vmem [shape: bf16[128,128], index: 1, kind: input, shape index: {}]   ;;  %s396_s0 = inlined_call_operand.vmem [shape: bf16[64,128], index: 0, kind: input, shape index: {}]   ;;  %s397_s2 = inlined_call_operand.vmem [shape: bf16[64,128], index: 2, kind: output, shape index: {}]  }
   0x1   :  { %v320_v0 = vld [vmem:[%s395_s1 + $0x38] sm:$0xff]   ;;  %v321_v1 = vld [vmem:[%s395_s1 + $0x30] sm:$0xff]   ;;  %v322_v2 = vld [vmem:[%s395_s1 + $0x28] sm:$0xff]  }
   0x2   :  { %280 = vmatprep.subr.bf16.mxu0 %v320_v0  ;;  %304 = vmatprep.subr.bf16.mxu1 %v320_v0  ;;  %v323_v3 = vld [vmem:[%s395_s1 + $0x20] sm:$0xff]   ;;  %v329_v5 = vld [vmem:[%s396_s0 + $0x10] sm:$0xff]   ;;  %v324_v6 = vld [vmem:[%s395_s1 + $0x18] sm:$0xff]  }
   0x3   :  { %281 = vmatpush3.bf16.msra.mxu0 %v320_v0  ;;  %312 = vmatpush3.bf16.msra.mxu1 %v320_v0  ;;  %v328_v4 = vld [vmem:[%s396_s0] sm:$0xff]   ;;  %v325_v7 = vld [vmem:[%s395_s1 + $0x10] sm:$0xff]   ;;  %v326_v8 = vld [vmem:[%s395_s1 + $0x8] sm:$0xff]  }
   0x4   :  { %282 = vmatprep.subr.bf16.mxu0 %v321_v1  ;;  %305 = vmatprep.subr.bf16.mxu1 %v321_v1  ;;  %v327_v9 = vld [vmem:[%s395_s1] sm:$0xff]   ;;  %v330_v10 = vld [vmem:[%s396_s0 + $0x8] sm:$0xff]   ;;  %v331_v11 = vld [vmem:[%s396_s0 + $0x18] sm:$0xff]  }
   0x5   :  { %296 = vmatprep.mubr.bf16.mxu0 %v328_v4  ;;  %300 = vmatprep.mubr.bf16.mxu1 %v329_v5 }
   0x7   :  { %283 = vmatpush3.bf16.msra.mxu0 %v321_v1  ;;  %313 = vmatpush3.bf16.msra.mxu1 %v321_v1 }
   0x8   :  { %284 = vmatprep.subr.bf16.mxu0 %v322_v2  ;;  %306 = vmatprep.subr.bf16.mxu1 %v322_v2 }
   0xb   :  { %285 = vmatpush3.bf16.msra.mxu0 %v322_v2  ;;  %314 = vmatpush3.bf16.msra.mxu1 %v322_v2 }
   0xc   :  { %286 = vmatprep.subr.bf16.mxu0 %v323_v3  ;;  %307 = vmatprep.subr.bf16.mxu1 %v323_v3 }
   0xf   :  { %287 = vmatpush3.bf16.msra.mxu0 %v323_v3  ;;  %315 = vmatpush3.bf16.msra.mxu1 %v323_v3 }
  0x10   :  { %288 = vmatprep.subr.bf16.mxu0 %v324_v6  ;;  %308 = vmatprep.subr.bf16.mxu1 %v324_v6 }
  0x13   :  { %289 = vmatpush3.bf16.msra.mxu0 %v324_v6  ;;  %316 = vmatpush3.bf16.msra.mxu1 %v324_v6 }
  0x14   :  { %290 = vmatprep.subr.bf16.mxu0 %v325_v7  ;;  %309 = vmatprep.subr.bf16.mxu1 %v325_v7 }
  0x17   :  { %291 = vmatpush3.bf16.msra.mxu0 %v325_v7  ;;  %317 = vmatpush3.bf16.msra.mxu1 %v325_v7 }
  0x18   :  { %292 = vmatprep.subr.bf16.mxu0 %v326_v8  ;;  %310 = vmatprep.subr.bf16.mxu1 %v326_v8 }
  0x1b   :  { %293 = vmatpush3.bf16.msra.mxu0 %v326_v8  ;;  %318 = vmatpush3.bf16.msra.mxu1 %v326_v8 }
  0x1c   :  { %294 = vmatprep.subr.bf16.mxu0 %v327_v9  ;;  %311 = vmatprep.subr.bf16.mxu1 %v327_v9 }
  0x1f   :  { %295 = vmatpush3.bf16.msra.mxu0 %v327_v9  ;;  %319 = vmatpush3.bf16.msra.mxu1 %v327_v9 }
  0x22   :  { %297 = vmatmul.mubr.bf16.vlgmr.msra.gmra.mxu0 %v330_v10  ;;  %301 = vmatmul.mubr.bf16.vlgmr.msra.gmra.mxu1 %v331_v11 }
  0xe2   :  { %v298_v12 = vpop.f32.mrf.mxu0  ;;  %v302_v13 = vpop.f32.mrf.mxu1 }
  0xe4   :  { %v142_v14 = vpop.f32.mrf.mxu0  ;;  %v158_v15 = vpop.f32.mrf.mxu1 }
  0xe6   :  { %v299_v16 = vpop.f32.mrf.mxu0  ;;  %v303_v17 = vpop.f32.mrf.mxu1 }
  0xe7   :  { %v253_v18 = vpack.c.bf16 %v299_v16, %v298_v12  ;;  %v263_v19 = vpack.c.bf16 %v303_v17, %v302_v13 }
  0xe8   :  { %v145_v20 = vpop.f32.mrf.mxu0  ;;  %v161_v21 = vpop.f32.mrf.mxu1 }
  0xe9   :  { %265 = vst [vmem:[%s397_s2 + $0x8] sm:$0xff] %v253_v18   ;;  %267 = vst [vmem:[%s397_s2 + $0x18] sm:$0xff] %v263_v19   ;;  %v248_v22 = vpack.c.bf16 %v145_v20, %v142_v14  ;;  %v258_v23 = vpack.c.bf16 %v161_v21, %v158_v15 }
  0xeb   :  { %249 = vst [vmem:[%s397_s2] sm:$0xff] %v248_v22   ;;  %266 = vst [vmem:[%s397_s2 + $0x10] sm:$0xff] %v258_v23  }

// kernel: forward.35
= control target key start
LH: loop header
LB: loop body
LE: loop exit
PB: predicated region body
PF: predicated region fallthrough
CT: control target
= control target key end

     0   :  { %s1205_s1 = inlined_call_operand.vmem [shape: bf16[640,128], index: 1, kind: input, shape index: {}]   ;;  %s1206_s0 = inlined_call_operand.vmem [shape: bf16[64,640], index: 0, kind: input, shape index: {}]   ;;  %s1207_s2 = inlined_call_operand.vmem [shape: bf16[64,128], index: 2, kind: output, shape index: {}]  }
   0x1   :  { %v930_v0 = vld [vmem:[%s1205_s1 + $0x78] sm:$0xff]   ;;  %v934_v4 = vld [vmem:[%s1205_s1 + $0x70] sm:$0xff]   ;;  %v938_v8 = vld [vmem:[%s1205_s1 + $0x68] sm:$0xff]  }
   0x2   :  { %v931_v1 = vld [vmem:[%s1205_s1 + $0xf8] sm:$0xff]   ;;  %798 = vmatprep.subr.bf16.mxu0 %v930_v0  ;;  %v935_v5 = vld [vmem:[%s1205_s1 + $0xf0] sm:$0xff]   ;;  %v939_v9 = vld [vmem:[%s1205_s1 + $0xe8] sm:$0xff]  }
   0x3   :  { %v932_v2 = vld [vmem:[%s1205_s1 + $0x38] sm:$0xff]   ;;  %838 = vmatprep.subr.bf16.mxu1 %v931_v1  ;;  %v936_v6 = vld [vmem:[%s1205_s1 + $0x30] sm:$0xff]   ;;  %v940_v10 = vld [vmem:[%s1205_s1 + $0x28] sm:$0xff]  }
   0x4   :  { %v933_v3 = vld [vmem:[%s1205_s1 + $0xb8] sm:$0xff]   ;;  %799 = vmatpush3.bf16.msra.mxu0 %v932_v2  ;;  %v937_v7 = vld [vmem:[%s1205_s1 + $0xb0] sm:$0xff]   ;;  %v941_v11 = vld [vmem:[%s1205_s1 + $0xa8] sm:$0xff]  }
   0x5   :  { %839 = vmatpush3.bf16.msra.mxu1 %v933_v3  ;;  %800 = vmatprep.subr.bf16.mxu0 %v934_v4  ;;  %v942_v12 = vld [vmem:[%s1205_s1 + $0x60] sm:$0xff]   ;;  %v946_v16 = vld [vmem:[%s1205_s1 + $0x58] sm:$0xff]   ;;  %v950_v20 = vld [vmem:[%s1205_s1 + $0x50] sm:$0xff]  }
   0x6   :  { %840 = vmatprep.subr.bf16.mxu1 %v935_v5  ;;  %v943_v13 = vld [vmem:[%s1205_s1 + $0xe0] sm:$0xff]   ;;  %v947_v17 = vld [vmem:[%s1205_s1 + $0xd8] sm:$0xff]   ;;  %v951_v21 = vld [vmem:[%s1205_s1 + $0xd0] sm:$0xff]  }
   0x7   :  { %v944_v14 = vld [vmem:[%s1205_s1 + $0x20] sm:$0xff]   ;;  %v948_v18 = vld [vmem:[%s1205_s1 + $0x18] sm:$0xff]   ;;  %v952_v22 = vld [vmem:[%s1205_s1 + $0x10] sm:$0xff]  }
   0x8   :  { %801 = vmatpush3.bf16.msra.mxu0 %v936_v6  ;;  %v945_v15 = vld [vmem:[%s1205_s1 + $0xa0] sm:$0xff]   ;;  %v949_v19 = vld [vmem:[%s1205_s1 + $0x98] sm:$0xff]   ;;  %v953_v23 = vld [vmem:[%s1205_s1 + $0x90] sm:$0xff]  }
   0x9   :  { %841 = vmatpush3.bf16.msra.mxu1 %v937_v7  ;;  %802 = vmatprep.subr.bf16.mxu0 %v938_v8  ;;  %v954_v24 = vld [vmem:[%s1205_s1 + $0x48] sm:$0xff]   ;;  %v958_v28 = vld [vmem:[%s1205_s1 + $0x40] sm:$0xff]   ;;  %v968_v36 = vld [vmem:[%s1205_s1 + $0x138] sm:$0xff]  }
   0xa   :  { %842 = vmatprep.subr.bf16.mxu1 %v939_v9  ;;  %v955_v25 = vld [vmem:[%s1205_s1 + $0xc8] sm:$0xff]   ;;  %v959_v29 = vld [vmem:[%s1205_s1 + $0xc0] sm:$0xff]   ;;  %v969_v37 = vld [vmem:[%s1205_s1 + $0x130] sm:$0xff]  }
   0xb   :  { %v956_v26 = vld [vmem:[%s1205_s1 + $0x8] sm:$0xff]   ;;  %v960_v30 = vld [vmem:[%s1205_s1] sm:$0xff]   ;;  %v980_v45 = vld [vmem:[%s1206_s0 + $0x5c] ss:$20 sps:$4 sm:$0xff]  }
   0xc   :  { %803 = vmatpush3.bf16.msra.mxu0 %v940_v10  ;;  %v957_v27 = vld [vmem:[%s1205_s1 + $0x88] sm:$0xff]   ;;  %v961_v31 = vld [vmem:[%s1205_s1 + $0x80] sm:$0xff]   ;;  %v984_v46 = vld [vmem:[%s1205_s1 + $0x118] sm:$0xff]  }
   0xd   :  { %843 = vmatpush3.bf16.msra.mxu1 %v941_v11  ;;  %804 = vmatprep.subr.bf16.mxu0 %v942_v12  ;;  %v962_v32 = vld [vmem:[%s1206_s0] ss:$20 sps:$4 sm:$0xff]   ;;  %v964_v33 = vld [vmem:[%s1206_s0 + $0x4] ss:$20 sps:$4 sm:$0xff]   ;;  %v965_v34 = vld [vmem:[%s1206_s0 + $0x8] ss:$20 sps:$4 sm:$0xff]  }
   0xe   :  { %844 = vmatprep.subr.bf16.mxu1 %v943_v13  ;;  %v967_v35 = vld [vmem:[%s1206_s0 + $0xc] ss:$20 sps:$4 sm:$0xff]   ;;  %492 = vmatprep.mubr.bf16.mxu0 %v964_v33  ;;  %v972_v39 = vld [vmem:[%s1206_s0 + $0x34] ss:$20 sps:$4 sm:$0xff]   ;;  %v975_v42 = vld [vmem:[%s1206_s0 + $0x30] ss:$20 sps:$4 sm:$0xff]  }
   0xf   :  { %557 = vmatprep.mubr.bf16.mxu1 %v967_v35  ;;  %v970_v38 = vld [vmem:[%s1206_s0 + $0x2c] ss:$20 sps:$4 sm:$0xff]   ;;  %v974_v40 = vld [vmem:[%s1206_s0 + $0x28] ss:$20 sps:$4 sm:$0xff]   ;;  %v982_v47 = vld [vmem:[%s1206_s0 + $0x50] ss:$20 sps:$4 sm:$0xff]  }
  0x10   :  { %805 = vmatpush3.bf16.msra.mxu0 %v944_v14  ;;  %v976_v41 = vld [vmem:[%s1205_s1 + $0x128] sm:$0xff]   ;;  %v977_v44 = vld [vmem:[%s1205_s1 + $0x120] sm:$0xff]   ;;  %v986_v49 = vld [vmem:[%s1206_s0 + $0x7c] ss:$20 sps:$4 sm:$0xff]  }
  0x11   :  { %845 = vmatpush3.bf16.msra.mxu1 %v945_v15  ;;  %806 = vmatprep.subr.bf16.mxu0 %v946_v16  ;;  %v978_v43 = vld [vmem:[%s1206_s0 + $0x54] ss:$20 sps:$4 sm:$0xff]   ;;  %v983_v48 = vld [vmem:[%s1206_s0 + $0x58] ss:$20 sps:$4 sm:$0xff]   ;;  %v994_v55 = vld [vmem:[%s1206_s0 + $0x10] ss:$20 sps:$4 sm:$0xff]  }
  0x12   :  { %846 = vmatprep.subr.bf16.mxu1 %v947_v17  ;;  %v988_v50 = vld [vmem:[%s1206_s0 + $0x84] ss:$20 sps:$4 sm:$0xff]   ;;  %v985_v51 = vld [vmem:[%s1205_s1 + $0x110] sm:$0xff]   ;;  %v992_v52 = vld [vmem:[%s1205_s1 + $0x108] sm:$0xff]  }
  0x13   :  { %v990_v53 = vld [vmem:[%s1206_s0 + $0x78] ss:$20 sps:$4 sm:$0xff]   ;;  %v991_v54 = vld [vmem:[%s1206_s0 + $0x80] ss:$20 sps:$4 sm:$0xff]   ;;  %v997_v59 = vld [vmem:[%s1206_s0 + $0x88] ss:$20 sps:$4 sm:$0xff]  }
  0x14   :  { %807 = vmatpush3.bf16.msra.mxu0 %v948_v18  ;;  %v995_v56 = vld [vmem:[%s1206_s0 + $0x60] ss:$20 sps:$4 sm:$0xff]   ;;  %v996_v58 = vld [vmem:[%s1206_s0 + $0x38] ss:$20 sps:$4 sm:$0xff]  }
  0x15   :  { %847 = vmatpush3.bf16.msra.mxu1 %v949_v19  ;;  %808 = vmatprep.subr.bf16.mxu0 %v950_v20  ;;  %v993_v57 = vld [vmem:[%s1205_s1 + $0x100] sm:$0xff]  }
  0x16   :  { %848 = vmatprep.subr.bf16.mxu1 %v951_v21 }
  0x18   :  { %809 = vmatpush3.bf16.msra.mxu0 %v952_v22 }
  0x19   :  { %849 = vmatpush3.bf16.msra.mxu1 %v953_v23  ;;  %810 = vmatprep.subr.bf16.mxu0 %v954_v24 }
  0x1a   :  { %850 = vmatprep.subr.bf16.mxu1 %v955_v25 }
  0x1c   :  { %811 = vmatpush3.bf16.msra.mxu0 %v956_v26 }
  0x1d   :  { %851 = vmatpush3.bf16.msra.mxu1 %v957_v27  ;;  %812 = vmatprep.subr.bf16.mxu0 %v958_v28 }
  0x1e   :  { %852 = vmatprep.subr.bf16.mxu1 %v959_v29 }
  0x20   :  { %813 = vmatpush3.bf16.msra.mxu0 %v960_v30 }
  0x21   :  { %853 = vmatpush3.bf16.msra.mxu1 %v961_v31  ;;  %890 = vmatprep.subr.bf16.mxu0 %v968_v36 }
  0x22   :  { %914 = vmatprep.subr.bf16.mxu1 %v968_v36 }
  0x23   :  { %493 = vmatmul.mubr.bf16.vlgmr.msra.gmra.mxu0 %v962_v32 }
  0x24   :  { %558 = vmatmul.mubr.bf16.vlgmr.msra.gmra.mxu1 %v965_v34  ;;  %891 = vmatpush3.bf16.msra.mxu0 %v968_v36 }
  0x25   :  { %922 = vmatpush3.bf16.msra.mxu1 %v968_v36  ;;  %892 = vmatprep.subr.bf16.mxu0 %v969_v37 }
  0x26   :  { %915 = vmatprep.subr.bf16.mxu1 %v969_v37  ;;  %500 = vmatprep.mubr.bf16.mxu0 %v970_v38 }
  0x27   :  { %565 = vmatprep.mubr.bf16.mxu1 %v972_v39 }
  0x28   :  { %893 = vmatpush3.bf16.msra.mxu0 %v969_v37 }
  0x29   :  { %923 = vmatpush3.bf16.msra.mxu1 %v969_v37  ;;  %894 = vmatprep.subr.bf16.mxu0 %v976_v41 }
  0x2a   :  { %916 = vmatprep.subr.bf16.mxu1 %v976_v41 }
  0x2b   :  { %501 = vmatmul.mubr.bf16.gmra.mxu0 %v974_v40 }
  0x2c   :  { %566 = vmatmul.mubr.bf16.gmra.mxu1 %v975_v42  ;;  %508 = vmatprep.mubr.bf16.mxu0 %v978_v43 }
  0x2d   :  { %895 = vmatpush3.bf16.msra.mxu0 %v976_v41  ;;  %573 = vmatprep.mubr.bf16.mxu1 %v980_v45 }
  0x2e   :  { %924 = vmatpush3.bf16.msra.mxu1 %v976_v41  ;;  %896 = vmatprep.subr.bf16.mxu0 %v977_v44 }
  0x2f   :  { %917 = vmatprep.subr.bf16.mxu1 %v977_v44 }
  0x31   :  { %897 = vmatpush3.bf16.msra.mxu0 %v977_v44 }
  0x32   :  { %925 = vmatpush3.bf16.msra.mxu1 %v977_v44  ;;  %898 = vmatprep.subr.bf16.mxu0 %v984_v46 }
  0x33   :  { %509 = vmatmul.mubr.bf16.gmra.mxu0 %v982_v47  ;;  %918 = vmatprep.subr.bf16.mxu1 %v984_v46 }
  0x34   :  { %574 = vmatmul.mubr.bf16.gmra.mxu1 %v983_v48  ;;  %516 = vmatprep.mubr.bf16.mxu0 %v986_v49 }
  0x35   :  { %899 = vmatpush3.bf16.msra.mxu0 %v984_v46  ;;  %581 = vmatprep.mubr.bf16.mxu1 %v988_v50 }
  0x36   :  { %926 = vmatpush3.bf16.msra.mxu1 %v984_v46  ;;  %900 = vmatprep.subr.bf16.mxu0 %v985_v51 }
  0x37   :  { %919 = vmatprep.subr.bf16.mxu1 %v985_v51 }
  0x39   :  { %901 = vmatpush3.bf16.msra.mxu0 %v985_v51 }
  0x3a   :  { %927 = vmatpush3.bf16.msra.mxu1 %v985_v51  ;;  %902 = vmatprep.subr.bf16.mxu0 %v992_v52 }
  0x3b   :  { %517 = vmatmul.mubr.bf16.gmra.mxu0 %v990_v53  ;;  %920 = vmatprep.subr.bf16.mxu1 %v992_v52 }
  0x3c   :  { %582 = vmatmul.mubr.bf16.gmra.mxu1 %v991_v54  ;;  %906 = vmatprep.mubr.bf16.mxu0 %v994_v55 }
  0x3d   :  { %903 = vmatpush3.bf16.msra.mxu0 %v992_v52  ;;  %910 = vmatprep.mubr.bf16.mxu1 %v995_v56 }
  0x3e   :  { %928 = vmatpush3.bf16.msra.mxu1 %v992_v52  ;;  %904 = vmatprep.subr.bf16.mxu0 %v993_v57 }
  0x3f   :  { %921 = vmatprep.subr.bf16.mxu1 %v993_v57 }
  0x41   :  { %905 = vmatpush3.bf16.msra.mxu0 %v993_v57 }
  0x42   :  { %929 = vmatpush3.bf16.msra.mxu1 %v993_v57 }
  0x44   :  { %907 = vmatmul.mubr.bf16.vlgmr.msra.gmra.mxu0 %v996_v58 }
  0x45   :  { %911 = vmatmul.mubr.bf16.vlgmr.msra.gmra.mxu1 %v997_v59 }
  0xe3   :  { %v814_v60 = vpop.f32.mrf.mxu0 }
  0xe4   :  { %v854_v61 = vpop.f32.mrf.mxu1 }
  0xe5   :  { %v815_v62 = vpop.f32.mrf.mxu0 }
  0xe6   :  { %v855_v63 = vpop.f32.mrf.mxu1  ;;  %v816_v37 = vadd.f32 %v815_v62, %v814_v60 }
  0xe7   :  { %v817_v0 = vpop.f32.mrf.mxu0  ;;  %v856_v38 = vadd.f32 %v855_v63, %v854_v61 }
  0xe8   :  { %v857_v1 = vpop.f32.mrf.mxu1 }
  0xe9   :  { %v818_v2 = vpop.f32.mrf.mxu0  ;;  %v560_v54 = vadd.f32 %v856_v38, %v816_v37 }
  0xea   :  { %v858_v3 = vpop.f32.mrf.mxu1  ;;  %v819_v39 = vadd.f32 %v818_v2, %v817_v0 }
  0xeb   :  { %v820_v4 = vpop.f32.mrf.mxu0  ;;  %v859_v40 = vadd.f32 %v858_v3, %v857_v1 }
  0xec   :  { %v860_v5 = vpop.f32.mrf.mxu1 }
  0xed   :  { %v821_v6 = vpop.f32.mrf.mxu0  ;;  %v563_v57 = vadd.f32 %v859_v40, %v819_v39 }
  0xee   :  { %v861_v7 = vpop.f32.mrf.mxu1  ;;  %v822_v28 = vadd.f32 %v821_v6, %v820_v4 }
  0xef   :  { %v823_v8 = vpop.f32.mrf.mxu0  ;;  %v862_v29 = vadd.f32 %v861_v7, %v860_v5 }
  0xf0   :  { %v863_v9 = vpop.f32.mrf.mxu1 }
  0xf1   :  { %v824_v10 = vpop.f32.mrf.mxu0  ;;  %v568_v47 = vadd.f32 %v862_v29, %v822_v28 }
  0xf2   :  { %v864_v11 = vpop.f32.mrf.mxu1  ;;  %v825_v30 = vadd.f32 %v824_v10, %v823_v8 }
  0xf3   :  { %v826_v12 = vpop.f32.mrf.mxu0  ;;  %v865_v31 = vadd.f32 %v864_v11, %v863_v9 }
  0xf4   :  { %v866_v13 = vpop.f32.mrf.mxu1 }
  0xf5   :  { %v827_v14 = vpop.f32.mrf.mxu0  ;;  %v571_v49 = vadd.f32 %v865_v31, %v825_v30 }
  0xf6   :  { %v867_v15 = vpop.f32.mrf.mxu1  ;;  %v828_v42 = vadd.f32 %v827_v14, %v826_v12 }
  0xf7   :  { %v829_v16 = vpop.f32.mrf.mxu0  ;;  %v868_v43 = vadd.f32 %v867_v15, %v866_v13 }
  0xf8   :  { %v869_v17 = vpop.f32.mrf.mxu1 }
  0xf9   :  { %v830_v18 = vpop.f32.mrf.mxu0  ;;  %v576_v59 = vadd.f32 %v868_v43, %v828_v42 }
  0xfa   :  { %v870_v19 = vpop.f32.mrf.mxu1  ;;  %v831_v44 = vadd.f32 %v830_v18, %v829_v16 }
  0xfb   :  { %v832_v20 = vpop.f32.mrf.mxu0  ;;  %v871_v45 = vadd.f32 %v870_v19, %v869_v17 }
  0xfc   :  { %v872_v21 = vpop.f32.mrf.mxu1 }
  0xfd   :  { %v833_v22 = vpop.f32.mrf.mxu0  ;;  %v579_v62 = vadd.f32 %v871_v45, %v831_v44 }
  0xfe   :  { %v873_v23 = vpop.f32.mrf.mxu1  ;;  %v834_v32 = vadd.f32 %v833_v22, %v832_v20 }
  0xff   :  { %v835_v24 = vpop.f32.mrf.mxu0  ;;  %v874_v33 = vadd.f32 %v873_v23, %v872_v21 }
 0x100   :  { %v875_v25 = vpop.f32.mrf.mxu1 }
 0x101   :  { %v836_v26 = vpop.f32.mrf.mxu0  ;;  %v584_v50 = vadd.f32 %v874_v33, %v834_v32 }
 0x102   :  { %v876_v27 = vpop.f32.mrf.mxu1  ;;  %v837_v34 = vadd.f32 %v836_v26, %v835_v24 }
 0x103   :  { %v877_v35 = vadd.f32 %v876_v27, %v875_v25 }
 0x104   :  { %v908_v36 = vpop.f32.mrf.mxu0 }
 0x105   :  { %v912_v41 = vpop.f32.mrf.mxu1  ;;  %v587_v52 = vadd.f32 %v877_v35, %v837_v34  ;;  %v633_v53 = vadd.f32 %v908_v36, %v568_v47 }
 0x106   :  { %v624_v46 = vpop.f32.mrf.mxu0  ;;  %v649_v58 = vadd.f32 %v912_v41, %v584_v50 }
 0x107   :  { %v640_v48 = vpop.f32.mrf.mxu1  ;;  %v625_v63 = vadd.f32 %v624_v46, %v560_v54 }
 0x108   :  { %v909_v51 = vpop.f32.mrf.mxu0  ;;  %v641_v3 = vadd.f32 %v640_v48, %v576_v59 }
 0x109   :  { %v636_v55 = vadd.f32 %v909_v51, %v571_v49  ;;  %v913_v56 = vpop.f32.mrf.mxu1 }
 0x10a   :  { %v652_v60 = vadd.f32 %v913_v56, %v587_v52  ;;  %v627_v61 = vpop.f32.mrf.mxu0 }
 0x10b   :  { %v783_v0 = vpack.c.bf16 %v636_v55, %v633_v53  ;;  %v628_v1 = vadd.f32 %v627_v61, %v563_v57  ;;  %v643_v2 = vpop.f32.mrf.mxu1 }
 0x10c   :  { %v793_v4 = vpack.c.bf16 %v652_v60, %v649_v58  ;;  %v644_v5 = vadd.f32 %v643_v2, %v579_v62 }
 0x10d   :  { %795 = vst [vmem:[%s1207_s2 + $0x8] sm:$0xff] %v783_v0   ;;  %v778_v6 = vpack.c.bf16 %v628_v1, %v625_v63 }
 0x10e   :  { %797 = vst [vmem:[%s1207_s2 + $0x18] sm:$0xff] %v793_v4   ;;  %v788_v7 = vpack.c.bf16 %v644_v5, %v641_v3 }
 0x10f   :  { %779 = vst [vmem:[%s1207_s2] sm:$0xff] %v778_v6  }
 0x110   :  { %796 = vst [vmem:[%s1207_s2 + $0x10] sm:$0xff] %v788_v7  }

// kernel: forward.37
= control target key start
LH: loop header
LB: loop body
LE: loop exit
PB: predicated region body
PF: predicated region fallthrough
CT: control target
= control target key end

     0   :  { %s2040_s0 = inlined_call_operand.vmem [shape: f32[2,256], index: 0, kind: input, shape index: {}]   ;;  %s2041_s1 = inlined_call_operand.vmem [shape: f32[256,64], index: 1, kind: input, shape index: {}]   ;;  %s2042_s2 = inlined_call_operand.vmem [shape: f32[1,64], index: 2, kind: input, shape index: {}]   ;;  %s2043_s3 = inlined_call_operand.vmem [shape: f32[64,16], index: 3, kind: input, shape index: {}]   ;;  %s2044_s4 = inlined_call_operand.vmem [shape: f32[1,16], index: 4, kind: input, shape index: {}]   ;;  %s2045_s5 = inlined_call_operand.vmem [shape: f32[16,128], index: 5, kind: input, shape index: {}]   ;;  %s2046_s6 = inlined_call_operand.vmem [shape: f32[1,128], index: 6, kind: input, shape index: {}]   ;;  %s2047_s7 = inlined_call_operand.vmem [shape: f32[128,128], index: 7, kind: input, shape index: {}]   ;;  %s2048_s8 = inlined_call_operand.vmem [shape: f32[1,128], index: 8, kind: input, shape index: {}]   ;;  %s2049_s9 = inlined_call_operand.vmem [shape: f32[128,128], index: 9, kind: input, shape index: {}]   ;;  %s2050_s10 = inlined_call_operand.vmem [shape: f32[1,128], index: 10, kind: input, shape index: {}]   ;;  %s2051_s11 = inlined_call_operand.vmem [shape: f32[128,128], index: 11, kind: input, shape index: {}]   ;;  %s2052_s12 = inlined_call_operand.vmem [shape: f32[1,128], index: 12, kind: input, shape index: {}]   ;;  %s2053_s13 = inlined_call_operand.vmem [shape: f32[128,128], index: 13, kind: input, shape index: {}]   ;;  %s2054_s14 = inlined_call_operand.vmem [shape: f32[1,128], index: 14, kind: input, shape index: {}]   ;;  %s2055_s15 = inlined_call_operand.vmem [shape: f32[16,64], index: 15, kind: input, shape index: {}]   ;;  %s2056_s16 = inlined_call_operand.vmem [shape: f32[1,64], index: 16, kind: input, shape index: {}]   ;;  %s2057_s17 = inlined_call_operand.vmem [shape: f32[64,256], index: 17, kind: input, shape index: {}]   ;;  %s2058_s18 = inlined_call_operand.vmem [shape: f32[1,256], index: 18, kind: input, shape index: {}]   ;;  %s2059_s19 = inlined_call_operand.hbm [shape: f32[2,16], index: 19, kind: output, shape index: {0}]   ;;  %s2060_s20 = inlined_call_operand.vmem [shape: f32[2,128], index: 20, kind: output, shape index: {1}]   ;;  %s2061_s21 = inlined_call_operand.vmem [shape: f32[2,256], index: 21, kind: output, shape index: {2}]  }
   0x1   :  { %2065 = sst [smem:[#allocation5_spill]] %s2040_s0 }
   0x2   :  { %2066 = sst [smem:[#allocation6_spill]] %s2041_s1 }
   0x3   :  { %2067 = sst [smem:[#allocation7_spill]] %s2042_s2 }
   0x4   :  { %2068 = sst [smem:[#allocation8_spill]] %s2043_s3 }
   0x5   :  { %2069 = sst [smem:[#allocation9_spill]] %s2044_s4 }
   0x6   :  { %2070 = sst [smem:[#allocation10_spill]] %s2045_s5 }
   0x7   :  { %s2071_s26 = sld [smem:[#allocation6_spill]] }
   0x8   :  { %s2072_s2 = sld [smem:[#allocation5_spill]] }
   0xd   :  { %v98_v0 = vld [vmem:[%s2071_s26 + $0xf8] sm:$0xff]  ;;  %v97_v2 = vld [vmem:[%s2071_s26 + $0xf0] sm:$0xff]  ;;  %v96_v4 = vld [vmem:[%s2071_s26 + $0xe8] sm:$0xff] }
   0xe   :  { %v82_v1 = vld [vmem:[%s2071_s26 + $0x78] sm:$0xff]  ;;  %1080 = vmatprep.subr.mxu0 %v98_v0  ;;  %v81_v3 = vld [vmem:[%s2071_s26 + $0x70] sm:$0xff]  ;;  %v80_v5 = vld [vmem:[%s2071_s26 + $0x68] sm:$0xff] }
   0xf   :  { %1081 = vmatpush3.msra.mxu0 %v82_v1  ;;  %v95_v6 = vld [vmem:[%s2071_s26 + $0xe0] sm:$0xff]  ;;  %v94_v8 = vld [vmem:[%s2071_s26 + $0xd8] sm:$0xff]  ;;  %v93_v10 = vld [vmem:[%s2071_s26 + $0xd0] sm:$0xff] }
  0x10   :  { %1082 = vmatprep.subr.mxu0 %v97_v2  ;;  %v79_v7 = vld [vmem:[%s2071_s26 + $0x60] sm:$0xff]  ;;  %v78_v9 = vld [vmem:[%s2071_s26 + $0x58] sm:$0xff]  ;;  %v77_v11 = vld [vmem:[%s2071_s26 + $0x50] sm:$0xff] }
  0x11   :  { %1083 = vmatpush3.msra.mxu0 %v81_v3  ;;  %v92_v12 = vld [vmem:[%s2071_s26 + $0xc8] sm:$0xff]  ;;  %v1067_v13 = vld.sshfl [vmem:[%s2072_s2] sm:$0x33 pattern:$0x76325410] }
  0x12   :  { %1084 = vmatprep.subr.mxu0 %v96_v4  ;;  %v76_v14 = vld [vmem:[%s2071_s26 + $0x48] sm:$0xff]  ;;  %v114_v15 = vcombine.high %v1067_v13, %v1067_v13 }
  0x13   :  { %1085 = vmatpush3.msra.mxu0 %v80_v5 }
  0x14   :  { %1086 = vmatprep.subr.mxu0 %v95_v6 }
  0x15   :  { %1087 = vmatpush3.msra.mxu0 %v79_v7 }
  0x16   :  { %1088 = vmatprep.subr.mxu0 %v94_v8 }
  0x17   :  { %1089 = vmatpush3.msra.mxu0 %v78_v9 }
  0x18   :  { %1090 = vmatprep.subr.mxu0 %v93_v10 }
  0x19   :  { %27 = vsyncpa [#allocation3], 0  ;;  %1091 = vmatpush3.msra.mxu0 %v77_v11  ;;  %v91_v16 = vld [vmem:[%s2071_s26 + $0xc0] sm:$0xff]  ;;  %181 = vmatprep.mubr.f32.mxu0 %v114_v15  ;;  %v90_v18 = vld [vmem:[%s2071_s26 + $0xb8] sm:$0xff]  ;;  %v1408_v34 = vmov 0.0   ;;  %s2073_s24 = sld [smem:[#allocation8_spill]] }
  0x1a   :  { %1092 = vmatprep.subr.mxu0 %v92_v12  ;;  %v75_v17 = vld [vmem:[%s2071_s26 + $0x40] sm:$0xff]  ;;  %v74_v19 = vld [vmem:[%s2071_s26 + $0x38] sm:$0xff]  ;;  %v89_v20 = vld [vmem:[%s2071_s26 + $0xb0] sm:$0xff]  ;;  %1198 = vmatprep.subr.mxu1 %v1408_v34  ;;  %vm1409_vm0 = vmmov 0   ;;  %vm187_vm1 = vcmask 517120   ;;  %vm228_vm3 = vcmask 523264  }
  0x1b   :  { %1093 = vmatpush3.msra.mxu0 %v76_v14  ;;  %v73_v21 = vld [vmem:[%s2071_s26 + $0x30] sm:$0xff]  ;;  %v88_v22 = vld [vmem:[%s2071_s26 + $0xa8] sm:$0xff]  ;;  %v87_v24 = vld [vmem:[%s2071_s26 + $0xa0] sm:$0xff]  ;;  %1214 = vmatprep.mubr.msk.f32.mxu1 %vm1409_vm0, %v1408_v34  ;;  %s2075_s3 = sld [smem:[#allocation10_spill]]  ;;  %vm319_vm4 = vcmask 130048   ;;  %vm308_vm5 = vcmask 123904  }
  0x1c   :  { %1094 = vmatprep.subr.mxu0 %v91_v16  ;;  %v72_v23 = vld [vmem:[%s2071_s26 + $0x28] sm:$0xff]  ;;  %v71_v25 = vld [vmem:[%s2071_s26 + $0x20] sm:$0xff]  ;;  %v86_v26 = vld [vmem:[%s2071_s26 + $0x98] sm:$0xff]  ;;  %s2076_s28 = sld [smem:[#allocation9_spill]] }
  0x1d   :  { %1095 = vmatpush3.msra.mxu0 %v75_v17  ;;  %v70_v27 = vld [vmem:[%s2071_s26 + $0x18] sm:$0xff]  ;;  %v85_v28 = vld [vmem:[%s2071_s26 + $0x90] sm:$0xff]  ;;  %v84_v30 = vld [vmem:[%s2071_s26 + $0x88] sm:$0xff] }
  0x1e   :  { %1096 = vmatprep.subr.mxu0 %v90_v18  ;;  %v69_v29 = vld [vmem:[%s2071_s26 + $0x10] sm:$0xff]  ;;  %v68_v31 = vld [vmem:[%s2071_s26 + $0x8] sm:$0xff]  ;;  %v83_v32 = vld [vmem:[%s2071_s26 + $0x80] sm:$0xff] }
  0x1f   :  { %1097 = vmatpush3.msra.mxu0 %v74_v19  ;;  %v67_v33 = vld [vmem:[%s2071_s26] sm:$0xff]  ;;  %v220_v35 = vld [vmem:[%s2073_s24 + $0x38] sm:$0xff]  ;;  %v219_v36 = vld [vmem:[%s2073_s24 + $0x30] sm:$0xff]  ;;  %s2074_s26 = sld [smem:[#allocation7_spill]] }
  0x20   :  { %1098 = vmatprep.subr.mxu0 %v89_v20  ;;  %1199 = vmatpush3.msra.mxu1 %v220_v35  ;;  %v218_v37 = vld [vmem:[%s2073_s24 + $0x28] sm:$0xff]  ;;  %v217_v38 = vld [vmem:[%s2073_s24 + $0x20] sm:$0xff]  ;;  %v216_v39 = vld [vmem:[%s2073_s24 + $0x18] sm:$0xff] }
  0x21   :  { %1099 = vmatpush3.msra.mxu0 %v73_v21  ;;  %1200 = vmatprep.subr.mxu1 %v1408_v34  ;;  %v215_v40 = vld [vmem:[%s2073_s24 + $0x10] sm:$0xff]  ;;  %v214_v41 = vld [vmem:[%s2073_s24 + $0x8] sm:$0xff]  ;;  %v213_v42 = vld [vmem:[%s2073_s24] sm:$0xff] }
  0x22   :  { %1100 = vmatprep.subr.mxu0 %v88_v22  ;;  %1201 = vmatpush3.msra.mxu1 %v219_v36  ;;  %v311_v7 = vld [vmem:[%s2075_s3 + $0x8] sm:$0xff]  ;;  %v310_v8 = vld [vmem:[%s2075_s3] sm:$0xff]  ;;  %v411_v9 = vld [vmem:[%s2047_s7 + $0x78] sm:$0xff] }
  0x23   :  { %1101 = vmatpush3.msra.mxu0 %v72_v23  ;;  %1202 = vmatprep.subr.mxu1 %v1408_v34  ;;  %v410_v10 = vld [vmem:[%s2047_s7 + $0x70] sm:$0xff]  ;;  %v409_v11 = vld [vmem:[%s2047_s7 + $0x68] sm:$0xff]  ;;  %v408_v12 = vld [vmem:[%s2047_s7 + $0x60] sm:$0xff] }
  0x24   :  { %1102 = vmatprep.subr.mxu0 %v87_v24  ;;  %1203 = vmatpush3.msra.mxu1 %v218_v37  ;;  %v406_v14 = vld [vmem:[%s2047_s7 + $0x50] sm:$0xff]  ;;  %v405_v15 = vld [vmem:[%s2047_s7 + $0x48] sm:$0xff]  ;;  %v404_v16 = vld [vmem:[%s2047_s7 + $0x40] sm:$0xff] }
  0x25   :  { %1103 = vmatpush3.msra.mxu0 %v71_v25  ;;  %1204 = vmatprep.subr.mxu1 %v1408_v34  ;;  %v1066_v44 = vld [vmem:[%s2074_s26] ss:$0 sm:$0xff]  ;;  %v403_v17 = vld [vmem:[%s2047_s7 + $0x38] sm:$0xff]  ;;  %v402_v18 = vld [vmem:[%s2047_s7 + $0x30] sm:$0xff] }
  0x26   :  { %1104 = vmatprep.subr.mxu0 %v86_v26  ;;  %1205 = vmatpush3.msra.mxu1 %v217_v38  ;;  %v401_v19 = vld [vmem:[%s2047_s7 + $0x28] sm:$0xff]  ;;  %v400_v20 = vld [vmem:[%s2047_s7 + $0x20] sm:$0xff]  ;;  %v399_v21 = vld [vmem:[%s2047_s7 + $0x18] sm:$0xff] }
  0x27   :  { %1105 = vmatpush3.msra.mxu0 %v70_v27  ;;  %1206 = vmatprep.subr.mxu1 %v1408_v34  ;;  %v1068_v22 = vld [vmem:[%s2076_s28] ss:$0 sm:$0xff]  ;;  %v507_v35 = vld [vmem:[%s2049_s9 + $0x78] sm:$0xff]  ;;  %v506_v36 = vld [vmem:[%s2049_s9 + $0x70] sm:$0xff] }
  0x28   :  { %1106 = vmatprep.subr.mxu0 %v85_v28  ;;  %1207 = vmatpush3.msra.mxu1 %v216_v39  ;;  %v505_v37 = vld [vmem:[%s2049_s9 + $0x68] sm:$0xff]  ;;  %v504_v38 = vld [vmem:[%s2049_s9 + $0x60] sm:$0xff]  ;;  %v503_v39 = vld [vmem:[%s2049_s9 + $0x58] sm:$0xff] }
  0x29   :  { %1107 = vmatpush3.msra.mxu0 %v69_v29  ;;  %1208 = vmatprep.subr.mxu1 %v1408_v34 }
  0x2a   :  { %1108 = vmatprep.subr.mxu0 %v84_v30  ;;  %1209 = vmatpush3.msra.mxu1 %v215_v40  ;;  %v502_v40 = vld [vmem:[%s2049_s9 + $0x50] sm:$0xff] }
  0x2b   :  { %1109 = vmatpush3.msra.mxu0 %v68_v31  ;;  %1210 = vmatprep.subr.mxu1 %v1408_v34  ;;  %v398_v31 = vld [vmem:[%s2047_s7 + $0x10] sm:$0xff] }
  0x2c   :  { %1110 = vmatprep.subr.mxu0 %v83_v32  ;;  %1211 = vmatpush3.msra.mxu1 %v214_v41  ;;  %v397_v32 = vld [vmem:[%s2047_s7 + $0x8] sm:$0xff] }
  0x2d   :  { %1111 = vmatpush3.msra.mxu0 %v67_v33  ;;  %1212 = vmatprep.subr.mxu1 %v1408_v34  ;;  %v396_v33 = vld [vmem:[%s2047_s7] sm:$0xff]  ;;  %v501_v41 = vld [vmem:[%s2049_s9 + $0x48] sm:$0xff] }
  0x2e   :  { %182 = vmatmul.mubr.f32.vlgmr.msra.gmra.mxu0 %v1067_v13  ;;  %1217 = vmatprep.subr.mxu0 %v1408_v34  ;;  %v407_v13 = vld [vmem:[%s2047_s7 + $0x58] sm:$0xff] }
  0x2f   :  { %1221 = vmatprep.mubr.msk.f32.mxu0 %vm1409_vm0, %v1408_v34  ;;  %1213 = vmatpush3.msra.mxu1 %v213_v42  ;;  %v500_v42 = vld [vmem:[%s2049_s9 + $0x40] sm:$0xff] }
  0x30   :  { %1224 = vmatprep.subr.mxu1 %v1408_v34  ;;  %1218 = vmatpush3.msra.mxu0 %v311_v7 }
  0x31   :  { %1219 = vmatprep.subr.mxu0 %v1408_v34 }
  0x32   :  { %1220 = vmatpush3.msra.mxu0 %v310_v8 }
  0x33   :  { %1259 = vmatprep.subr.mxu0 %v1408_v34 }
  0xee   :  { %v1112_v43 = vpop.f32.mrf.mxu0 }
  0xf0   :  { %v1113_v45 = vpop.f32.mrf.mxu0 }
  0xf1   :  { %v1114_v46 = vadd.f32 %v1113_v45, %v1112_v43  ;;  %v499_v43 = vld [vmem:[%s2049_s9 + $0x38] sm:$0xff]  ;;  %v497_v45 = vld [vmem:[%s2049_s9 + $0x28] sm:$0xff] }
  0xf3   :  { %v184_v47 = vadd.f32 %v1114_v46, %v1066_v44  ;;  %v498_v44 = vld [vmem:[%s2049_s9 + $0x30] sm:$0xff]  ;;  %v496_v46 = vld [vmem:[%s2049_s9 + $0x20] sm:$0xff] }
  0xf5   :  { %v188_v48 = vsel %vm187_vm1, %v184_v47, 0.0 }
  0xf6   :  { %v189_v49 = vrot.slane %v188_v48, 4 }
  0xf8   :  { %v190_v50 = vadd.f32 %v189_v49, %v188_v48  ;;  %v1070_v48 = vld [vmem:[%s2046_s6] ss:$0 sm:$0xff] }
  0xfa   :  { %v191_v51 = vrot.slane %v190_v50, 2 }
  0xfc   :  { %v192_v52 = vadd.f32 %v191_v51, %v190_v50 }
  0xfe   :  { %v193_v53 = vrot.slane %v192_v52, 1 }
 0x100   :  { %v194_v54 = vadd.f32 %v193_v53, %v192_v52 }
 0x102   :  { %v196_v55 = vmul.f32 0.5, %v194_v54  ;;  %v494_v54 = vld [vmem:[%s2049_s9 + $0x10] sm:$0xff] }
 0x104   :  { %v197_v56 = vsub.f32 %v184_v47, %v196_v55  ;;  %v495_v47 = vld [vmem:[%s2049_s9 + $0x18] sm:$0xff]  ;;  %v493_v55 = vld [vmem:[%s2049_s9 + $0x8] sm:$0xff] }
 0x106   :  { %v198_v57 = vmul.f32 %v197_v56, %v197_v56 }
 0x108   :  { %v199_v58 = vsel %vm187_vm1, %v198_v57, 0.0  ;;  %v603_v57 = vld [vmem:[%s2051_s11 + $0x78] sm:$0xff] }
 0x109   :  { %v200_v59 = vrot.slane %v199_v58, 4 }
 0x10b   :  { %v201_v60 = vadd.f32 %v200_v59, %v199_v58  ;;  %v602_v58 = vld [vmem:[%s2051_s11 + $0x70] sm:$0xff]  ;;  %v601_v59 = vld [vmem:[%s2051_s11 + $0x68] sm:$0xff] }
 0x10d   :  { %v202_v61 = vrot.slane %v201_v60, 2 }
 0x10f   :  { %v203_v62 = vadd.f32 %v202_v61, %v201_v60  ;;  %v600_v60 = vld [vmem:[%s2051_s11 + $0x60] sm:$0xff]  ;;  %v599_v61 = vld [vmem:[%s2051_s11 + $0x58] sm:$0xff] }
 0x111   :  { %v204_v63 = vrot.slane %v203_v62, 1 }
 0x113   :  { %v205_v0 = vadd.f32 %v204_v63, %v203_v62  ;;  %v598_v62 = vld [vmem:[%s2051_s11 + $0x50] sm:$0xff]  ;;  %v597_v63 = vld [vmem:[%s2051_s11 + $0x48] sm:$0xff] }
 0x115   :  { %v206_v1 = vmul.f32 0.5, %v205_v0  ;;  %v596_v0 = vld [vmem:[%s2051_s11 + $0x40] sm:$0xff] }
 0x117   :  { %v207_v2 = vadd.f32 1e-05, %v206_v1  ;;  %v595_v1 = vld [vmem:[%s2051_s11 + $0x38] sm:$0xff] }
 0x119   :  { %1374 = vrsqrt.f32 %v207_v2  ;;  %v594_v2 = vld [vmem:[%s2051_s11 + $0x30] sm:$0xff] }
 0x126   :  { %v1375_v3 = vpop.eup %1374 }
 0x127   :  { %v209_v4 = vmul.f32 %v1375_v3, %v197_v56  ;;  %v492_v56 = vld [vmem:[%s2049_s9] sm:$0xff]  ;;  %v593_v3 = vld [vmem:[%s2051_s11 + $0x28] sm:$0xff] }
 0x129   :  { %vm210_vm2 = vcmp.ge.f32.partialorder %v209_v4, 0.0  ;;  %v211_v5 = vmul.f32 0.01, %v209_v4 }
 0x12b   :  { %v212_v6 = vsel %vm210_vm2, %v209_v4, %v211_v5  ;;  %v592_v4 = vld [vmem:[%s2051_s11 + $0x20] sm:$0xff]  ;;  %v591_v5 = vld [vmem:[%s2051_s11 + $0x18] sm:$0xff] }
 0x12c   :  { %1215 = vmatmul.mubr.msk.f32.vlgmr.msra.gmra.mxu1 %vm228_vm3, %v212_v6  ;;  %v1072_v6 = vld [vmem:[%s2048_s8] ss:$0 sm:$0xff] }
 0x12d   :  { %1256 = vmatprep.mubr.msk.f32.mxu1 %vm1409_vm0, %v1408_v34  ;;  %1225 = vmatpush3.msra.mxu1 %v411_v9 }
 0x12e   :  { %1226 = vmatprep.subr.mxu1 %v1408_v34 }
 0x12f   :  { %1227 = vmatpush3.msra.mxu1 %v410_v10 }
 0x130   :  { %1228 = vmatprep.subr.mxu1 %v1408_v34 }
 0x131   :  { %1229 = vmatpush3.msra.mxu1 %v409_v11 }
 0x132   :  { %1230 = vmatprep.subr.mxu1 %v1408_v34 }
 0x133   :  { %1231 = vmatpush3.msra.mxu1 %v408_v12  ;;  %v590_v12 = vld [vmem:[%s2051_s11 + $0x10] sm:$0xff] }
 0x134   :  { %1232 = vmatprep.subr.mxu1 %v1408_v34 }
 0x135   :  { %1233 = vmatpush3.msra.mxu1 %v407_v13  ;;  %v589_v13 = vld [vmem:[%s2051_s11 + $0x8] sm:$0xff] }
 0x136   :  { %1234 = vmatprep.subr.mxu1 %v1408_v34 }
 0x137   :  { %1235 = vmatpush3.msra.mxu1 %v406_v14  ;;  %v588_v14 = vld [vmem:[%s2051_s11] sm:$0xff] }
 0x138   :  { %1236 = vmatprep.subr.mxu1 %v1408_v34 }
 0x139   :  { %1237 = vmatpush3.msra.mxu1 %v405_v15  ;;  %v699_v15 = vld [vmem:[%s2053_s13 + $0x78] sm:$0xff] }
 0x13a   :  { %1238 = vmatprep.subr.mxu1 %v1408_v34 }
 0x13b   :  { %1239 = vmatpush3.msra.mxu1 %v404_v16  ;;  %v698_v16 = vld [vmem:[%s2053_s13 + $0x70] sm:$0xff] }
 0x13c   :  { %1240 = vmatprep.subr.mxu1 %v1408_v34 }
 0x13d   :  { %1241 = vmatpush3.msra.mxu1 %v403_v17  ;;  %v697_v17 = vld [vmem:[%s2053_s13 + $0x68] sm:$0xff] }
 0x13e   :  { %1242 = vmatprep.subr.mxu1 %v1408_v34 }
 0x13f   :  { %1243 = vmatpush3.msra.mxu1 %v402_v18  ;;  %v696_v18 = vld [vmem:[%s2053_s13 + $0x60] sm:$0xff] }
 0x140   :  { %1244 = vmatprep.subr.mxu1 %v1408_v34 }
 0x141   :  { %1245 = vmatpush3.msra.mxu1 %v401_v19  ;;  %v695_v19 = vld [vmem:[%s2053_s13 + $0x58] sm:$0xff] }
 0x142   :  { %1246 = vmatprep.subr.mxu1 %v1408_v34 }
 0x143   :  { %1247 = vmatpush3.msra.mxu1 %v400_v20  ;;  %v694_v20 = vld [vmem:[%s2053_s13 + $0x50] sm:$0xff] }
 0x144   :  { %1248 = vmatprep.subr.mxu1 %v1408_v34 }
 0x145   :  { %1249 = vmatpush3.msra.mxu1 %v399_v21  ;;  %v693_v21 = vld [vmem:[%s2053_s13 + $0x48] sm:$0xff] }
 0x146   :  { %1250 = vmatprep.subr.mxu1 %v1408_v34 }
 0x147   :  { %1251 = vmatpush3.msra.mxu1 %v398_v31 }
 0x148   :  { %1252 = vmatprep.subr.mxu1 %v1408_v34 }
 0x149   :  { %1253 = vmatpush3.msra.mxu1 %v397_v32 }
 0x14a   :  { %1254 = vmatprep.subr.mxu1 %v1408_v34 }
 0x14b   :  { %1255 = vmatpush3.msra.mxu1 %v396_v33 }
 0x14c   :  { %1294 = vmatprep.subr.mxu1 %v1408_v34 }
 0x1ec   :  { %v298_v23 = vpop.f32.mrf.mxu1 }
 0x1ed   :  { %v299_v24 = vadd.f32 %v1068_v22, %v298_v23  ;;  %v692_v22 = vld [vmem:[%s2053_s13 + $0x40] sm:$0xff]  ;;  %v691_v23 = vld [vmem:[%s2053_s13 + $0x38] sm:$0xff] }
 0x1ee   :  { %v1216_v25 = vpop.f32.mrf.mxu1 }
 0x1ef   :  { %v302_v26 = vsub.f32 0.0, %v299_v24  ;;  %v690_v24 = vld [vmem:[%s2053_s13 + $0x30] sm:$0xff]  ;;  %v689_v25 = vld [vmem:[%s2053_s13 + $0x28] sm:$0xff] }
 0x1f1   :  { %v303_v27 = vmul.f32 1.442695, %v302_v26  ;;  %v688_v26 = vld [vmem:[%s2053_s13 + $0x20] sm:$0xff] }
 0x1f3   :  { %1376 = vpow2.f32 %v303_v27  ;;  %v687_v27 = vld [vmem:[%s2053_s13 + $0x18] sm:$0xff] }
 0x200   :  { %v1377_v28 = vpop.eup %1376 }
 0x201   :  { %v305_v29 = vadd.f32 1.0, %v1377_v28  ;;  %v1073_v28 = vld [vmem:[%s2050_s10] ss:$0 sm:$0xff] }
 0x203   :  { %1378 = vrcp.f32 %v305_v29 }
 0x210   :  { %v1729_v30 = vpop.eup %1378 }
 0x211   :  { %1222 = vmatmul.mubr.msk.f32.vlgmr.msra.gmra.mxu0 %vm319_vm4, %v1729_v30  ;;  %309 = vst.msk [vmem:[#allocation2] sm:$0x3] %vm308_vm5, %v1729_v30 }
 0x212   :  { %1291 = vmatprep.mubr.msk.f32.mxu0 %vm1409_vm0, %v1408_v34  ;;  %1260 = vmatpush3.msra.mxu0 %v507_v35  ;;  %v779_v35 = vld [vmem:[%s2055_s15 + $0x8] sm:$0xff] }
 0x213   :  { %1261 = vmatprep.subr.mxu0 %v1408_v34 }
 0x214   :  { %1262 = vmatpush3.msra.mxu0 %v506_v36 }
 0x215   :  { %1263 = vmatprep.subr.mxu0 %v1408_v34 }
 0x216   :  { %1264 = vmatpush3.msra.mxu0 %v505_v37  ;;  %v778_v37 = vld [vmem:[%s2055_s15] sm:$0xff] }
 0x217   :  { %1265 = vmatprep.subr.mxu0 %v1408_v34 }
 0x218   :  { %1266 = vmatpush3.msra.mxu0 %v504_v38  ;;  %v686_v38 = vld [vmem:[%s2053_s13 + $0x10] sm:$0xff] }
 0x219   :  { %1267 = vmatprep.subr.mxu0 %v1408_v34 }
 0x21a   :  { %1268 = vmatpush3.msra.mxu0 %v503_v39  ;;  %v685_v39 = vld [vmem:[%s2053_s13 + $0x8] sm:$0xff] }
 0x21b   :  { %1269 = vmatprep.subr.mxu0 %v1408_v34 }
 0x21c   :  { %1270 = vmatpush3.msra.mxu0 %v502_v40  ;;  %v896_v40 = vld [vmem:[%s2057_s17 + $0x78] sm:$0xff] }
 0x21d   :  { %1271 = vmatprep.subr.mxu0 %v1408_v34 }
 0x21e   :  { %1272 = vmatpush3.msra.mxu0 %v501_v41  ;;  %v895_v41 = vld [vmem:[%s2057_s17 + $0x70] sm:$0xff] }
 0x21f   :  { %1273 = vmatprep.subr.mxu0 %v1408_v34 }
 0x220   :  { %1274 = vmatpush3.msra.mxu0 %v500_v42  ;;  %v894_v42 = vld [vmem:[%s2057_s17 + $0x68] sm:$0xff] }
 0x221   :  { %1275 = vmatprep.subr.mxu0 %v1408_v34 }
 0x222   :  { %1276 = vmatpush3.msra.mxu0 %v499_v43  ;;  %v892_v43 = vld [vmem:[%s2057_s17 + $0x58] sm:$0xff] }
 0x223   :  { %1277 = vmatprep.subr.mxu0 %v1408_v34 }
 0x224   :  { %1278 = vmatpush3.msra.mxu0 %v498_v44  ;;  %v891_v44 = vld [vmem:[%s2057_s17 + $0x50] sm:$0xff] }
 0x225   :  { %1279 = vmatprep.subr.mxu0 %v1408_v34 }
 0x226   :  { %1280 = vmatpush3.msra.mxu0 %v497_v45  ;;  %v890_v45 = vld [vmem:[%s2057_s17 + $0x48] sm:$0xff] }
 0x227   :  { %1281 = vmatprep.subr.mxu0 %v1408_v34 }
 0x228   :  { %1282 = vmatpush3.msra.mxu0 %v496_v46  ;;  %v889_v46 = vld [vmem:[%s2057_s17 + $0x40] sm:$0xff] }
 0x229   :  { %1283 = vmatprep.subr.mxu0 %v1408_v34 }
 0x22a   :  { %1284 = vmatpush3.msra.mxu0 %v495_v47  ;;  %v888_v47 = vld [vmem:[%s2057_s17 + $0x38] sm:$0xff] }
 0x22b   :  { %1285 = vmatprep.subr.mxu0 %v1408_v34 }
 0x22c   :  { %1286 = vmatpush3.msra.mxu0 %v494_v54  ;;  %v881_v54 = vld [vmem:[%s2057_s17] sm:$0xff] }
 0x22d   :  { %1287 = vmatprep.subr.mxu0 %v1408_v34 }
 0x22e   :  { %1288 = vmatpush3.msra.mxu0 %v493_v55  ;;  %v1074_v55 = vld [vmem:[%s2052_s12] ss:$0 sm:$0xff]  ;;  %s1410_s12 = smov [#allocation2]  }
 0x22f   :  { %1289 = vmatprep.subr.mxu0 %v1408_v34 }
 0x230   :  { %1290 = vmatpush3.msra.mxu0 %v492_v56 }
 0x231   :  { %1329 = vmatprep.subr.mxu0 %v1408_v34 }
 0x2d1   :  { %v389_v49 = vpop.f32.mrf.mxu0 }
 0x2d2   :  { %v390_v50 = vadd.f32 %v1070_v48, %v389_v49  ;;  %v887_v48 = vld [vmem:[%s2057_s17 + $0x30] sm:$0xff]  ;;  %v886_v49 = vld [vmem:[%s2057_s17 + $0x28] sm:$0xff] }
 0x2d3   :  { %v1223_v51 = vpop.f32.mrf.mxu0 }
 0x2d4   :  { %vm393_vm6 = vcmp.ge.f32.partialorder %v390_v50, 0.0  ;;  %v394_v52 = vmul.f32 0.01, %v390_v50  ;;  %v884_v51 = vld [vmem:[%s2057_s17 + $0x18] sm:$0xff] }
 0x2d6   :  { %v395_v53 = vsel %vm393_vm6, %v390_v50, %v394_v52  ;;  %v885_v50 = vld [vmem:[%s2057_s17 + $0x20] sm:$0xff]  ;;  %v883_v52 = vld [vmem:[%s2057_s17 + $0x10] sm:$0xff] }
 0x2d7   :  { %1257 = vmatmul.mubr.f32.vlgmr.msra.gmra.mxu1 %v395_v53  ;;  %v882_v53 = vld [vmem:[%s2057_s17 + $0x8] sm:$0xff] }
 0x2d8   :  { %1326 = vmatprep.mubr.msk.f32.mxu1 %vm1409_vm0, %v1408_v34  ;;  %1295 = vmatpush3.msra.mxu1 %v603_v57 }
 0x2d9   :  { %1296 = vmatprep.subr.mxu1 %v1408_v34 }
 0x2da   :  { %1297 = vmatpush3.msra.mxu1 %v602_v58 }
 0x2db   :  { %1298 = vmatprep.subr.mxu1 %v1408_v34 }
 0x2dc   :  { %1299 = vmatpush3.msra.mxu1 %v601_v59  ;;  %v1076_v59 = vld [vmem:[%s2056_s16] ss:$0 sm:$0xff]  ;;  %s1050_s16 = sshll.u32 %s1410_s12, 4  ;;  %s1051_s16 = int_to_ptr.vmem [resolvable:$true] %s1050_s16 }
 0x2dd   :  { %1300 = vmatprep.subr.mxu1 %v1408_v34  ;;  %p1391_p1 = scmp.lt.s32.totalorder %s1051_s16, %s1051_s16 }
 0x2de   :  { %1301 = vmatpush3.msra.mxu1 %v600_v60 }
 0x2df   :  { %1302 = vmatprep.subr.mxu1 %v1408_v34 }
 0x2e0   :  { %1303 = vmatpush3.msra.mxu1 %v599_v61 }
 0x2e1   :  { %1304 = vmatprep.subr.mxu1 %v1408_v34 }
 0x2e2   :  { %1305 = vmatpush3.msra.mxu1 %v598_v62 }
 0x2e3   :  { %1306 = vmatprep.subr.mxu1 %v1408_v34 }
 0x2e4   :  { %1307 = vmatpush3.msra.mxu1 %v597_v63 }
 0x2e5   :  { %1308 = vmatprep.subr.mxu1 %v1408_v34 }
 0x2e6   :  { %1309 = vmatpush3.msra.mxu1 %v596_v0 }
 0x2e7   :  { %1310 = vmatprep.subr.mxu1 %v1408_v34 }
 0x2e8   :  { %1311 = vmatpush3.msra.mxu1 %v595_v1 }
 0x2e9   :  { %1312 = vmatprep.subr.mxu1 %v1408_v34 }
 0x2ea   :  { %1313 = vmatpush3.msra.mxu1 %v594_v2 }
 0x2eb   :  { %1314 = vmatprep.subr.mxu1 %v1408_v34 }
 0x2ec   :  { %1315 = vmatpush3.msra.mxu1 %v593_v3 }
 0x2ed   :  { %1316 = vmatprep.subr.mxu1 %v1408_v34 }
 0x2ee   :  { %1317 = vmatpush3.msra.mxu1 %v592_v4 }
 0x2ef   :  { %1318 = vmatprep.subr.mxu1 %v1408_v34 }
 0x2f0   :  { %1319 = vmatpush3.msra.mxu1 %v591_v5 }
 0x2f1   :  { %1320 = vmatprep.subr.mxu1 %v1408_v34 }
 0x2f2   :  { %1321 = vmatpush3.msra.mxu1 %v590_v12 }
 0x2f3   :  { %1322 = vmatprep.subr.mxu1 %v1408_v34 }
 0x2f4   :  { %1323 = vmatpush3.msra.mxu1 %v589_v13 }
 0x2f5   :  { %1324 = vmatprep.subr.mxu1 %v1408_v34 }
 0x2f6   :  { %1325 = vmatpush3.msra.mxu1 %v588_v14 }
 0x2f7   :  { %1364 = vmatprep.subr.mxu1 %v1408_v34 }
 0x397   :  { %v485_v7 = vpop.f32.mrf.mxu1 }
 0x398   :  { %v486_v8 = vadd.f32 %v1072_v6, %v485_v7 }
 0x399   :  { %v1258_v9 = vpop.f32.mrf.mxu1 }
 0x39a   :  { %vm489_vm7 = vcmp.ge.f32.partialorder %v486_v8, 0.0  ;;  %v490_v10 = vmul.f32 0.01, %v486_v8 }
 0x39c   :  { %v491_v11 = vsel %vm489_vm7, %v486_v8, %v490_v10 }
 0x39d   :  { %1292 = vmatmul.mubr.f32.vlgmr.msra.gmra.mxu0 %v491_v11 }
 0x39e   :  { %1361 = vmatprep.mubr.msk.f32.mxu0 %vm1409_vm0, %v1408_v34  ;;  %1330 = vmatpush3.msra.mxu0 %v699_v15 }
 0x39f   :  { %1331 = vmatprep.subr.mxu0 %v1408_v34 }
 0x3a0   :  { %1332 = vmatpush3.msra.mxu0 %v698_v16 }
 0x3a1   :  { %1333 = vmatprep.subr.mxu0 %v1408_v34 }
 0x3a2   :  { %1334 = vmatpush3.msra.mxu0 %v697_v17 }
 0x3a3   :  { %1335 = vmatprep.subr.mxu0 %v1408_v34 }
 0x3a4   :  { %1336 = vmatpush3.msra.mxu0 %v696_v18 }
 0x3a5   :  { %1337 = vmatprep.subr.mxu0 %v1408_v34 }
 0x3a6   :  { %1338 = vmatpush3.msra.mxu0 %v695_v19 }
 0x3a7   :  { %1339 = vmatprep.subr.mxu0 %v1408_v34 }
 0x3a8   :  { %1340 = vmatpush3.msra.mxu0 %v694_v20 }
 0x3a9   :  { %1341 = vmatprep.subr.mxu0 %v1408_v34 }
 0x3aa   :  { %1342 = vmatpush3.msra.mxu0 %v693_v21 }
 0x3ab   :  { %1343 = vmatprep.subr.mxu0 %v1408_v34 }
 0x3ac   :  { %1344 = vmatpush3.msra.mxu0 %v692_v22 }
 0x3ad   :  { %1345 = vmatprep.subr.mxu0 %v1408_v34 }
 0x3ae   :  { %1346 = vmatpush3.msra.mxu0 %v691_v23 }
 0x3af   :  { %1347 = vmatprep.subr.mxu0 %v1408_v34 }
 0x3b0   :  { %1348 = vmatpush3.msra.mxu0 %v690_v24 }
 0x3b1   :  { %1349 = vmatprep.subr.mxu0 %v1408_v34 }
 0x3b2   :  { %1350 = vmatpush3.msra.mxu0 %v689_v25 }
 0x3b3   :  { %1351 = vmatprep.subr.mxu0 %v1408_v34 }
 0x3b4   :  { %1352 = vmatpush3.msra.mxu0 %v688_v26 }
 0x3b5   :  { %1353 = vmatprep.subr.mxu0 %v1408_v34 }
 0x3b6   :  { %1354 = vmatpush3.msra.mxu0 %v687_v27 }
 0x3b7   :  { %1355 = vmatprep.subr.mxu0 %v1408_v34 }
 0x3b8   :  { %1356 = vmatpush3.msra.mxu0 %v686_v38 }
 0x3b9   :  { %1357 = vmatprep.subr.mxu0 %v1408_v34 }
 0x3ba   :  { %1358 = vmatpush3.msra.mxu0 %v685_v39 }
 0x3bb   :  { %1359 = vmatprep.subr.mxu0 %v1408_v34 }
 0x45d   :  { %v581_v29 = vpop.f32.mrf.mxu0 }
 0x45e   :  { %v582_v31 = vadd.f32 %v1073_v28, %v581_v29 }
 0x45f   :  { %v1293_v32 = vpop.f32.mrf.mxu0 }
 0x460   :  { %vm585_vm8 = vcmp.ge.f32.partialorder %v582_v31, 0.0  ;;  %v586_v33 = vmul.f32 0.01, %v582_v31 }
 0x462   :  { %v587_v36 = vsel %vm585_vm8, %v582_v31, %v586_v33 }
 0x463   :  { %1327 = vmatmul.mubr.f32.vlgmr.msra.gmra.mxu1 %v587_v36 }
 0x464   :  { %1365 = vmatpush3.msra.mxu1 %v779_v35  ;;  %1368 = vmatprep.mubr.msk.f32.mxu1 %vm1409_vm0, %v1408_v34 }
 0x465   :  { %1366 = vmatprep.subr.mxu1 %v1408_v34 }
 0x466   :  { %1367 = vmatpush3.msra.mxu1 %v778_v37 }
 0x467   :  { %1369 = vmatmul.mubr.msk.f32.vlgmr.msra.gmra.mxu1 %vm319_vm4, %v1729_v30  ;;  %v684_v30 = vld [vmem:[%s2053_s13] sm:$0xff]  ;;  %928 = vmatprep.subr.mxu1 %v896_v40 }
 0x468   :  { %976 = vmatprep.mubr.f32.mxu1 %v1408_v34  ;;  %1360 = vmatpush3.msra.mxu0 %v684_v30  ;;  %v893_v34 = vld [vmem:[%s2057_s17 + $0x60] sm:$0xff]  ;;  %s1386_s17 = scalar_lea.vmem %s1051_s16, 32 }
 0x469   :  { %929 = vmatpush1.msra.mxu1 %v895_v41  ;;  %p1387_p0 = scmp.ne.s32.totalorder %s1051_s16, %s1386_s17  ;;  %p1392_p2 = scmp.lt.s32.totalorder %s1386_s17, %s1386_s17 }
 0x46a   :  { %930 = vmatprep.subr.mxu1 %v894_v42 }
 0x46b   :  { %931 = vmatpush1.msra.mxu1 %v893_v34  ;;  %p1393_p3 = por %p1392_p2, %p1391_p1 }
 0x46c   :  { %932 = vmatprep.subr.mxu1 %v892_v43 }
 0x46d   :  { %933 = vmatpush1.msra.mxu1 %v891_v44  ;;  %p1394_p4 = pnand %p1393_p3, %p1387_p0 }
 0x46e   :  { %934 = vmatprep.subr.mxu1 %v890_v45 }
 0x46f   :  { %935 = vmatpush1.msra.mxu1 %v889_v46 }
 0x470   :  { %936 = vmatprep.subr.mxu1 %v888_v47 }
 0x471   :  { %937 = vmatpush1.msra.mxu1 %v887_v48 }
 0x472   :  { %938 = vmatprep.subr.mxu1 %v886_v49 }
 0x473   :  { %939 = vmatpush1.msra.mxu1 %v885_v50 }
 0x474   :  { %940 = vmatprep.subr.mxu1 %v884_v51 }
 0x475   :  { %941 = vmatpush1.msra.mxu1 %v883_v52 }
 0x476   :  { %942 = vmatprep.subr.mxu1 %v882_v53 }
 0x477   :  { %943 = vmatpush1.msra.mxu1 %v881_v54 }
 0x523   :  { %v677_v56 = vpop.f32.mrf.mxu1 }
 0x524   :  { %v678_v57 = vadd.f32 %v1074_v55, %v677_v56 }
 0x525   :  { %v1328_v58 = vpop.f32.mrf.mxu1 }
 0x526   :  { %vm681_vm9 = vcmp.ge.f32.partialorder %v678_v57, 0.0  ;;  %v682_v60 = vmul.f32 0.01, %v678_v57 }
 0x527   :  { %v853_v61 = vpop.f32.mrf.mxu1 }
 0x528   :  { %v854_v62 = vadd.f32 %v1076_v59, %v853_v61  ;;  %v683_v63 = vsel %vm681_vm9, %v678_v57, %v682_v60 }
 0x529   :  { %1362 = vmatmul.mubr.f32.vlgmr.msra.gmra.mxu0 %v683_v63  ;;  %v1370_v0 = vpop.f32.mrf.mxu1 }
 0x52a   :  { %v857_v1 = vsel %vm187_vm1, %v854_v62, 0.0 }
 0x52b   :  { %v858_v2 = vrot.slane %v857_v1, 4 }
 0x52d   :  { %v859_v3 = vadd.f32 %v858_v2, %v857_v1 }
 0x52f   :  { %v860_v4 = vrot.slane %v859_v3, 2 }
 0x531   :  { %v861_v5 = vadd.f32 %v860_v4, %v859_v3 }
 0x533   :  { %v862_v6 = vrot.slane %v861_v5, 1 }
 0x535   :  { %v863_v7 = vadd.f32 %v862_v6, %v861_v5 }
 0x537   :  { %v864_v8 = vmul.f32 0.5, %v863_v7 }
 0x539   :  { %v865_v9 = vsub.f32 %v854_v62, %v864_v8 }
 0x53b   :  { %v866_v10 = vmul.f32 %v865_v9, %v865_v9 }
 0x53d   :  { %v867_v11 = vsel %vm187_vm1, %v866_v10, 0.0 }
 0x53e   :  { %v868_v12 = vrot.slane %v867_v11, 4 }
 0x540   :  { %v869_v13 = vadd.f32 %v868_v12, %v867_v11 }
 0x542   :  { %v870_v14 = vrot.slane %v869_v13, 2 }
 0x544   :  { %v871_v15 = vadd.f32 %v870_v14, %v869_v13 }
 0x546   :  { %v872_v16 = vrot.slane %v871_v15, 1 }
 0x548   :  { %v873_v17 = vadd.f32 %v872_v16, %v871_v15 }
 0x54a   :  { %v874_v18 = vmul.f32 0.5, %v873_v17 }
 0x54c   :  { %v875_v19 = vadd.f32 1e-05, %v874_v18 }
 0x54e   :  { %1380 = vrsqrt.f32 %v875_v19 }
 0x55b   :  { %v1381_v20 = vpop.eup %1380 }
 0x55c   :  { %v877_v21 = vmul.f32 %v1381_v20, %v865_v9 }
 0x55e   :  { %v879_v22 = vmul.f32 0.01, %v877_v21  ;;  %vm878_vm10 = vcmp.ge.f32.partialorder %v877_v21, 0.0 }
 0x560   :  { %v880_v23 = vsel %vm878_vm10, %v877_v21, %v879_v22 }
 0x561   :  { %1078 = vmatmul.mubr.msk.f32.vlgmr.msra.gmra.mxu1 %vm228_vm3, %v880_v23 }
 0x562   :  { %1397 = shalt.err (!%p1394_p4)
}
 0x563   :  { %1053 = dma.vmem_to_hbm [thread:$0]  %s1051_s16, 32, %s2059_s19, [#allocation3]   ;;  %v1075_v24 = vld [vmem:[%s2054_s14] ss:$0 sm:$0xff]  ;;  %v899_v28 = vlaneseq  ;;  %vm983_vm11 = vcmask 1041408  }
 0x564   :  { %v897_v32 = vld [vmem:[%s2058_s18] sm:$0x3] }
 0x565   :  { %v900_v29 = vshrl.u32 %v899_v28, 7 }
 0x567   :  { %v901_v31 = vsub.s32 0, %v900_v29  ;;  %v905_v33 = vsub.s32 1, %v900_v29 }
 0x569   :  { %v902_v35 = vrot.slane %v897_v32, %v901_v31  ;;  %v906_v36 = vrot.slane %v897_v32, %v905_v33 }
 0x5e9   :  { %v773_v25 = vpop.f32.mrf.mxu0 }
 0x5ea   :  { %v774_v26 = vadd.f32 %v1075_v24, %v773_v25 }
 0x5eb   :  { %v1363_v27 = vpop.f32.mrf.mxu0 }
 0x5ec   :  { %777 = vst [vmem:[%s2060_s20] sm:$0x3] %v774_v26 }
 0x621   :  { %v978_v37 = vpop.f32.mrf.mxu1 }
 0x622   :  { %v979_v38 = vadd.f32 %v978_v37, %v902_v35 }
 0x623   :  { %v980_v39 = vpop.f32.mrf.mxu1 }
 0x624   :  { %v984_v30 = vsel %vm983_vm11, %v979_v38, 0.0  ;;  %v981_v40 = vadd.f32 %v980_v39, %v906_v36 }
 0x625   :  { %v985_v41 = vrot.slane %v984_v30, 4 }
 0x626   :  { %v991_v42 = vsel %vm983_vm11, %v981_v40, 0.0 }
 0x627   :  { %v986_v34 = vadd.f32 %v985_v41, %v984_v30  ;;  %v992_v43 = vrot.slane %v991_v42, 4 }
 0x629   :  { %v987_v44 = vrot.slane %v986_v34, 2  ;;  %v993_v45 = vadd.f32 %v992_v43, %v991_v42 }
 0x62b   :  { %v988_v46 = vadd.f32 %v987_v44, %v986_v34  ;;  %v994_v47 = vrot.slane %v993_v45, 2 }
 0x62d   :  { %v989_v48 = vrot.slane %v988_v46, 1  ;;  %v995_v49 = vadd.f32 %v994_v47, %v993_v45 }
 0x62f   :  { %v990_v50 = vadd.f32 %v989_v48, %v988_v46  ;;  %v996_v51 = vrot.slane %v995_v49, 1 }
 0x631   :  { %v998_v52 = vmul.f32 0.5, %v990_v50  ;;  %v997_v53 = vadd.f32 %v996_v51, %v995_v49 }
 0x633   :  { %v1000_v54 = vsub.f32 %v979_v38, %v998_v52  ;;  %v999_v55 = vmul.f32 0.5, %v997_v53 }
 0x635   :  { %v1002_v56 = vmul.f32 %v1000_v54, %v1000_v54  ;;  %v1001_v57 = vsub.f32 %v981_v40, %v999_v55 }
 0x637   :  { %v1004_v58 = vsel %vm983_vm11, %v1002_v56, 0.0  ;;  %v1003_v59 = vmul.f32 %v1001_v57, %v1001_v57 }
 0x638   :  { %v1005_v60 = vrot.slane %v1004_v58, 4 }
 0x639   :  { %v1011_v61 = vsel %vm983_vm11, %v1003_v59, 0.0 }
 0x63a   :  { %v1006_v62 = vadd.f32 %v1005_v60, %v1004_v58  ;;  %v1012_v63 = vrot.slane %v1011_v61, 4 }
 0x63c   :  { %v1007_v0 = vrot.slane %v1006_v62, 2  ;;  %v1013_v1 = vadd.f32 %v1012_v63, %v1011_v61 }
 0x63e   :  { %v1008_v2 = vadd.f32 %v1007_v0, %v1006_v62  ;;  %v1014_v3 = vrot.slane %v1013_v1, 2 }
 0x640   :  { %v1009_v4 = vrot.slane %v1008_v2, 1  ;;  %v1015_v5 = vadd.f32 %v1014_v3, %v1013_v1 }
 0x642   :  { %v1010_v6 = vadd.f32 %v1009_v4, %v1008_v2  ;;  %v1016_v7 = vrot.slane %v1015_v5, 1 }
 0x644   :  { %v1018_v8 = vmul.f32 0.5, %v1010_v6  ;;  %v1017_v9 = vadd.f32 %v1016_v7, %v1015_v5 }
 0x646   :  { %v1020_v10 = vadd.f32 1e-05, %v1018_v8  ;;  %v1019_v11 = vmul.f32 0.5, %v1017_v9 }
 0x648   :  { %1382 = vrsqrt.f32 %v1020_v10  ;;  %v1021_v12 = vadd.f32 1e-05, %v1019_v11 }
 0x64a   :  { %1384 = vrsqrt.f32 %v1021_v12 }
 0x655   :  { %v1383_v13 = vpop.eup %1382 }
 0x656   :  { %v1024_v14 = vmul.f32 %v1383_v13, %v1000_v54 }
 0x657   :  { %v1385_v15 = vpop.eup %1384 }
 0x658   :  { %v1028_v16 = vmul.f32 0.01, %v1024_v14  ;;  %v1025_v17 = vmul.f32 %v1385_v15, %v1001_v57  ;;  %vm1026_vm12 = vcmp.ge.f32.partialorder %v1024_v14, 0.0 }
 0x65a   :  { %vm1027_vm13 = vcmp.ge.f32.partialorder %v1025_v17, 0.0  ;;  %v1029_v18 = vmul.f32 0.01, %v1025_v17  ;;  %v1030_v19 = vsel %vm1026_vm12, %v1024_v14, %v1028_v16 }
 0x65c   :  { %v1031_v20 = vsel %vm1027_vm13, %v1025_v17, %v1029_v18 }
 0x65d   :  { %v1034_v21 = vcombine.low %v1030_v19, %v1031_v20 }
 0x65f   :  { %1079 = vst.sshfl [vmem:[%s2061_s21] sm:$0x33 pattern:$0x76325410] %v1034_v21 }
 0x660   :  { %1406 = dma.done.wait [#allocation3], 32  }
 0x661   :  { %1407 = vsyncadd [#allocation3], 4294967264 }
 0x662   :  { %1065 = vsyncpa [#allocation3], 1 }

// kernel: forward.40
= control target key start
LH: loop header
LB: loop body
LE: loop exit
PB: predicated region body
PF: predicated region fallthrough
CT: control target
= control target key end

     0   :  { %s285_s1 = inlined_call_operand.vmem [shape: bf16[128,128], index: 1, kind: input, shape index: {}]   ;;  %s286_s0 = inlined_call_operand.vmem [shape: bf16[32,128], index: 0, kind: input, shape index: {}]   ;;  %s287_s2 = inlined_call_operand.vmem [shape: bf16[32,128], index: 2, kind: output, shape index: {}]  }
   0x1   :  { %v224_v0 = vld [vmem:[%s285_s1 + $0x38] sm:$0xff]   ;;  %v225_v1 = vld [vmem:[%s285_s1 + $0x30] sm:$0xff]   ;;  %v226_v2 = vld [vmem:[%s285_s1 + $0x28] sm:$0xff]  }
   0x2   :  { %204 = vmatprep.subr.bf16.mxu0 %v224_v0  ;;  %v227_v3 = vld [vmem:[%s285_s1 + $0x20] sm:$0xff]   ;;  %v228_v5 = vld [vmem:[%s285_s1 + $0x18] sm:$0xff]   ;;  %v229_v6 = vld [vmem:[%s285_s1 + $0x10] sm:$0xff]  }
   0x3   :  { %205 = vmatpush3.bf16.msra.mxu0 %v224_v0  ;;  %v232_v4 = vld [vmem:[%s286_s0] sm:$0xff]   ;;  %v230_v7 = vld [vmem:[%s285_s1 + $0x8] sm:$0xff]  }
   0x4   :  { %206 = vmatprep.subr.bf16.mxu0 %v225_v1  ;;  %220 = vmatprep.mubr.bf16.mxu0 %v232_v4  ;;  %v231_v8 = vld [vmem:[%s285_s1] sm:$0xff]   ;;  %v233_v9 = vld [vmem:[%s286_s0 + $0x8] sm:$0xff]  }
   0x7   :  { %207 = vmatpush3.bf16.msra.mxu0 %v225_v1 }
   0x8   :  { %208 = vmatprep.subr.bf16.mxu0 %v226_v2 }
   0xb   :  { %209 = vmatpush3.bf16.msra.mxu0 %v226_v2 }
   0xc   :  { %210 = vmatprep.subr.bf16.mxu0 %v227_v3 }
   0xf   :  { %211 = vmatpush3.bf16.msra.mxu0 %v227_v3 }
  0x10   :  { %212 = vmatprep.subr.bf16.mxu0 %v228_v5 }
  0x13   :  { %213 = vmatpush3.bf16.msra.mxu0 %v228_v5 }
  0x14   :  { %214 = vmatprep.subr.bf16.mxu0 %v229_v6 }
  0x17   :  { %215 = vmatpush3.bf16.msra.mxu0 %v229_v6 }
  0x18   :  { %216 = vmatprep.subr.bf16.mxu0 %v230_v7 }
  0x1b   :  { %217 = vmatpush3.bf16.msra.mxu0 %v230_v7 }
  0x1c   :  { %218 = vmatprep.subr.bf16.mxu0 %v231_v8 }
  0x1f   :  { %219 = vmatpush3.bf16.msra.mxu0 %v231_v8 }
  0x22   :  { %221 = vmatmul.mubr.bf16.vlgmr.msra.gmra.mxu0 %v233_v9 }
  0xe2   :  { %v222_v10 = vpop.f32.mrf.mxu0 }
  0xe4   :  { %v126_v11 = vpop.f32.mrf.mxu0 }
  0xe6   :  { %v223_v12 = vpop.f32.mrf.mxu0 }
  0xe7   :  { %v191_v13 = vpack.c.bf16 %v223_v12, %v222_v10 }
  0xe8   :  { %v129_v14 = vpop.f32.mrf.mxu0 }
  0xe9   :  { %193 = vst [vmem:[%s287_s2 + $0x8] sm:$0xff] %v191_v13   ;;  %v186_v15 = vpack.c.bf16 %v129_v14, %v126_v11 }
  0xeb   :  { %187 = vst [vmem:[%s287_s2] sm:$0xff] %v186_v15  }

// kernel: forward.38
= control target key start
LH: loop header
LB: loop body
LE: loop exit
PB: predicated region body
PF: predicated region fallthrough
CT: control target
= control target key end

     0   :  { %s2271_s1 = inlined_call_operand.vmem [shape: bf16[1664,128], index: 1, kind: input, shape index: {}]   ;;  %s2272_s0 = inlined_call_operand.vmem [shape: bf16[32,1664], index: 0, kind: input, shape index: {}]   ;;  %s2273_s2 = inlined_call_operand.vmem [shape: bf16[32,128], index: 2, kind: output, shape index: {}]  }
   0x1   :  { %v1718_v0 = vld [vmem:[%s2271_s1 + $0x78] sm:$0xff]   ;;  %v1722_v4 = vld [vmem:[%s2271_s1 + $0x70] sm:$0xff]   ;;  %v1726_v8 = vld [vmem:[%s2271_s1 + $0x68] sm:$0xff]  }
   0x2   :  { %v1719_v1 = vld [vmem:[%s2271_s1 + $0xf8] sm:$0xff]   ;;  %1520 = vmatprep.subr.bf16.mxu0 %v1718_v0  ;;  %v1723_v5 = vld [vmem:[%s2271_s1 + $0xf0] sm:$0xff]   ;;  %v1727_v9 = vld [vmem:[%s2271_s1 + $0xe8] sm:$0xff]  }
   0x3   :  { %v1720_v2 = vld [vmem:[%s2271_s1 + $0x38] sm:$0xff]   ;;  %1548 = vmatprep.subr.bf16.mxu1 %v1719_v1  ;;  %v1724_v6 = vld [vmem:[%s2271_s1 + $0x30] sm:$0xff]   ;;  %v1728_v10 = vld [vmem:[%s2271_s1 + $0x28] sm:$0xff]  }
   0x4   :  { %v1721_v3 = vld [vmem:[%s2271_s1 + $0xb8] sm:$0xff]   ;;  %1521 = vmatpush3.bf16.msra.mxu0 %v1720_v2  ;;  %v1725_v7 = vld [vmem:[%s2271_s1 + $0xb0] sm:$0xff]   ;;  %v1729_v11 = vld [vmem:[%s2271_s1 + $0xa8] sm:$0xff]  }
   0x5   :  { %1549 = vmatpush3.bf16.msra.mxu1 %v1721_v3  ;;  %1522 = vmatprep.subr.bf16.mxu0 %v1722_v4  ;;  %v1730_v12 = vld [vmem:[%s2271_s1 + $0x60] sm:$0xff]   ;;  %v1734_v16 = vld [vmem:[%s2271_s1 + $0x58] sm:$0xff]   ;;  %v1738_v20 = vld [vmem:[%s2271_s1 + $0x50] sm:$0xff]  }
   0x6   :  { %1550 = vmatprep.subr.bf16.mxu1 %v1723_v5  ;;  %v1731_v13 = vld [vmem:[%s2271_s1 + $0xe0] sm:$0xff]   ;;  %v1735_v17 = vld [vmem:[%s2271_s1 + $0xd8] sm:$0xff]   ;;  %v1739_v21 = vld [vmem:[%s2271_s1 + $0xd0] sm:$0xff]  }
   0x7   :  { %v1732_v14 = vld [vmem:[%s2271_s1 + $0x20] sm:$0xff]   ;;  %v1736_v18 = vld [vmem:[%s2271_s1 + $0x18] sm:$0xff]   ;;  %v1740_v22 = vld [vmem:[%s2271_s1 + $0x10] sm:$0xff]  }
   0x8   :  { %1523 = vmatpush3.bf16.msra.mxu0 %v1724_v6  ;;  %v1733_v15 = vld [vmem:[%s2271_s1 + $0xa0] sm:$0xff]   ;;  %v1737_v19 = vld [vmem:[%s2271_s1 + $0x98] sm:$0xff]   ;;  %v1741_v23 = vld [vmem:[%s2271_s1 + $0x90] sm:$0xff]  }
   0x9   :  { %1551 = vmatpush3.bf16.msra.mxu1 %v1725_v7  ;;  %1524 = vmatprep.subr.bf16.mxu0 %v1726_v8  ;;  %v1742_v24 = vld [vmem:[%s2271_s1 + $0x48] sm:$0xff]   ;;  %v1746_v28 = vld [vmem:[%s2271_s1 + $0x40] sm:$0xff]   ;;  %v1756_v36 = vld [vmem:[%s2271_s1 + $0x178] sm:$0xff]  }
   0xa   :  { %1552 = vmatprep.subr.bf16.mxu1 %v1727_v9  ;;  %v1743_v25 = vld [vmem:[%s2271_s1 + $0xc8] sm:$0xff]   ;;  %v1747_v29 = vld [vmem:[%s2271_s1 + $0xc0] sm:$0xff]   ;;  %v1757_v37 = vld [vmem:[%s2271_s1 + $0x138] sm:$0xff]  }
   0xb   :  { %v1744_v26 = vld [vmem:[%s2271_s1 + $0x8] sm:$0xff]   ;;  %v1748_v30 = vld [vmem:[%s2271_s1] sm:$0xff]   ;;  %v1758_v38 = vld [vmem:[%s2271_s1 + $0x1f8] sm:$0xff]  }
   0xc   :  { %1525 = vmatpush3.bf16.msra.mxu0 %v1728_v10  ;;  %v1745_v27 = vld [vmem:[%s2271_s1 + $0x88] sm:$0xff]   ;;  %v1749_v31 = vld [vmem:[%s2271_s1 + $0x80] sm:$0xff]   ;;  %v1759_v39 = vld [vmem:[%s2271_s1 + $0x1b8] sm:$0xff]  }
   0xd   :  { %1553 = vmatpush3.bf16.msra.mxu1 %v1729_v11  ;;  %1526 = vmatprep.subr.bf16.mxu0 %v1730_v12  ;;  %v1750_v32 = vld [vmem:[%s2272_s0] ss:$52 sps:$4 sm:$0xff]   ;;  %v1752_v33 = vld [vmem:[%s2272_s0 + $0x4] ss:$52 sps:$4 sm:$0xff]   ;;  %v1753_v34 = vld [vmem:[%s2272_s0 + $0x8] ss:$52 sps:$4 sm:$0xff]  }
   0xe   :  { %1554 = vmatprep.subr.bf16.mxu1 %v1731_v13  ;;  %v1755_v35 = vld [vmem:[%s2272_s0 + $0xc] ss:$52 sps:$4 sm:$0xff]   ;;  %1036 = vmatprep.mubr.bf16.mxu0 %v1752_v33  ;;  %v1760_v40 = vld [vmem:[%s2271_s1 + $0x170] sm:$0xff]   ;;  %v1772_v52 = vld [vmem:[%s2271_s1 + $0x158] sm:$0xff]  }
   0xf   :  { %1085 = vmatprep.mubr.bf16.mxu1 %v1755_v35  ;;  %v1761_v41 = vld [vmem:[%s2271_s1 + $0x130] sm:$0xff]   ;;  %v1764_v44 = vld [vmem:[%s2271_s1 + $0x168] sm:$0xff]   ;;  %v1768_v48 = vld [vmem:[%s2271_s1 + $0x160] sm:$0xff]  }
  0x10   :  { %1527 = vmatpush3.bf16.msra.mxu0 %v1732_v14  ;;  %v1762_v42 = vld [vmem:[%s2271_s1 + $0x1f0] sm:$0xff]   ;;  %v1765_v45 = vld [vmem:[%s2271_s1 + $0x128] sm:$0xff]   ;;  %v1769_v49 = vld [vmem:[%s2271_s1 + $0x120] sm:$0xff]  }
  0x11   :  { %1555 = vmatpush3.bf16.msra.mxu1 %v1733_v15  ;;  %1528 = vmatprep.subr.bf16.mxu0 %v1734_v16  ;;  %v1763_v43 = vld [vmem:[%s2271_s1 + $0x1b0] sm:$0xff]   ;;  %v1766_v46 = vld [vmem:[%s2271_s1 + $0x1e8] sm:$0xff]   ;;  %v1770_v50 = vld [vmem:[%s2271_s1 + $0x1e0] sm:$0xff]  }
  0x12   :  { %1556 = vmatprep.subr.bf16.mxu1 %v1735_v17  ;;  %v1767_v47 = vld [vmem:[%s2271_s1 + $0x1a8] sm:$0xff]   ;;  %v1771_v51 = vld [vmem:[%s2271_s1 + $0x1a0] sm:$0xff]   ;;  %v1773_v53 = vld [vmem:[%s2271_s1 + $0x118] sm:$0xff]  }
  0x13   :  { %v1774_v54 = vld [vmem:[%s2272_s0 + $0x6c] ss:$52 sps:$4 sm:$0xff]   ;;  %v1776_v55 = vld [vmem:[%s2272_s0 + $0x74] ss:$52 sps:$4 sm:$0xff]   ;;  %v1778_v56 = vld [vmem:[%s2271_s1 + $0x1d8] sm:$0xff]  }
  0x14   :  { %1529 = vmatpush3.bf16.msra.mxu0 %v1736_v18  ;;  %v1779_v57 = vld [vmem:[%s2272_s0 + $0x68] ss:$52 sps:$4 sm:$0xff]   ;;  %v1780_v58 = vld [vmem:[%s2272_s0 + $0x70] ss:$52 sps:$4 sm:$0xff]   ;;  %v1798_v11 = vld [vmem:[%s2272_s0 + $0x18] ss:$52 sps:$4 sm:$0xff]  }
  0x15   :  { %1557 = vmatpush3.bf16.msra.mxu1 %v1737_v19  ;;  %1530 = vmatprep.subr.bf16.mxu0 %v1738_v20  ;;  %v1781_v59 = vld [vmem:[%s2271_s1 + $0x198] sm:$0xff]   ;;  %v1782_v60 = vld [vmem:[%s2271_s1 + $0x150] sm:$0xff]   ;;  %v1786_v0 = vld [vmem:[%s2271_s1 + $0x148] sm:$0xff]  }
  0x16   :  { %1558 = vmatprep.subr.bf16.mxu1 %v1739_v21  ;;  %v1783_v61 = vld [vmem:[%s2271_s1 + $0x110] sm:$0xff]   ;;  %v1787_v1 = vld [vmem:[%s2271_s1 + $0x108] sm:$0xff]   ;;  %v1790_v4 = vld [vmem:[%s2271_s1 + $0x140] sm:$0xff]  }
  0x17   :  { %v1784_v62 = vld [vmem:[%s2271_s1 + $0x1d0] sm:$0xff]   ;;  %v1788_v2 = vld [vmem:[%s2271_s1 + $0x1c8] sm:$0xff]   ;;  %v1791_v5 = vld [vmem:[%s2271_s1 + $0x100] sm:$0xff]  }
  0x18   :  { %1531 = vmatpush3.bf16.msra.mxu0 %v1740_v22  ;;  %v1785_v63 = vld [vmem:[%s2271_s1 + $0x190] sm:$0xff]   ;;  %v1789_v3 = vld [vmem:[%s2271_s1 + $0x188] sm:$0xff]   ;;  %v1792_v6 = vld [vmem:[%s2271_s1 + $0x1c0] sm:$0xff]  }
  0x19   :  { %1559 = vmatpush3.bf16.msra.mxu1 %v1741_v23  ;;  %1532 = vmatprep.subr.bf16.mxu0 %v1742_v24  ;;  %v1793_v7 = vld [vmem:[%s2272_s0 + $0x10] ss:$52 sps:$4 sm:$0xff]   ;;  %v1795_v8 = vld [vmem:[%s2272_s0 + $0x14] ss:$52 sps:$4 sm:$0xff]   ;;  %v1797_v10 = vld [vmem:[%s2271_s1 + $0x278] sm:$0xff]  }
  0x1a   :  { %1560 = vmatprep.subr.bf16.mxu1 %v1743_v25  ;;  %v1796_v9 = vld [vmem:[%s2271_s1 + $0x180] sm:$0xff]   ;;  %v1800_v12 = vld [vmem:[%s2272_s0 + $0x1c] ss:$52 sps:$4 sm:$0xff]   ;;  %v1810_v21 = vld [vmem:[%s2272_s0 + $0x78] ss:$52 sps:$4 sm:$0xff]  }
  0x1b   :  { %v1801_v13 = vld [vmem:[%s2271_s1 + $0x238] sm:$0xff]   ;;  %v1804_v16 = vld [vmem:[%s2271_s1 + $0x270] sm:$0xff]   ;;  %v1811_v22 = vld [vmem:[%s2271_s1 + $0x268] sm:$0xff]  }
  0x1c   :  { %1533 = vmatpush3.bf16.msra.mxu0 %v1744_v26  ;;  %v1802_v14 = vld [vmem:[%s2271_s1 + $0x2f8] sm:$0xff]   ;;  %v1805_v17 = vld [vmem:[%s2271_s1 + $0x230] sm:$0xff]   ;;  %v1814_v24 = vld [vmem:[%s2271_s1 + $0x228] sm:$0xff]  }
  0x1d   :  { %1561 = vmatpush3.bf16.msra.mxu1 %v1745_v27  ;;  %1534 = vmatprep.subr.bf16.mxu0 %v1746_v28  ;;  %v1803_v15 = vld [vmem:[%s2271_s1 + $0x2b8] sm:$0xff]   ;;  %v1806_v18 = vld [vmem:[%s2271_s1 + $0x2f0] sm:$0xff]   ;;  %v1816_v26 = vld [vmem:[%s2271_s1 + $0x2e8] sm:$0xff]  }
  0x1e   :  { %1562 = vmatprep.subr.bf16.mxu1 %v1747_v29  ;;  %v1807_v19 = vld [vmem:[%s2272_s0 + $0x7c] ss:$52 sps:$4 sm:$0xff]   ;;  %v1812_v23 = vld [vmem:[%s2272_s0 + $0x84] ss:$52 sps:$4 sm:$0xff]   ;;  %v1815_v25 = vld [vmem:[%s2272_s0 + $0x80] ss:$52 sps:$4 sm:$0xff]  }
  0x1f   :  { %v1809_v20 = vld [vmem:[%s2271_s1 + $0x2b0] sm:$0xff]   ;;  %v1817_v27 = vld [vmem:[%s2271_s1 + $0x2a8] sm:$0xff]   ;;  %v1818_v28 = vld [vmem:[%s2271_s1 + $0x260] sm:$0xff]  }
  0x20   :  { %1535 = vmatpush3.bf16.msra.mxu0 %v1748_v30  ;;  %v1819_v29 = vld [vmem:[%s2271_s1 + $0x220] sm:$0xff]   ;;  %v1823_v33 = vld [vmem:[%s2271_s1 + $0x218] sm:$0xff]  }
  0x21   :  { %1563 = vmatpush3.bf16.msra.mxu1 %v1749_v31  ;;  %1576 = vmatprep.subr.bf16.mxu0 %v1756_v36  ;;  %v1820_v30 = vld [vmem:[%s2271_s1 + $0x2e0] sm:$0xff]   ;;  %v1825_v35 = vld [vmem:[%s2271_s1 + $0x298] sm:$0xff]   ;;  %v1826_v36 = vld [vmem:[%s2271_s1 + $0x250] sm:$0xff]  }
  0x22   :  { %1604 = vmatprep.subr.bf16.mxu1 %v1758_v38  ;;  %v1821_v31 = vld [vmem:[%s2271_s1 + $0x2a0] sm:$0xff]   ;;  %v1828_v38 = vld [vmem:[%s2271_s1 + $0x2d0] sm:$0xff]  }
  0x23   :  { %1037 = vmatmul.mubr.bf16.vlgmr.msra.gmra.mxu0 %v1750_v32  ;;  %v1822_v32 = vld [vmem:[%s2271_s1 + $0x258] sm:$0xff]  }
  0x24   :  { %1086 = vmatmul.mubr.bf16.vlgmr.msra.gmra.mxu1 %v1753_v34  ;;  %1577 = vmatpush3.bf16.msra.mxu0 %v1757_v37  ;;  %v1824_v34 = vld [vmem:[%s2271_s1 + $0x2d8] sm:$0xff]   ;;  %v1827_v37 = vld [vmem:[%s2271_s1 + $0x210] sm:$0xff]  }
  0x25   :  { %1605 = vmatpush3.bf16.msra.mxu1 %v1759_v39  ;;  %1578 = vmatprep.subr.bf16.mxu0 %v1760_v40  ;;  %v1829_v39 = vld [vmem:[%s2271_s1 + $0x290] sm:$0xff]   ;;  %v1830_v40 = vld [vmem:[%s2271_s1 + $0x248] sm:$0xff]  }
  0x26   :  { %1606 = vmatprep.subr.bf16.mxu1 %v1762_v42  ;;  %1044 = vmatprep.mubr.bf16.mxu0 %v1774_v54  ;;  %v1832_v42 = vld [vmem:[%s2271_s1 + $0x2c8] sm:$0xff]  }
  0x27   :  { %1093 = vmatprep.mubr.bf16.mxu1 %v1776_v55  ;;  %v1846_v54 = vld [vmem:[%s2272_s0 + $0x8c] ss:$52 sps:$4 sm:$0xff]   ;;  %v1848_v55 = vld [vmem:[%s2272_s0 + $0x88] ss:$52 sps:$4 sm:$0xff]  }
  0x28   :  { %1579 = vmatpush3.bf16.msra.mxu0 %v1761_v41  ;;  %v1831_v41 = vld [vmem:[%s2271_s1 + $0x208] sm:$0xff]  }
  0x29   :  { %1607 = vmatpush3.bf16.msra.mxu1 %v1763_v43  ;;  %1580 = vmatprep.subr.bf16.mxu0 %v1764_v44  ;;  %v1833_v43 = vld [vmem:[%s2271_s1 + $0x288] sm:$0xff]   ;;  %v1834_v44 = vld [vmem:[%s2271_s1 + $0x240] sm:$0xff]  }
  0x2a   :  { %1608 = vmatprep.subr.bf16.mxu1 %v1766_v46  ;;  %v1836_v46 = vld [vmem:[%s2271_s1 + $0x2c0] sm:$0xff]  }
  0x2b   :  { %1045 = vmatmul.mubr.bf16.gmra.mxu0 %v1779_v57  ;;  %v1850_v57 = vld [vmem:[%s2272_s0 + $0x94] ss:$52 sps:$4 sm:$0xff]  }
  0x2c   :  { %1581 = vmatpush3.bf16.msra.mxu0 %v1765_v45  ;;  %1094 = vmatmul.mubr.bf16.gmra.mxu1 %v1780_v58  ;;  %v1835_v45 = vld [vmem:[%s2271_s1 + $0x200] sm:$0xff]  }
  0x2d   :  { %1609 = vmatpush3.bf16.msra.mxu1 %v1767_v47  ;;  %1582 = vmatprep.subr.bf16.mxu0 %v1768_v48  ;;  %v1837_v47 = vld [vmem:[%s2272_s0 + $0x20] ss:$52 sps:$4 sm:$0xff]   ;;  %v1839_v48 = vld [vmem:[%s2272_s0 + $0x24] ss:$52 sps:$4 sm:$0xff]  }
  0x2e   :  { %1610 = vmatprep.subr.bf16.mxu1 %v1770_v50  ;;  %1134 = vmatprep.mubr.bf16.mxu0 %v1795_v8  ;;  %v1841_v50 = vld [vmem:[%s2271_s1 + $0x338] sm:$0xff]   ;;  %v1853_v58 = vld [vmem:[%s2271_s1 + $0x320] sm:$0xff]  }
  0x2f   :  { %1183 = vmatprep.mubr.bf16.mxu1 %v1800_v12 }
  0x30   :  { %1583 = vmatpush3.bf16.msra.mxu0 %v1769_v49  ;;  %v1840_v49 = vld [vmem:[%s2271_s1 + $0x280] sm:$0xff]  }
  0x31   :  { %1611 = vmatpush3.bf16.msra.mxu1 %v1771_v51  ;;  %1584 = vmatprep.subr.bf16.mxu0 %v1772_v52  ;;  %v1842_v51 = vld [vmem:[%s2272_s0 + $0x28] ss:$52 sps:$4 sm:$0xff]   ;;  %v1844_v52 = vld [vmem:[%s2272_s0 + $0x2c] ss:$52 sps:$4 sm:$0xff]  }
  0x32   :  { %1612 = vmatprep.subr.bf16.mxu1 %v1778_v56  ;;  %v1849_v56 = vld [vmem:[%s2271_s1 + $0x328] sm:$0xff]  }
  0x34   :  { %1585 = vmatpush3.bf16.msra.mxu0 %v1773_v53  ;;  %v1845_v53 = vld [vmem:[%s2271_s1 + $0x330] sm:$0xff]  }
  0x35   :  { %1613 = vmatpush3.bf16.msra.mxu1 %v1781_v59  ;;  %1586 = vmatprep.subr.bf16.mxu0 %v1782_v60  ;;  %v1852_v59 = vld [vmem:[%s2272_s0 + $0x90] ss:$52 sps:$4 sm:$0xff]   ;;  %v1854_v60 = vld [vmem:[%s2271_s1 + $0x318] sm:$0xff]  }
  0x36   :  { %1614 = vmatprep.subr.bf16.mxu1 %v1784_v62  ;;  %v1855_v62 = vld [vmem:[%s2271_s1 + $0x310] sm:$0xff]  }
  0x38   :  { %1587 = vmatpush3.bf16.msra.mxu0 %v1783_v61  ;;  %v1858_v61 = vld [vmem:[%s2272_s0 + $0x30] ss:$52 sps:$4 sm:$0xff]  }
  0x39   :  { %1615 = vmatpush3.bf16.msra.mxu1 %v1785_v63  ;;  %1588 = vmatprep.subr.bf16.mxu0 %v1786_v0  ;;  %v1856_v63 = vld [vmem:[%s2271_s1 + $0x308] sm:$0xff]   ;;  %v1857_v0 = vld [vmem:[%s2271_s1 + $0x300] sm:$0xff]  }
  0x3a   :  { %1616 = vmatprep.subr.bf16.mxu1 %v1788_v2 }
  0x3c   :  { %1589 = vmatpush3.bf16.msra.mxu0 %v1787_v1  ;;  %v1859_v1 = vld [vmem:[%s2272_s0 + $0x98] ss:$52 sps:$4 sm:$0xff]  }
  0x3d   :  { %1617 = vmatpush3.bf16.msra.mxu1 %v1789_v3  ;;  %1590 = vmatprep.subr.bf16.mxu0 %v1790_v4 }
  0x3e   :  { %1618 = vmatprep.subr.bf16.mxu1 %v1792_v6 }
  0x40   :  { %1591 = vmatpush3.bf16.msra.mxu0 %v1791_v5 }
  0x41   :  { %1619 = vmatpush3.bf16.msra.mxu1 %v1796_v9  ;;  %1632 = vmatprep.subr.bf16.mxu0 %v1797_v10 }
  0x42   :  { %1660 = vmatprep.subr.bf16.mxu1 %v1802_v14 }
  0x43   :  { %1135 = vmatmul.mubr.bf16.vlgmr.msra.gmra.mxu0 %v1793_v7 }
  0x44   :  { %1633 = vmatpush3.bf16.msra.mxu0 %v1801_v13  ;;  %1184 = vmatmul.mubr.bf16.vlgmr.msra.gmra.mxu1 %v1798_v11 }
  0x45   :  { %1661 = vmatpush3.bf16.msra.mxu1 %v1803_v15  ;;  %1634 = vmatprep.subr.bf16.mxu0 %v1804_v16 }
  0x46   :  { %1662 = vmatprep.subr.bf16.mxu1 %v1806_v18  ;;  %1142 = vmatprep.mubr.bf16.mxu0 %v1807_v19 }
  0x47   :  { %1191 = vmatprep.mubr.bf16.mxu1 %v1812_v23 }
  0x48   :  { %1635 = vmatpush3.bf16.msra.mxu0 %v1805_v17 }
  0x49   :  { %1663 = vmatpush3.bf16.msra.mxu1 %v1809_v20  ;;  %1636 = vmatprep.subr.bf16.mxu0 %v1811_v22 }
  0x4a   :  { %1664 = vmatprep.subr.bf16.mxu1 %v1816_v26 }
  0x4b   :  { %1143 = vmatmul.mubr.bf16.gmra.mxu0 %v1810_v21 }
  0x4c   :  { %1637 = vmatpush3.bf16.msra.mxu0 %v1814_v24  ;;  %1192 = vmatmul.mubr.bf16.gmra.mxu1 %v1815_v25 }
  0x4d   :  { %1665 = vmatpush3.bf16.msra.mxu1 %v1817_v27  ;;  %1638 = vmatprep.subr.bf16.mxu0 %v1818_v28 }
  0x4e   :  { %1666 = vmatprep.subr.bf16.mxu1 %v1820_v30  ;;  %1232 = vmatprep.mubr.bf16.mxu0 %v1839_v48 }
  0x4f   :  { %1281 = vmatprep.mubr.bf16.mxu1 %v1844_v52 }
  0x50   :  { %1639 = vmatpush3.bf16.msra.mxu0 %v1819_v29 }
  0x51   :  { %1667 = vmatpush3.bf16.msra.mxu1 %v1821_v31  ;;  %1640 = vmatprep.subr.bf16.mxu0 %v1822_v32 }
  0x52   :  { %1668 = vmatprep.subr.bf16.mxu1 %v1824_v34 }
  0x54   :  { %1641 = vmatpush3.bf16.msra.mxu0 %v1823_v33 }
  0x55   :  { %1669 = vmatpush3.bf16.msra.mxu1 %v1825_v35  ;;  %1642 = vmatprep.subr.bf16.mxu0 %v1826_v36 }
  0x56   :  { %1670 = vmatprep.subr.bf16.mxu1 %v1828_v38 }
  0x58   :  { %1643 = vmatpush3.bf16.msra.mxu0 %v1827_v37 }
  0x59   :  { %1671 = vmatpush3.bf16.msra.mxu1 %v1829_v39  ;;  %1644 = vmatprep.subr.bf16.mxu0 %v1830_v40 }
  0x5a   :  { %1672 = vmatprep.subr.bf16.mxu1 %v1832_v42 }
  0x5c   :  { %1645 = vmatpush3.bf16.msra.mxu0 %v1831_v41 }
  0x5d   :  { %1673 = vmatpush3.bf16.msra.mxu1 %v1833_v43  ;;  %1646 = vmatprep.subr.bf16.mxu0 %v1834_v44 }
  0x5e   :  { %1674 = vmatprep.subr.bf16.mxu1 %v1836_v46 }
  0x60   :  { %1647 = vmatpush3.bf16.msra.mxu0 %v1835_v45 }
  0x61   :  { %1675 = vmatpush3.bf16.msra.mxu1 %v1840_v49  ;;  %1698 = vmatprep.subr.bf16.mxu0 %v1841_v50 }
  0x63   :  { %1233 = vmatmul.mubr.bf16.vlgmr.msra.gmra.mxu0 %v1837_v47 }
  0x64   :  { %1699 = vmatpush3.bf16.msra.mxu0 %v1841_v50  ;;  %1282 = vmatmul.mubr.bf16.vlgmr.msra.gmra.mxu1 %v1842_v51 }
  0x65   :  { %1700 = vmatprep.subr.bf16.mxu0 %v1845_v53  ;;  %1240 = vmatprep.mubr.bf16.mxu0 %v1846_v54 }
  0x66   :  { %1289 = vmatprep.mubr.bf16.mxu1 %v1850_v57 }
  0x68   :  { %1701 = vmatpush3.bf16.msra.mxu0 %v1845_v53 }
  0x69   :  { %1702 = vmatprep.subr.bf16.mxu0 %v1849_v56 }
  0x6b   :  { %1241 = vmatmul.mubr.bf16.gmra.mxu0 %v1848_v55 }
  0x6c   :  { %1703 = vmatpush3.bf16.msra.mxu0 %v1849_v56  ;;  %1290 = vmatmul.mubr.bf16.gmra.mxu1 %v1852_v59 }
  0x6d   :  { %1704 = vmatprep.subr.bf16.mxu0 %v1853_v58  ;;  %1714 = vmatprep.mubr.bf16.mxu0 %v1858_v61 }
  0x70   :  { %1705 = vmatpush3.bf16.msra.mxu0 %v1853_v58 }
  0x71   :  { %1706 = vmatprep.subr.bf16.mxu0 %v1854_v60 }
  0x74   :  { %1707 = vmatpush3.bf16.msra.mxu0 %v1854_v60 }
  0x75   :  { %1708 = vmatprep.subr.bf16.mxu0 %v1855_v62 }
  0x78   :  { %1709 = vmatpush3.bf16.msra.mxu0 %v1855_v62 }
  0x79   :  { %1710 = vmatprep.subr.bf16.mxu0 %v1856_v63 }
  0x7c   :  { %1711 = vmatpush3.bf16.msra.mxu0 %v1856_v63 }
  0x7d   :  { %1712 = vmatprep.subr.bf16.mxu0 %v1857_v0 }
  0x80   :  { %1713 = vmatpush3.bf16.msra.mxu0 %v1857_v0 }
  0x83   :  { %1715 = vmatmul.mubr.bf16.vlgmr.msra.gmra.mxu0 %v1859_v1 }
  0xe3   :  { %v1536_v2 = vpop.f32.mrf.mxu0 }
  0xe4   :  { %v1564_v3 = vpop.f32.mrf.mxu1 }
  0xe5   :  { %v1537_v4 = vpop.f32.mrf.mxu0 }
  0xe6   :  { %v1565_v5 = vpop.f32.mrf.mxu1  ;;  %v1538_v49 = vadd.f32 %v1537_v4, %v1536_v2 }
  0xe7   :  { %v1539_v6 = vpop.f32.mrf.mxu0  ;;  %v1566_v50 = vadd.f32 %v1565_v5, %v1564_v3 }
  0xe8   :  { %v1567_v7 = vpop.f32.mrf.mxu1 }
  0xe9   :  { %v1540_v8 = vpop.f32.mrf.mxu0  ;;  %v1088_v61 = vadd.f32 %v1566_v50, %v1538_v49 }
  0xea   :  { %v1568_v10 = vpop.f32.mrf.mxu1  ;;  %v1541_v51 = vadd.f32 %v1540_v8, %v1539_v6 }
  0xeb   :  { %v1542_v9 = vpop.f32.mrf.mxu0  ;;  %v1569_v52 = vadd.f32 %v1568_v10, %v1567_v7 }
  0xec   :  { %v1570_v11 = vpop.f32.mrf.mxu1 }
  0xed   :  { %v1543_v12 = vpop.f32.mrf.mxu0  ;;  %v1091_v62 = vadd.f32 %v1569_v52, %v1541_v51 }
  0xee   :  { %v1571_v13 = vpop.f32.mrf.mxu1  ;;  %v1544_v45 = vadd.f32 %v1543_v12, %v1542_v9 }
  0xef   :  { %v1545_v14 = vpop.f32.mrf.mxu0  ;;  %v1572_v46 = vadd.f32 %v1571_v13, %v1570_v11 }
  0xf0   :  { %v1573_v15 = vpop.f32.mrf.mxu1 }
  0xf1   :  { %v1546_v16 = vpop.f32.mrf.mxu0  ;;  %v1096_v59 = vadd.f32 %v1572_v46, %v1544_v45 }
  0xf2   :  { %v1574_v18 = vpop.f32.mrf.mxu1  ;;  %v1547_v47 = vadd.f32 %v1546_v16, %v1545_v14 }
  0xf3   :  { %v1575_v48 = vadd.f32 %v1574_v18, %v1573_v15 }
  0xf5   :  { %v1099_v60 = vadd.f32 %v1575_v48, %v1547_v47 }
 0x103   :  { %v1592_v17 = vpop.f32.mrf.mxu0 }
 0x104   :  { %v1620_v20 = vpop.f32.mrf.mxu1 }
 0x105   :  { %v1593_v19 = vpop.f32.mrf.mxu0 }
 0x106   :  { %v1621_v22 = vpop.f32.mrf.mxu1  ;;  %v1594_v57 = vadd.f32 %v1593_v19, %v1592_v17 }
 0x107   :  { %v1595_v21 = vpop.f32.mrf.mxu0  ;;  %v1622_v3 = vadd.f32 %v1621_v22, %v1620_v20 }
 0x108   :  { %v1623_v24 = vpop.f32.mrf.mxu1  ;;  %v1137_v2 = vadd.f32 %v1594_v57, %v1088_v61 }
 0x109   :  { %v1596_v23 = vpop.f32.mrf.mxu0 }
 0x10a   :  { %v1624_v26 = vpop.f32.mrf.mxu1  ;;  %v1597_v58 = vadd.f32 %v1596_v23, %v1595_v21  ;;  %v1186_v16 = vadd.f32 %v1622_v3, %v1137_v2 }
 0x10b   :  { %v1598_v25 = vpop.f32.mrf.mxu0  ;;  %v1625_v5 = vadd.f32 %v1624_v26, %v1623_v24 }
 0x10c   :  { %v1626_v28 = vpop.f32.mrf.mxu1  ;;  %v1140_v4 = vadd.f32 %v1597_v58, %v1091_v62 }
 0x10d   :  { %v1599_v27 = vpop.f32.mrf.mxu0 }
 0x10e   :  { %v1627_v30 = vpop.f32.mrf.mxu1  ;;  %v1600_v55 = vadd.f32 %v1599_v27, %v1598_v25  ;;  %v1189_v17 = vadd.f32 %v1625_v5, %v1140_v4 }
 0x10f   :  { %v1601_v29 = vpop.f32.mrf.mxu0  ;;  %v1628_v9 = vadd.f32 %v1627_v30, %v1626_v28 }
 0x110   :  { %v1629_v32 = vpop.f32.mrf.mxu1  ;;  %v1145_v1 = vadd.f32 %v1600_v55, %v1096_v59 }
 0x111   :  { %v1602_v31 = vpop.f32.mrf.mxu0 }
 0x112   :  { %v1630_v34 = vpop.f32.mrf.mxu1  ;;  %v1603_v56 = vadd.f32 %v1602_v31, %v1601_v29  ;;  %v1194_v10 = vadd.f32 %v1628_v9, %v1145_v1 }
 0x113   :  { %v1631_v12 = vadd.f32 %v1630_v34, %v1629_v32 }
 0x114   :  { %v1148_v11 = vadd.f32 %v1603_v56, %v1099_v60 }
 0x116   :  { %v1197_v13 = vadd.f32 %v1631_v12, %v1148_v11 }
 0x123   :  { %v1648_v33 = vpop.f32.mrf.mxu0 }
 0x124   :  { %v1676_v36 = vpop.f32.mrf.mxu1 }
 0x125   :  { %v1649_v35 = vpop.f32.mrf.mxu0 }
 0x126   :  { %v1677_v38 = vpop.f32.mrf.mxu1  ;;  %v1650_v14 = vadd.f32 %v1649_v35, %v1648_v33 }
 0x127   :  { %v1651_v37 = vpop.f32.mrf.mxu0  ;;  %v1678_v28 = vadd.f32 %v1677_v38, %v1676_v36 }
 0x128   :  { %v1679_v40 = vpop.f32.mrf.mxu1  ;;  %v1235_v27 = vadd.f32 %v1650_v14, %v1186_v16 }
 0x129   :  { %v1652_v39 = vpop.f32.mrf.mxu0 }
 0x12a   :  { %v1680_v42 = vpop.f32.mrf.mxu1  ;;  %v1653_v15 = vadd.f32 %v1652_v39, %v1651_v37  ;;  %v1284_v32 = vadd.f32 %v1678_v28, %v1235_v27 }
 0x12b   :  { %v1654_v41 = vpop.f32.mrf.mxu0  ;;  %v1681_v20 = vadd.f32 %v1680_v42, %v1679_v40 }
 0x12c   :  { %v1682_v44 = vpop.f32.mrf.mxu1  ;;  %v1238_v29 = vadd.f32 %v1653_v15, %v1189_v17 }
 0x12d   :  { %v1655_v43 = vpop.f32.mrf.mxu0 }
 0x12e   :  { %v1683_v54 = vpop.f32.mrf.mxu1  ;;  %v1656_v6 = vadd.f32 %v1655_v43, %v1654_v41  ;;  %v1287_v33 = vadd.f32 %v1681_v20, %v1238_v29 }
 0x12f   :  { %v1657_v53 = vpop.f32.mrf.mxu0  ;;  %v1684_v19 = vadd.f32 %v1683_v54, %v1682_v44 }
 0x130   :  { %v1685_v0 = vpop.f32.mrf.mxu1  ;;  %v1243_v18 = vadd.f32 %v1656_v6, %v1194_v10 }
 0x131   :  { %v1658_v63 = vpop.f32.mrf.mxu0 }
 0x132   :  { %v1659_v7 = vadd.f32 %v1658_v63, %v1657_v53  ;;  %v1686_v8 = vpop.f32.mrf.mxu1  ;;  %v1292_v24 = vadd.f32 %v1684_v19, %v1243_v18 }
 0x133   :  { %v1687_v23 = vadd.f32 %v1686_v8, %v1685_v0 }
 0x134   :  { %v1246_v21 = vadd.f32 %v1659_v7, %v1197_v13 }
 0x136   :  { %v1295_v26 = vadd.f32 %v1687_v23, %v1246_v21 }
 0x143   :  { %v1716_v25 = vpop.f32.mrf.mxu0 }
 0x144   :  { %v1341_v31 = vadd.f32 %v1716_v25, %v1292_v24 }
 0x145   :  { %v1332_v22 = vpop.f32.mrf.mxu0 }
 0x146   :  { %v1333_v37 = vadd.f32 %v1332_v22, %v1284_v32 }
 0x147   :  { %v1717_v30 = vpop.f32.mrf.mxu0 }
 0x148   :  { %v1344_v34 = vadd.f32 %v1717_v30, %v1295_v26 }
 0x149   :  { %v1335_v35 = vpop.f32.mrf.mxu0 }
 0x14a   :  { %v1517_v39 = vpack.c.bf16 %v1344_v34, %v1341_v31  ;;  %v1336_v41 = vadd.f32 %v1335_v35, %v1287_v33 }
 0x14c   :  { %1519 = vst [vmem:[%s2273_s2 + $0x8] sm:$0xff] %v1517_v39   ;;  %v1512_v43 = vpack.c.bf16 %v1336_v41, %v1333_v37 }
 0x14e   :  { %1513 = vst [vmem:[%s2273_s2] sm:$0xff] %v1512_v43  }

// kernel: forward.41
= control target key start
LH: loop header
LB: loop body
LE: loop exit
PB: predicated region body
PF: predicated region fallthrough
CT: control target
= control target key end

     0   :  { %v917_v36 = vmov 0.0   ;;  %vm918_vm0 = vmmov 0   ;;  %s1126_s1 = inlined_call_operand.vmem [shape: bf16[896,128], index: 1, kind: input, shape index: {}]   ;;  %s1127_s0 = inlined_call_operand.vmem [shape: bf16[16,896], index: 0, kind: input, shape index: {}]   ;;  %s1128_s2 = inlined_call_operand.vmem [shape: bf16[16,128], index: 2, kind: output, shape index: {}]  }
   0x1   :  { %v851_v0 = vld [vmem:[%s1126_s1 + $0x78] sm:$0xff]   ;;  %v855_v4 = vld [vmem:[%s1126_s1 + $0x70] sm:$0xff]   ;;  %v859_v8 = vld [vmem:[%s1126_s1 + $0x68] sm:$0xff]  }
   0x2   :  { %v852_v1 = vld [vmem:[%s1126_s1 + $0xf8] sm:$0xff]   ;;  %754 = vmatprep.subr.bf16.mxu0 %v851_v0  ;;  %v856_v5 = vld [vmem:[%s1126_s1 + $0xf0] sm:$0xff]   ;;  %v860_v9 = vld [vmem:[%s1126_s1 + $0xe8] sm:$0xff]  }
   0x3   :  { %v853_v2 = vld [vmem:[%s1126_s1 + $0x38] sm:$0xff]   ;;  %776 = vmatprep.subr.bf16.mxu1 %v852_v1  ;;  %v857_v6 = vld [vmem:[%s1126_s1 + $0x30] sm:$0xff]   ;;  %v861_v10 = vld [vmem:[%s1126_s1 + $0x28] sm:$0xff]  }
   0x4   :  { %v854_v3 = vld [vmem:[%s1126_s1 + $0xb8] sm:$0xff]   ;;  %755 = vmatpush3.bf16.msra.mxu0 %v853_v2  ;;  %v858_v7 = vld [vmem:[%s1126_s1 + $0xb0] sm:$0xff]   ;;  %v862_v11 = vld [vmem:[%s1126_s1 + $0xa8] sm:$0xff]  }
   0x5   :  { %777 = vmatpush3.bf16.msra.mxu1 %v854_v3  ;;  %756 = vmatprep.subr.bf16.mxu0 %v855_v4  ;;  %v863_v12 = vld [vmem:[%s1126_s1 + $0x60] sm:$0xff]   ;;  %v867_v16 = vld [vmem:[%s1126_s1 + $0x58] sm:$0xff]   ;;  %v871_v20 = vld [vmem:[%s1126_s1 + $0x50] sm:$0xff]  }
   0x6   :  { %778 = vmatprep.subr.bf16.mxu1 %v856_v5  ;;  %v864_v13 = vld [vmem:[%s1126_s1 + $0xe0] sm:$0xff]   ;;  %v868_v17 = vld [vmem:[%s1126_s1 + $0xd8] sm:$0xff]   ;;  %v872_v21 = vld [vmem:[%s1126_s1 + $0xd0] sm:$0xff]  }
   0x7   :  { %v865_v14 = vld [vmem:[%s1126_s1 + $0x20] sm:$0xff]   ;;  %v869_v18 = vld [vmem:[%s1126_s1 + $0x18] sm:$0xff]   ;;  %v873_v22 = vld [vmem:[%s1126_s1 + $0x10] sm:$0xff]  }
   0x8   :  { %757 = vmatpush3.bf16.msra.mxu0 %v857_v6  ;;  %v866_v15 = vld [vmem:[%s1126_s1 + $0xa0] sm:$0xff]   ;;  %v870_v19 = vld [vmem:[%s1126_s1 + $0x98] sm:$0xff]   ;;  %v874_v23 = vld [vmem:[%s1126_s1 + $0x90] sm:$0xff]  }
   0x9   :  { %779 = vmatpush3.bf16.msra.mxu1 %v858_v7  ;;  %758 = vmatprep.subr.bf16.mxu0 %v859_v8  ;;  %v875_v24 = vld [vmem:[%s1126_s1 + $0x48] sm:$0xff]   ;;  %v879_v28 = vld [vmem:[%s1126_s1 + $0x40] sm:$0xff]   ;;  %v889_v37 = vld [vmem:[%s1126_s1 + $0x178] sm:$0xff]  }
   0xa   :  { %780 = vmatprep.subr.bf16.mxu1 %v860_v9  ;;  %v876_v25 = vld [vmem:[%s1126_s1 + $0xc8] sm:$0xff]   ;;  %v880_v29 = vld [vmem:[%s1126_s1 + $0xc0] sm:$0xff]   ;;  %v890_v38 = vld [vmem:[%s1126_s1 + $0x138] sm:$0xff]  }
   0xb   :  { %v877_v26 = vld [vmem:[%s1126_s1 + $0x8] sm:$0xff]   ;;  %v881_v30 = vld [vmem:[%s1126_s1] sm:$0xff]   ;;  %v891_v39 = vld [vmem:[%s1126_s1 + $0x1b8] sm:$0xff]  }
   0xc   :  { %759 = vmatpush3.bf16.msra.mxu0 %v861_v10  ;;  %v878_v27 = vld [vmem:[%s1126_s1 + $0x88] sm:$0xff]   ;;  %v882_v31 = vld [vmem:[%s1126_s1 + $0x80] sm:$0xff]   ;;  %v892_v40 = vld [vmem:[%s1126_s1 + $0x170] sm:$0xff]  }
   0xd   :  { %781 = vmatpush3.bf16.msra.mxu1 %v862_v11  ;;  %760 = vmatprep.subr.bf16.mxu0 %v863_v12  ;;  %v883_v32 = vld [vmem:[%s1127_s0] ss:$28 sps:$4 sm:$0xff]   ;;  %v886_v34 = vld [vmem:[%s1127_s0 + $0x8] ss:$28 sps:$4 sm:$0xff]   ;;  %v893_v41 = vld [vmem:[%s1126_s1 + $0x130] sm:$0xff]  }
   0xe   :  { %782 = vmatprep.subr.bf16.mxu1 %v864_v13  ;;  %v885_v33 = vld [vmem:[%s1127_s0 + $0x4] ss:$28 sps:$4 sm:$0xff]   ;;  %v888_v35 = vld [vmem:[%s1127_s0 + $0xc] ss:$28 sps:$4 sm:$0xff]   ;;  %v894_v42 = vld [vmem:[%s1126_s1 + $0x1b0] sm:$0xff]  }
   0xf   :  { %536 = vmatprep.mubr.bf16.mxu0 %v885_v33  ;;  %577 = vmatprep.mubr.bf16.mxu1 %v888_v35  ;;  %v895_v43 = vld [vmem:[%s1126_s1 + $0x168] sm:$0xff]   ;;  %v898_v46 = vld [vmem:[%s1126_s1 + $0x160] sm:$0xff]   ;;  %v901_v49 = vld [vmem:[%s1126_s1 + $0x158] sm:$0xff]  }
  0x10   :  { %761 = vmatpush3.bf16.msra.mxu0 %v865_v14  ;;  %v896_v44 = vld [vmem:[%s1126_s1 + $0x128] sm:$0xff]   ;;  %v899_v47 = vld [vmem:[%s1126_s1 + $0x120] sm:$0xff]   ;;  %v902_v50 = vld [vmem:[%s1126_s1 + $0x118] sm:$0xff]  }
  0x11   :  { %783 = vmatpush3.bf16.msra.mxu1 %v866_v15  ;;  %762 = vmatprep.subr.bf16.mxu0 %v867_v16  ;;  %v897_v45 = vld [vmem:[%s1126_s1 + $0x1a8] sm:$0xff]   ;;  %v900_v48 = vld [vmem:[%s1126_s1 + $0x1a0] sm:$0xff]   ;;  %v903_v51 = vld [vmem:[%s1126_s1 + $0x198] sm:$0xff]  }
  0x12   :  { %784 = vmatprep.subr.bf16.mxu1 %v868_v17  ;;  %v904_v52 = vld [vmem:[%s1126_s1 + $0x150] sm:$0xff]   ;;  %v907_v55 = vld [vmem:[%s1126_s1 + $0x148] sm:$0xff]   ;;  %v910_v58 = vld [vmem:[%s1126_s1 + $0x140] sm:$0xff]  }
  0x13   :  { %v905_v53 = vld [vmem:[%s1126_s1 + $0x110] sm:$0xff]   ;;  %v908_v56 = vld [vmem:[%s1126_s1 + $0x108] sm:$0xff]   ;;  %v911_v60 = vld [vmem:[%s1126_s1 + $0x100] sm:$0xff]  }
  0x14   :  { %763 = vmatpush3.bf16.msra.mxu0 %v869_v18  ;;  %v906_v54 = vld [vmem:[%s1126_s1 + $0x190] sm:$0xff]   ;;  %v909_v57 = vld [vmem:[%s1126_s1 + $0x188] sm:$0xff]   ;;  %v912_v61 = vld [vmem:[%s1126_s1 + $0x180] sm:$0xff]  }
  0x15   :  { %785 = vmatpush3.bf16.msra.mxu1 %v870_v19  ;;  %764 = vmatprep.subr.bf16.mxu0 %v871_v20  ;;  %v915_v59 = vld [vmem:[%s1127_s0 + $0x14] ss:$28 sps:$4 sm:$0xff]  }
  0x16   :  { %786 = vmatprep.subr.bf16.mxu1 %v872_v21  ;;  %v913_v62 = vld [vmem:[%s1127_s0 + $0x10] ss:$28 sps:$4 sm:$0xff]   ;;  %v916_v63 = vld [vmem:[%s1127_s0 + $0x18] ss:$28 sps:$4 sm:$0xff]  }
  0x18   :  { %765 = vmatpush3.bf16.msra.mxu0 %v873_v22 }
  0x19   :  { %787 = vmatpush3.bf16.msra.mxu1 %v874_v23  ;;  %766 = vmatprep.subr.bf16.mxu0 %v875_v24 }
  0x1a   :  { %788 = vmatprep.subr.bf16.mxu1 %v876_v25 }
  0x1c   :  { %767 = vmatpush3.bf16.msra.mxu0 %v877_v26 }
  0x1d   :  { %789 = vmatpush3.bf16.msra.mxu1 %v878_v27  ;;  %768 = vmatprep.subr.bf16.mxu0 %v879_v28 }
  0x1e   :  { %790 = vmatprep.subr.bf16.mxu1 %v880_v29 }
  0x20   :  { %769 = vmatpush3.bf16.msra.mxu0 %v881_v30 }
  0x21   :  { %791 = vmatpush3.bf16.msra.mxu1 %v882_v31  ;;  %798 = vmatprep.subr.bf16.mxu0 %v889_v37 }
  0x22   :  { %829 = vmatprep.subr.bf16.mxu1 %v917_v36 }
  0x23   :  { %537 = vmatmul.mubr.bf16.vlgmr.msra.gmra.mxu0 %v883_v32 }
  0x24   :  { %578 = vmatmul.mubr.bf16.vlgmr.msra.gmra.mxu1 %v886_v34  ;;  %799 = vmatpush3.bf16.msra.mxu0 %v890_v38 }
  0x25   :  { %845 = vmatprep.mubr.msk.bf16.mxu1 %vm918_vm0, %v917_v36  ;;  %830 = vmatpush3.bf16.msra.mxu1 %v891_v39 }
  0x26   :  { %800 = vmatprep.subr.bf16.mxu0 %v892_v40  ;;  %831 = vmatprep.subr.bf16.mxu1 %v917_v36 }
  0x27   :  { %618 = vmatprep.mubr.bf16.mxu0 %v915_v59 }
  0x28   :  { %801 = vmatpush3.bf16.msra.mxu0 %v893_v41 }
  0x29   :  { %832 = vmatpush3.bf16.msra.mxu1 %v894_v42  ;;  %802 = vmatprep.subr.bf16.mxu0 %v895_v43 }
  0x2a   :  { %833 = vmatprep.subr.bf16.mxu1 %v917_v36 }
  0x2c   :  { %803 = vmatpush3.bf16.msra.mxu0 %v896_v44 }
  0x2d   :  { %834 = vmatpush3.bf16.msra.mxu1 %v897_v45  ;;  %804 = vmatprep.subr.bf16.mxu0 %v898_v46 }
  0x2e   :  { %835 = vmatprep.subr.bf16.mxu1 %v917_v36 }
  0x30   :  { %805 = vmatpush3.bf16.msra.mxu0 %v899_v47 }
  0x31   :  { %836 = vmatpush3.bf16.msra.mxu1 %v900_v48  ;;  %806 = vmatprep.subr.bf16.mxu0 %v901_v49 }
  0x32   :  { %837 = vmatprep.subr.bf16.mxu1 %v917_v36 }
  0x34   :  { %807 = vmatpush3.bf16.msra.mxu0 %v902_v50 }
  0x35   :  { %838 = vmatpush3.bf16.msra.mxu1 %v903_v51  ;;  %808 = vmatprep.subr.bf16.mxu0 %v904_v52 }
  0x36   :  { %839 = vmatprep.subr.bf16.mxu1 %v917_v36 }
  0x38   :  { %809 = vmatpush3.bf16.msra.mxu0 %v905_v53 }
  0x39   :  { %840 = vmatpush3.bf16.msra.mxu1 %v906_v54  ;;  %810 = vmatprep.subr.bf16.mxu0 %v907_v55 }
  0x3a   :  { %841 = vmatprep.subr.bf16.mxu1 %v917_v36 }
  0x3c   :  { %811 = vmatpush3.bf16.msra.mxu0 %v908_v56 }
  0x3d   :  { %842 = vmatpush3.bf16.msra.mxu1 %v909_v57  ;;  %812 = vmatprep.subr.bf16.mxu0 %v910_v58 }
  0x3e   :  { %843 = vmatprep.subr.bf16.mxu1 %v917_v36 }
  0x40   :  { %813 = vmatpush3.bf16.msra.mxu0 %v911_v60 }
  0x41   :  { %844 = vmatpush3.bf16.msra.mxu1 %v912_v61 }
  0x43   :  { %619 = vmatmul.mubr.bf16.vlgmr.msra.gmra.mxu0 %v913_v62 }
  0x44   :  { %846 = vmatmul.mubr.bf16.vlgmr.msra.gmra.mxu1 %v916_v63 }
  0xe3   :  { %v770_v0 = vpop.f32.mrf.mxu0 }
  0xe4   :  { %v792_v1 = vpop.f32.mrf.mxu1 }
  0xe5   :  { %v771_v2 = vpop.f32.mrf.mxu0 }
  0xe6   :  { %v793_v3 = vpop.f32.mrf.mxu1  ;;  %v772_v9 = vadd.f32 %v771_v2, %v770_v0 }
  0xe7   :  { %v773_v4 = vpop.f32.mrf.mxu0  ;;  %v794_v10 = vadd.f32 %v793_v3, %v792_v1 }
  0xe8   :  { %v795_v5 = vpop.f32.mrf.mxu1 }
  0xe9   :  { %v774_v6 = vpop.f32.mrf.mxu0  ;;  %v580_v18 = vadd.f32 %v794_v10, %v772_v9 }
  0xea   :  { %v796_v7 = vpop.f32.mrf.mxu1  ;;  %v775_v13 = vadd.f32 %v774_v6, %v773_v4 }
  0xeb   :  { %v797_v14 = vadd.f32 %v796_v7, %v795_v5 }
  0xed   :  { %v583_v21 = vadd.f32 %v797_v14, %v775_v13 }
 0x103   :  { %v814_v8 = vpop.f32.mrf.mxu0 }
 0x104   :  { %v661_v11 = vpop.f32.mrf.mxu1 }
 0x105   :  { %v815_v12 = vpop.f32.mrf.mxu0 }
 0x106   :  { %v816_v15 = vadd.f32 %v815_v12, %v814_v8  ;;  %v847_v16 = vpop.f32.mrf.mxu1 }
 0x107   :  { %v817_v17 = vpop.f32.mrf.mxu0 }
 0x108   :  { %v664_v19 = vpop.f32.mrf.mxu1  ;;  %v621_v22 = vadd.f32 %v816_v15, %v580_v18 }
 0x109   :  { %v818_v20 = vpop.f32.mrf.mxu0 }
 0x10a   :  { %v819_v23 = vadd.f32 %v818_v20, %v817_v17  ;;  %v848_v24 = vpop.f32.mrf.mxu1  ;;  %v662_v26 = vadd.f32 %v661_v11, %v621_v22 }
 0x10c   :  { %v624_v25 = vadd.f32 %v819_v23, %v583_v21 }
 0x10e   :  { %v665_v27 = vadd.f32 %v664_v19, %v624_v25 }
 0x110   :  { %v752_v28 = vpack.c.bf16 %v665_v27, %v662_v26 }
 0x112   :  { %753 = vst [vmem:[%s1128_s2] sm:$0xff] %v752_v28  }

// kernel: forward.42
= control target key start
LH: loop header
LB: loop body
LE: loop exit
PB: predicated region body
PF: predicated region fallthrough
CT: control target
= control target key end

     0   :  { %s347_s1 = inlined_call_operand.vmem [shape: bf16[256,128], index: 1, kind: input, shape index: {}]   ;;  %s348_s0 = inlined_call_operand.vmem [shape: bf16[16,256], index: 0, kind: input, shape index: {}]   ;;  %s349_s2 = inlined_call_operand.vmem [shape: bf16[16,128], index: 2, kind: output, shape index: {}]  }
   0x1   :  { %v256_v0 = vld [vmem:[%s347_s1 + $0x78] sm:$0xff]   ;;  %v258_v2 = vld [vmem:[%s347_s1 + $0x70] sm:$0xff]   ;;  %v260_v4 = vld [vmem:[%s347_s1 + $0x68] sm:$0xff]  }
   0x2   :  { %v257_v1 = vld [vmem:[%s347_s1 + $0x38] sm:$0xff]   ;;  %234 = vmatprep.subr.bf16.mxu0 %v256_v0  ;;  %v259_v3 = vld [vmem:[%s347_s1 + $0x30] sm:$0xff]   ;;  %v261_v5 = vld [vmem:[%s347_s1 + $0x28] sm:$0xff]  }
   0x3   :  { %235 = vmatpush3.bf16.msra.mxu0 %v257_v1  ;;  %v262_v6 = vld [vmem:[%s347_s1 + $0x60] sm:$0xff]   ;;  %v264_v8 = vld [vmem:[%s347_s1 + $0x58] sm:$0xff]   ;;  %v266_v10 = vld [vmem:[%s347_s1 + $0x50] sm:$0xff]  }
   0x4   :  { %236 = vmatprep.subr.bf16.mxu0 %v258_v2  ;;  %v263_v7 = vld [vmem:[%s347_s1 + $0x20] sm:$0xff]   ;;  %v265_v9 = vld [vmem:[%s347_s1 + $0x18] sm:$0xff]   ;;  %v267_v12 = vld [vmem:[%s347_s1 + $0x10] sm:$0xff]  }
   0x5   :  { %v274_v11 = vld [vmem:[%s348_s0 + $0x4] ss:$8 sps:$4 sm:$0xff]   ;;  %v272_v17 = vld [vmem:[%s348_s0] ss:$8 sps:$4 sm:$0xff]  }
   0x6   :  { %184 = vmatprep.mubr.bf16.mxu0 %v274_v11  ;;  %v268_v13 = vld [vmem:[%s347_s1 + $0x48] sm:$0xff]   ;;  %v270_v15 = vld [vmem:[%s347_s1 + $0x40] sm:$0xff]  }
   0x7   :  { %237 = vmatpush3.bf16.msra.mxu0 %v259_v3  ;;  %v269_v14 = vld [vmem:[%s347_s1 + $0x8] sm:$0xff]   ;;  %v271_v16 = vld [vmem:[%s347_s1] sm:$0xff]  }
   0x8   :  { %238 = vmatprep.subr.bf16.mxu0 %v260_v4 }
   0xb   :  { %239 = vmatpush3.bf16.msra.mxu0 %v261_v5 }
   0xc   :  { %240 = vmatprep.subr.bf16.mxu0 %v262_v6 }
   0xf   :  { %241 = vmatpush3.bf16.msra.mxu0 %v263_v7 }
  0x10   :  { %242 = vmatprep.subr.bf16.mxu0 %v264_v8 }
  0x13   :  { %243 = vmatpush3.bf16.msra.mxu0 %v265_v9 }
  0x14   :  { %244 = vmatprep.subr.bf16.mxu0 %v266_v10 }
  0x17   :  { %245 = vmatpush3.bf16.msra.mxu0 %v267_v12 }
  0x18   :  { %246 = vmatprep.subr.bf16.mxu0 %v268_v13 }
  0x1b   :  { %247 = vmatpush3.bf16.msra.mxu0 %v269_v14 }
  0x1c   :  { %248 = vmatprep.subr.bf16.mxu0 %v270_v15 }
  0x1f   :  { %249 = vmatpush3.bf16.msra.mxu0 %v271_v16 }
  0x22   :  { %185 = vmatmul.mubr.bf16.vlgmr.msra.gmra.mxu0 %v272_v17 }
  0xe2   :  { %v250_v18 = vpop.f32.mrf.mxu0 }
  0xe4   :  { %v251_v19 = vpop.f32.mrf.mxu0 }
  0xe5   :  { %v252_v22 = vadd.f32 %v251_v19, %v250_v18 }
  0xe6   :  { %v253_v20 = vpop.f32.mrf.mxu0 }
  0xe8   :  { %v254_v21 = vpop.f32.mrf.mxu0 }
  0xe9   :  { %v255_v23 = vadd.f32 %v254_v21, %v253_v20 }
  0xeb   :  { %v232_v24 = vpack.c.bf16 %v255_v23, %v252_v22 }
  0xed   :  { %233 = vst [vmem:[%s349_s2] sm:$0xff] %v232_v24  }

// kernel: forward.43
= control target key start
LH: loop header
LB: loop body
LE: loop exit
PB: predicated region body
PF: predicated region fallthrough
CT: control target
= control target key end

     0   :  { %v197_v0 = vmov 0.0   ;;  %vm198_vm0 = vmmov 0   ;;  %s244_s1 = inlined_call_operand.vmem [shape: bf16[128,128], index: 1, kind: input, shape index: {}]   ;;  %s245_s0 = inlined_call_operand.vmem [shape: bf16[16,128], index: 0, kind: input, shape index: {}]   ;;  %s246_s2 = inlined_call_operand.vmem [shape: bf16[16,128], index: 2, kind: output, shape index: {}]  }
   0x1   :  { %166 = vmatprep.subr.bf16.mxu0 %v197_v0  ;;  %v188_v1 = vld [vmem:[%s244_s1 + $0x38] sm:$0xff]   ;;  %182 = vmatprep.mubr.msk.bf16.mxu0 %vm198_vm0, %v197_v0  ;;  %v189_v2 = vld [vmem:[%s244_s1 + $0x30] sm:$0xff]   ;;  %v190_v3 = vld [vmem:[%s244_s1 + $0x28] sm:$0xff]  }
   0x2   :  { %167 = vmatpush3.bf16.msra.mxu0 %v188_v1  ;;  %v191_v4 = vld [vmem:[%s244_s1 + $0x20] sm:$0xff]   ;;  %v192_v5 = vld [vmem:[%s244_s1 + $0x18] sm:$0xff]   ;;  %v193_v6 = vld [vmem:[%s244_s1 + $0x10] sm:$0xff]  }
   0x3   :  { %168 = vmatprep.subr.bf16.mxu0 %v197_v0  ;;  %v194_v7 = vld [vmem:[%s244_s1 + $0x8] sm:$0xff]   ;;  %v195_v8 = vld [vmem:[%s244_s1] sm:$0xff]  }
   0x4   :  { %v196_v9 = vld [vmem:[%s245_s0] sm:$0xff]  }
   0x6   :  { %169 = vmatpush3.bf16.msra.mxu0 %v189_v2 }
   0x7   :  { %170 = vmatprep.subr.bf16.mxu0 %v197_v0 }
   0xa   :  { %171 = vmatpush3.bf16.msra.mxu0 %v190_v3 }
   0xb   :  { %172 = vmatprep.subr.bf16.mxu0 %v197_v0 }
   0xe   :  { %173 = vmatpush3.bf16.msra.mxu0 %v191_v4 }
   0xf   :  { %174 = vmatprep.subr.bf16.mxu0 %v197_v0 }
  0x12   :  { %175 = vmatpush3.bf16.msra.mxu0 %v192_v5 }
  0x13   :  { %176 = vmatprep.subr.bf16.mxu0 %v197_v0 }
  0x16   :  { %177 = vmatpush3.bf16.msra.mxu0 %v193_v6 }
  0x17   :  { %178 = vmatprep.subr.bf16.mxu0 %v197_v0 }
  0x1a   :  { %179 = vmatpush3.bf16.msra.mxu0 %v194_v7 }
  0x1b   :  { %180 = vmatprep.subr.bf16.mxu0 %v197_v0 }
  0x1e   :  { %181 = vmatpush3.bf16.msra.mxu0 %v195_v8 }
  0x21   :  { %183 = vmatmul.mubr.bf16.vlgmr.msra.gmra.mxu0 %v196_v9 }
  0xe1   :  { %v118_v10 = vpop.f32.mrf.mxu0 }
  0xe3   :  { %v184_v11 = vpop.f32.mrf.mxu0 }
  0xe5   :  { %v121_v12 = vpop.f32.mrf.mxu0 }
  0xe6   :  { %v155_v13 = vpack.c.bf16 %v121_v12, %v118_v10 }
  0xe7   :  { %v185_v14 = vpop.f32.mrf.mxu0 }
  0xe8   :  { %156 = vst [vmem:[%s246_s2] sm:$0xff] %v155_v13  }

// kernel: forward.44
= control target key start
LH: loop header
LB: loop body
LE: loop exit
PB: predicated region body
PF: predicated region fallthrough
CT: control target
= control target key end

     0   :  { %s1349_s9 = smov 0   ;;  %s1351_s10 = smov 0   ;;  %s1630_s0 = inlined_call_operand.vmem [shape: bf16[8,512], index: 0, kind: input, shape index: {}]   ;;  %s1631_s1 = inlined_call_operand.vmem [shape: bf16[512,512], index: 1, kind: input, shape index: {}]   ;;  %s1632_s2 = inlined_call_operand.vmem [shape: bf16[8,512], index: 2, kind: output, shape index: {}]  }
   0x1   :  { %s1353_s11 = smov 0   ;;  %s1355_s12 = smov 0  }
   0x2   :  { %s1357_s13 = smov 0  }
   0x3 LB: > { %s21_s14 = sadd.s32 1, %s1328_s12  ;;  %p64_p1 = scmp.ne.s32.totalorder %s1320_s10, %s1316_s9  ;;  %s1332_s13 = sphi %s1357_s13, %s12_s13   ;;  %s1328_s12 = sphi %s1355_s12, %s1636_s12   ;;  %s1324_s11 = sphi %s1353_s11, %s1635_s11   ;;  %s1320_s10 = sphi %s1351_s10, %s1634_s10   ;;  %s1316_s9 = sphi %s1349_s9, %s1633_s9  }
   0x4   : > { %p22_p0 = scmp.ge.s32.totalorder %s21_s14, 2  ;;  %p65_p2 = scmp.eq.s32.totalorder %s1332_s13, 0 }
   0x5   : > { %s57_s16 = sadd.s32 1, %s1320_s10  ;;  %p1073_p5 = scmp.ge.s32.totalorder %s1332_s13, 2 }
   0x6   : > { %s1638_s14 = smov (%p22_p0, %s21_s14), 0  ;;  %p66_p3 = por %p65_p2, %p64_p1 }
   0x7   : > { %s54_s15 = ssub.s32 %s1328_s12, %s1638_s14  ;;  %126 = sbr.rel (%p1073_p5) target bundleno = 48 (0x30), region = 20 }
   0x8   : > { %p55_p4 = scmp.eq.s32.totalorder %s54_s15, 0 }
   0xa   : > { %s1384_s17 = scalar_select %p55_p4, %s1320_s10, %s57_s16  }
   0xc   : > { %129 = sbr.rel (!%p66_p3) target bundleno = 48 (0x30), region = 24  ;;  %s131_s18 = sand.u32 (%p66_p3), 1, %s1320_s10  }
   0xd   : > { %s1152_s19 = sshll.u32 (%p66_p3), %s1328_s12, 3  ;;  %s1074_s20 = sshll.u32 (%p66_p3), %s131_s18, 9 }
   0xe   : > { %s1392_s23 = scalar_lea.vmem (%p66_p3), %s1631_s1, %s1152_s19  ;;  %s1397_s24 = scalar_lea.vmem (%p66_p3), [#allocation2], %s1074_s20 }
   0xf   : > { %v291_v0 = vld [vmem:[%s1392_s23] sm:$0xff] (%p66_p3)  ;;  %v293_v1 = vld [vmem:[%s1392_s23 + $0x10] sm:$0xff] (%p66_p3) }
  0x10   : > { %v295_v2 = vld [vmem:[%s1392_s23 + $0x20] sm:$0xff] (%p66_p3)  ;;  %292 = vst [vmem:[%s1397_s24] sm:$0xff] (%p66_p3), %v291_v0  ;;  %294 = vst [vmem:[%s1397_s24 + $0x8] sm:$0xff] (%p66_p3), %v293_v1  ;;  %v297_v3 = vld [vmem:[%s1392_s23 + $0x30] sm:$0xff] (%p66_p3) }
  0x11   : > { %296 = vst [vmem:[%s1397_s24 + $0x10] sm:$0xff] %v295_v2  ;;  %v299_v4 = vld [vmem:[%s1392_s23 + $0x40] sm:$0xff]  ;;  %v301_v5 = vld [vmem:[%s1392_s23 + $0x50] sm:$0xff]  ;;  %298 = vst [vmem:[%s1397_s24 + $0x18] sm:$0xff] %v297_v3 }
  0x12   : > { %300 = vst [vmem:[%s1397_s24 + $0x20] sm:$0xff] %v299_v4  ;;  %302 = vst [vmem:[%s1397_s24 + $0x28] sm:$0xff] %v301_v5  ;;  %v303_v6 = vld [vmem:[%s1392_s23 + $0x60] sm:$0xff]  ;;  %v305_v7 = vld [vmem:[%s1392_s23 + $0x70] sm:$0xff] }
  0x13   : > { %v307_v8 = vld [vmem:[%s1392_s23 + $0x80] sm:$0xff]  ;;  %304 = vst [vmem:[%s1397_s24 + $0x30] sm:$0xff] %v303_v6  ;;  %306 = vst [vmem:[%s1397_s24 + $0x38] sm:$0xff] %v305_v7  ;;  %v309_v9 = vld [vmem:[%s1392_s23 + $0x90] sm:$0xff] }
  0x14   : > { %308 = vst [vmem:[%s1397_s24 + $0x40] sm:$0xff] %v307_v8  ;;  %v311_v10 = vld [vmem:[%s1392_s23 + $0xa0] sm:$0xff]  ;;  %v313_v11 = vld [vmem:[%s1392_s23 + $0xb0] sm:$0xff]  ;;  %310 = vst [vmem:[%s1397_s24 + $0x48] sm:$0xff] %v309_v9 }
  0x15   : > { %312 = vst [vmem:[%s1397_s24 + $0x50] sm:$0xff] %v311_v10  ;;  %314 = vst [vmem:[%s1397_s24 + $0x58] sm:$0xff] %v313_v11  ;;  %v315_v12 = vld [vmem:[%s1392_s23 + $0xc0] sm:$0xff]  ;;  %v317_v13 = vld [vmem:[%s1392_s23 + $0xd0] sm:$0xff] }
  0x16   : > { %v319_v14 = vld [vmem:[%s1392_s23 + $0xe0] sm:$0xff]  ;;  %316 = vst [vmem:[%s1397_s24 + $0x60] sm:$0xff] %v315_v12  ;;  %318 = vst [vmem:[%s1397_s24 + $0x68] sm:$0xff] %v317_v13  ;;  %v321_v15 = vld [vmem:[%s1392_s23 + $0xf0] sm:$0xff] }
  0x17   : > { %320 = vst [vmem:[%s1397_s24 + $0x70] sm:$0xff] %v319_v14  ;;  %v323_v16 = vld [vmem:[%s1392_s23 + $0x100] sm:$0xff]  ;;  %v325_v17 = vld [vmem:[%s1392_s23 + $0x110] sm:$0xff]  ;;  %322 = vst [vmem:[%s1397_s24 + $0x78] sm:$0xff] %v321_v15 }
  0x18   : > { %324 = vst [vmem:[%s1397_s24 + $0x80] sm:$0xff] %v323_v16  ;;  %326 = vst [vmem:[%s1397_s24 + $0x88] sm:$0xff] %v325_v17  ;;  %v327_v18 = vld [vmem:[%s1392_s23 + $0x120] sm:$0xff]  ;;  %v329_v19 = vld [vmem:[%s1392_s23 + $0x130] sm:$0xff] }
  0x19   : > { %v331_v20 = vld [vmem:[%s1392_s23 + $0x140] sm:$0xff]  ;;  %328 = vst [vmem:[%s1397_s24 + $0x90] sm:$0xff] %v327_v18  ;;  %330 = vst [vmem:[%s1397_s24 + $0x98] sm:$0xff] %v329_v19  ;;  %v333_v21 = vld [vmem:[%s1392_s23 + $0x150] sm:$0xff] }
  0x1a   : > { %332 = vst [vmem:[%s1397_s24 + $0xa0] sm:$0xff] %v331_v20  ;;  %v335_v22 = vld [vmem:[%s1392_s23 + $0x160] sm:$0xff]  ;;  %v337_v23 = vld [vmem:[%s1392_s23 + $0x170] sm:$0xff]  ;;  %334 = vst [vmem:[%s1397_s24 + $0xa8] sm:$0xff] %v333_v21 }
  0x1b   : > { %336 = vst [vmem:[%s1397_s24 + $0xb0] sm:$0xff] %v335_v22  ;;  %338 = vst [vmem:[%s1397_s24 + $0xb8] sm:$0xff] %v337_v23  ;;  %v339_v24 = vld [vmem:[%s1392_s23 + $0x180] sm:$0xff]  ;;  %v341_v25 = vld [vmem:[%s1392_s23 + $0x190] sm:$0xff] }
  0x1c   : > { %v343_v26 = vld [vmem:[%s1392_s23 + $0x1a0] sm:$0xff]  ;;  %340 = vst [vmem:[%s1397_s24 + $0xc0] sm:$0xff] %v339_v24  ;;  %342 = vst [vmem:[%s1397_s24 + $0xc8] sm:$0xff] %v341_v25  ;;  %v345_v27 = vld [vmem:[%s1392_s23 + $0x1b0] sm:$0xff] }
  0x1d   : > { %344 = vst [vmem:[%s1397_s24 + $0xd0] sm:$0xff] %v343_v26  ;;  %v347_v28 = vld [vmem:[%s1392_s23 + $0x1c0] sm:$0xff]  ;;  %v349_v29 = vld [vmem:[%s1392_s23 + $0x1d0] sm:$0xff]  ;;  %346 = vst [vmem:[%s1397_s24 + $0xd8] sm:$0xff] %v345_v27 }
  0x1e   : > { %348 = vst [vmem:[%s1397_s24 + $0xe0] sm:$0xff] %v347_v28  ;;  %350 = vst [vmem:[%s1397_s24 + $0xe8] sm:$0xff] %v349_v29  ;;  %v351_v30 = vld [vmem:[%s1392_s23 + $0x1e0] sm:$0xff]  ;;  %v353_v31 = vld [vmem:[%s1392_s23 + $0x1f0] sm:$0xff] }
  0x1f   : > { %v355_v32 = vld [vmem:[%s1392_s23 + $0x200] sm:$0xff]  ;;  %352 = vst [vmem:[%s1397_s24 + $0xf0] sm:$0xff] %v351_v30  ;;  %354 = vst [vmem:[%s1397_s24 + $0xf8] sm:$0xff] %v353_v31  ;;  %v357_v33 = vld [vmem:[%s1392_s23 + $0x210] sm:$0xff] }
  0x20   : > { %356 = vst [vmem:[%s1397_s24 + $0x100] sm:$0xff] %v355_v32  ;;  %v359_v34 = vld [vmem:[%s1392_s23 + $0x220] sm:$0xff]  ;;  %v361_v35 = vld [vmem:[%s1392_s23 + $0x230] sm:$0xff]  ;;  %358 = vst [vmem:[%s1397_s24 + $0x108] sm:$0xff] %v357_v33 }
  0x21   : > { %360 = vst [vmem:[%s1397_s24 + $0x110] sm:$0xff] %v359_v34  ;;  %362 = vst [vmem:[%s1397_s24 + $0x118] sm:$0xff] %v361_v35  ;;  %v363_v36 = vld [vmem:[%s1392_s23 + $0x240] sm:$0xff]  ;;  %v365_v37 = vld [vmem:[%s1392_s23 + $0x250] sm:$0xff] }
  0x22   : > { %v367_v38 = vld [vmem:[%s1392_s23 + $0x260] sm:$0xff]  ;;  %364 = vst [vmem:[%s1397_s24 + $0x120] sm:$0xff] %v363_v36  ;;  %366 = vst [vmem:[%s1397_s24 + $0x128] sm:$0xff] %v365_v37  ;;  %v369_v39 = vld [vmem:[%s1392_s23 + $0x270] sm:$0xff] }
  0x23   : > { %368 = vst [vmem:[%s1397_s24 + $0x130] sm:$0xff] %v367_v38  ;;  %v371_v40 = vld [vmem:[%s1392_s23 + $0x280] sm:$0xff]  ;;  %v373_v41 = vld [vmem:[%s1392_s23 + $0x290] sm:$0xff]  ;;  %370 = vst [vmem:[%s1397_s24 + $0x138] sm:$0xff] %v369_v39 }
  0x24   : > { %372 = vst [vmem:[%s1397_s24 + $0x140] sm:$0xff] %v371_v40  ;;  %374 = vst [vmem:[%s1397_s24 + $0x148] sm:$0xff] %v373_v41  ;;  %v375_v42 = vld [vmem:[%s1392_s23 + $0x2a0] sm:$0xff]  ;;  %v377_v43 = vld [vmem:[%s1392_s23 + $0x2b0] sm:$0xff] }
  0x25   : > { %v379_v44 = vld [vmem:[%s1392_s23 + $0x2c0] sm:$0xff]  ;;  %376 = vst [vmem:[%s1397_s24 + $0x150] sm:$0xff] %v375_v42  ;;  %378 = vst [vmem:[%s1397_s24 + $0x158] sm:$0xff] %v377_v43  ;;  %v381_v45 = vld [vmem:[%s1392_s23 + $0x2d0] sm:$0xff] }
  0x26   : > { %380 = vst [vmem:[%s1397_s24 + $0x160] sm:$0xff] %v379_v44  ;;  %v383_v46 = vld [vmem:[%s1392_s23 + $0x2e0] sm:$0xff]  ;;  %v385_v47 = vld [vmem:[%s1392_s23 + $0x2f0] sm:$0xff]  ;;  %382 = vst [vmem:[%s1397_s24 + $0x168] sm:$0xff] %v381_v45 }
  0x27   : > { %384 = vst [vmem:[%s1397_s24 + $0x170] sm:$0xff] %v383_v46  ;;  %386 = vst [vmem:[%s1397_s24 + $0x178] sm:$0xff] %v385_v47  ;;  %v387_v48 = vld [vmem:[%s1392_s23 + $0x300] sm:$0xff]  ;;  %v389_v49 = vld [vmem:[%s1392_s23 + $0x310] sm:$0xff] }
  0x28   : > { %v391_v50 = vld [vmem:[%s1392_s23 + $0x320] sm:$0xff]  ;;  %388 = vst [vmem:[%s1397_s24 + $0x180] sm:$0xff] %v387_v48  ;;  %390 = vst [vmem:[%s1397_s24 + $0x188] sm:$0xff] %v389_v49  ;;  %v393_v51 = vld [vmem:[%s1392_s23 + $0x330] sm:$0xff] }
  0x29   : > { %392 = vst [vmem:[%s1397_s24 + $0x190] sm:$0xff] %v391_v50  ;;  %v395_v52 = vld [vmem:[%s1392_s23 + $0x340] sm:$0xff]  ;;  %v397_v53 = vld [vmem:[%s1392_s23 + $0x350] sm:$0xff]  ;;  %394 = vst [vmem:[%s1397_s24 + $0x198] sm:$0xff] %v393_v51 }
  0x2a   : > { %396 = vst [vmem:[%s1397_s24 + $0x1a0] sm:$0xff] %v395_v52  ;;  %398 = vst [vmem:[%s1397_s24 + $0x1a8] sm:$0xff] %v397_v53  ;;  %v399_v54 = vld [vmem:[%s1392_s23 + $0x360] sm:$0xff]  ;;  %v401_v55 = vld [vmem:[%s1392_s23 + $0x370] sm:$0xff] }
  0x2b   : > { %v403_v56 = vld [vmem:[%s1392_s23 + $0x380] sm:$0xff]  ;;  %400 = vst [vmem:[%s1397_s24 + $0x1b0] sm:$0xff] %v399_v54  ;;  %402 = vst [vmem:[%s1397_s24 + $0x1b8] sm:$0xff] %v401_v55  ;;  %v405_v57 = vld [vmem:[%s1392_s23 + $0x390] sm:$0xff] }
  0x2c   : > { %404 = vst [vmem:[%s1397_s24 + $0x1c0] sm:$0xff] %v403_v56  ;;  %v407_v58 = vld [vmem:[%s1392_s23 + $0x3a0] sm:$0xff]  ;;  %v409_v59 = vld [vmem:[%s1392_s23 + $0x3b0] sm:$0xff]  ;;  %406 = vst [vmem:[%s1397_s24 + $0x1c8] sm:$0xff] %v405_v57 }
  0x2d   : > { %408 = vst [vmem:[%s1397_s24 + $0x1d0] sm:$0xff] %v407_v58  ;;  %410 = vst [vmem:[%s1397_s24 + $0x1d8] sm:$0xff] %v409_v59  ;;  %v411_v60 = vld [vmem:[%s1392_s23 + $0x3c0] sm:$0xff]  ;;  %v413_v61 = vld [vmem:[%s1392_s23 + $0x3d0] sm:$0xff] }
  0x2e   : > { %v415_v62 = vld [vmem:[%s1392_s23 + $0x3e0] sm:$0xff]  ;;  %412 = vst [vmem:[%s1397_s24 + $0x1e0] sm:$0xff] %v411_v60  ;;  %414 = vst [vmem:[%s1397_s24 + $0x1e8] sm:$0xff] %v413_v61  ;;  %v417_v63 = vld [vmem:[%s1392_s23 + $0x3f0] sm:$0xff] }
  0x2f   : > { %416 = vst [vmem:[%s1397_s24 + $0x1f0] sm:$0xff] %v415_v62  ;;  %418 = vst [vmem:[%s1397_s24 + $0x1f8] sm:$0xff] %v417_v63 }
  0x30 PF: > { %p1077_p6 = scmp.ge.s32.totalorder %s1332_s13, 1  ;;  %p423_p7 = scmp.lt.s32.totalorder %s1332_s13, 3 }
  0x32   : > { %p424_p8 = pnand %p1077_p6, %p423_p7 }
  0x33   : > { %s430_s25 = sand.u32 (!%p424_p8), 1, %s1316_s9   ;;  %s1079_s4 = sshll.u32 (!%p424_p8), %s1324_s11, 1 }
  0x34   : > { %427 = sbr.rel (%p424_p8) target bundleno = 324 (0x144), region = 62  ;;  %s1078_s30 = sshll.u32 (!%p424_p8), %s430_s25, 9 }
  0x35   : > { %s1541_s3 = scalar_lea.vmem (!%p424_p8), [#allocation2], %s1078_s30  ;;  %p469_p9 = scmp.lt.s32.totalorder (!%p424_p8), %s1079_s4, 3 }
  0x39   : > { %v1530_v0 = vld [vmem:[%s1630_s0] sm:$0xff]  ;;  %v1535_v1 = vld [vmem:[%s1630_s0 + $0x8] sm:$0xff]  ;;  %v1194_v4 = vld [vmem:[%s1541_s3 + $0x74] ss:$8 sps:$4 sm:$0xff]   ;;  %s1640_s4 = smov (!%p469_p9, %s1079_s4), 3 }
  0x3a   : > { %v1082_v2 = vcombine.high %v1530_v0, %v1530_v0  ;;  %v1084_v3 = vcombine.high %v1535_v1, %v1535_v1  ;;  %v1196_v5 = vld [vmem:[%s1541_s3 + $0x174] ss:$8 sps:$4 sm:$0xff]   ;;  %876 = vmatprep.subr.bf16.mxu0 %v1194_v4  ;;  %v1198_v6 = vld [vmem:[%s1541_s3 + $0x70] ss:$8 sps:$4 sm:$0xff]   ;;  %v1200_v8 = vld [vmem:[%s1541_s3 + $0x64] ss:$8 sps:$4 sm:$0xff]  }
  0x3b   : > { %v1199_v7 = vld [vmem:[%s1541_s3 + $0x170] ss:$8 sps:$4 sm:$0xff]   ;;  %917 = vmatprep.subr.bf16.mxu1 %v1196_v5  ;;  %877 = vmatpush1.bf16.msra.mxu0 %v1198_v6  ;;  %v1202_v9 = vld [vmem:[%s1541_s3 + $0x164] ss:$8 sps:$4 sm:$0xff]   ;;  %v1204_v10 = vld [vmem:[%s1541_s3 + $0x60] ss:$8 sps:$4 sm:$0xff]   ;;  %v1081_v6 = vcombine.low %v1530_v0, %v1530_v0 }
  0x3c   : > { %908 = vmatprep.mubr.bf16.mxu0 %v1082_v2  ;;  %949 = vmatprep.mubr.bf16.mxu1 %v1084_v3  ;;  %v1205_v11 = vld [vmem:[%s1541_s3 + $0x160] ss:$8 sps:$4 sm:$0xff]   ;;  %v1206_v12 = vld [vmem:[%s1541_s3 + $0x54] ss:$8 sps:$4 sm:$0xff]   ;;  %v1210_v14 = vld [vmem:[%s1541_s3 + $0x50] ss:$8 sps:$4 sm:$0xff]  }
  0x3d   : > { %918 = vmatpush1.bf16.msra.mxu1 %v1199_v7  ;;  %878 = vmatprep.subr.bf16.mxu0 %v1200_v8  ;;  %v1208_v13 = vld [vmem:[%s1541_s3 + $0x154] ss:$8 sps:$4 sm:$0xff]   ;;  %v1211_v15 = vld [vmem:[%s1541_s3 + $0x150] ss:$8 sps:$4 sm:$0xff]   ;;  %v1212_v16 = vld [vmem:[%s1541_s3 + $0x44] ss:$8 sps:$4 sm:$0xff]   ;;  %v1083_v7 = vcombine.low %v1535_v1, %v1535_v1 }
  0x3e   : > { %919 = vmatprep.subr.bf16.mxu1 %v1202_v9  ;;  %v1214_v17 = vld [vmem:[%s1541_s3 + $0x144] ss:$8 sps:$4 sm:$0xff]   ;;  %v1216_v18 = vld [vmem:[%s1541_s3 + $0x40] ss:$8 sps:$4 sm:$0xff]   ;;  %v1218_v20 = vld [vmem:[%s1541_s3 + $0x34] ss:$8 sps:$4 sm:$0xff]  }
  0x3f   : > { %879 = vmatpush1.bf16.msra.mxu0 %v1204_v10  ;;  %v1217_v19 = vld [vmem:[%s1541_s3 + $0x140] ss:$8 sps:$4 sm:$0xff]   ;;  %v1220_v21 = vld [vmem:[%s1541_s3 + $0x134] ss:$8 sps:$4 sm:$0xff]   ;;  %v1222_v22 = vld [vmem:[%s1541_s3 + $0x30] ss:$8 sps:$4 sm:$0xff]  }
  0x40   : > { %880 = vmatprep.subr.bf16.mxu0 %v1206_v12  ;;  %v1223_v23 = vld [vmem:[%s1541_s3 + $0x130] ss:$8 sps:$4 sm:$0xff]   ;;  %v1224_v24 = vld [vmem:[%s1541_s3 + $0x24] ss:$8 sps:$4 sm:$0xff]   ;;  %v1228_v26 = vld [vmem:[%s1541_s3 + $0x20] ss:$8 sps:$4 sm:$0xff]  }
  0x41   : > { %920 = vmatpush1.bf16.msra.mxu1 %v1205_v11  ;;  %v1226_v25 = vld [vmem:[%s1541_s3 + $0x124] ss:$8 sps:$4 sm:$0xff]   ;;  %v1229_v27 = vld [vmem:[%s1541_s3 + $0x120] ss:$8 sps:$4 sm:$0xff]   ;;  %v1230_v28 = vld [vmem:[%s1541_s3 + $0x14] ss:$8 sps:$4 sm:$0xff]  }
  0x42   : > { %921 = vmatprep.subr.bf16.mxu1 %v1208_v13  ;;  %v1232_v29 = vld [vmem:[%s1541_s3 + $0x114] ss:$8 sps:$4 sm:$0xff]   ;;  %v1234_v30 = vld [vmem:[%s1541_s3 + $0x10] ss:$8 sps:$4 sm:$0xff]   ;;  %v1236_v32 = vld [vmem:[%s1541_s3 + $0x4] ss:$8 sps:$4 sm:$0xff]  }
  0x43   : > { %881 = vmatpush1.bf16.msra.mxu0 %v1210_v14  ;;  %v1235_v31 = vld [vmem:[%s1541_s3 + $0x110] ss:$8 sps:$4 sm:$0xff]   ;;  %v1238_v33 = vld [vmem:[%s1541_s3 + $0x104] ss:$8 sps:$4 sm:$0xff]   ;;  %v1240_v34 = vld [vmem:[%s1541_s3] ss:$8 sps:$4 sm:$0xff]  }
  0x44   : > { %882 = vmatprep.subr.bf16.mxu0 %v1212_v16  ;;  %v1241_v35 = vld [vmem:[%s1541_s3 + $0x100] ss:$8 sps:$4 sm:$0xff]   ;;  %v1242_v36 = vld [vmem:[%s1541_s3 + $0xf4] ss:$8 sps:$4 sm:$0xff]   ;;  %v1246_v38 = vld [vmem:[%s1541_s3 + $0xf0] ss:$8 sps:$4 sm:$0xff]  }
  0x45   : > { %922 = vmatpush1.bf16.msra.mxu1 %v1211_v15  ;;  %v1244_v37 = vld [vmem:[%s1541_s3 + $0x1f4] ss:$8 sps:$4 sm:$0xff]   ;;  %v1247_v39 = vld [vmem:[%s1541_s3 + $0x1f0] ss:$8 sps:$4 sm:$0xff]   ;;  %v1248_v40 = vld [vmem:[%s1541_s3 + $0xe4] ss:$8 sps:$4 sm:$0xff]  }
  0x46   : > { %923 = vmatprep.subr.bf16.mxu1 %v1214_v17  ;;  %v1250_v41 = vld [vmem:[%s1541_s3 + $0x1e4] ss:$8 sps:$4 sm:$0xff]   ;;  %v1252_v42 = vld [vmem:[%s1541_s3 + $0xe0] ss:$8 sps:$4 sm:$0xff]   ;;  %v1254_v44 = vld [vmem:[%s1541_s3 + $0xd4] ss:$8 sps:$4 sm:$0xff]  }
  0x47   : > { %883 = vmatpush1.bf16.msra.mxu0 %v1216_v18  ;;  %v1253_v43 = vld [vmem:[%s1541_s3 + $0x1e0] ss:$8 sps:$4 sm:$0xff]   ;;  %v1256_v45 = vld [vmem:[%s1541_s3 + $0x1d4] ss:$8 sps:$4 sm:$0xff]   ;;  %v1258_v46 = vld [vmem:[%s1541_s3 + $0xd0] ss:$8 sps:$4 sm:$0xff]  }
  0x48   : > { %884 = vmatprep.subr.bf16.mxu0 %v1218_v20  ;;  %v1259_v47 = vld [vmem:[%s1541_s3 + $0x1d0] ss:$8 sps:$4 sm:$0xff]   ;;  %v1260_v48 = vld [vmem:[%s1541_s3 + $0xc4] ss:$8 sps:$4 sm:$0xff]   ;;  %v1264_v50 = vld [vmem:[%s1541_s3 + $0xc0] ss:$8 sps:$4 sm:$0xff]  }
  0x49   : > { %924 = vmatpush1.bf16.msra.mxu1 %v1217_v19  ;;  %v1262_v49 = vld [vmem:[%s1541_s3 + $0x1c4] ss:$8 sps:$4 sm:$0xff]   ;;  %v1265_v51 = vld [vmem:[%s1541_s3 + $0x1c0] ss:$8 sps:$4 sm:$0xff]   ;;  %v1266_v52 = vld [vmem:[%s1541_s3 + $0xb4] ss:$8 sps:$4 sm:$0xff]  }
  0x4a   : > { %925 = vmatprep.subr.bf16.mxu1 %v1220_v21  ;;  %v1268_v53 = vld [vmem:[%s1541_s3 + $0x1b4] ss:$8 sps:$4 sm:$0xff]   ;;  %v1270_v54 = vld [vmem:[%s1541_s3 + $0xb0] ss:$8 sps:$4 sm:$0xff]   ;;  %v1272_v56 = vld [vmem:[%s1541_s3 + $0xa4] ss:$8 sps:$4 sm:$0xff]  }
  0x4b   : > { %885 = vmatpush1.bf16.msra.mxu0 %v1222_v22  ;;  %v1271_v55 = vld [vmem:[%s1541_s3 + $0x1b0] ss:$8 sps:$4 sm:$0xff]   ;;  %v1274_v57 = vld [vmem:[%s1541_s3 + $0x1a4] ss:$8 sps:$4 sm:$0xff]   ;;  %v1276_v58 = vld [vmem:[%s1541_s3 + $0xa0] ss:$8 sps:$4 sm:$0xff]  }
  0x4c   : > { %886 = vmatprep.subr.bf16.mxu0 %v1224_v24  ;;  %v1277_v59 = vld [vmem:[%s1541_s3 + $0x1a0] ss:$8 sps:$4 sm:$0xff]   ;;  %v1278_v60 = vld [vmem:[%s1541_s3 + $0x94] ss:$8 sps:$4 sm:$0xff]   ;;  %v1282_v62 = vld [vmem:[%s1541_s3 + $0x90] ss:$8 sps:$4 sm:$0xff]  }
  0x4d   : > { %926 = vmatpush1.bf16.msra.mxu1 %v1223_v23  ;;  %v1280_v61 = vld [vmem:[%s1541_s3 + $0x194] ss:$8 sps:$4 sm:$0xff]   ;;  %v1283_v63 = vld [vmem:[%s1541_s3 + $0x190] ss:$8 sps:$4 sm:$0xff]   ;;  %v1284_v2 = vld [vmem:[%s1541_s3 + $0x84] ss:$8 sps:$4 sm:$0xff]  }
  0x4e   : > { %927 = vmatprep.subr.bf16.mxu1 %v1226_v25  ;;  %v1286_v3 = vld [vmem:[%s1541_s3 + $0x184] ss:$8 sps:$4 sm:$0xff]   ;;  %v1288_v4 = vld [vmem:[%s1541_s3 + $0x80] ss:$8 sps:$4 sm:$0xff]   ;;  %s1080_s5 = sshll.u32 %s1640_s4, 2 }
  0x4f   : > { %887 = vmatpush1.bf16.msra.mxu0 %v1228_v26  ;;  %v1289_v5 = vld [vmem:[%s1541_s3 + $0x180] ss:$8 sps:$4 sm:$0xff]   ;;  %s474_s8 = scalar_lea.vmem %s1632_s2, %s1080_s5 }
  0x50   : > { %888 = vmatprep.subr.bf16.mxu0 %v1230_v28 }
  0x51   : > { %928 = vmatpush1.bf16.msra.mxu1 %v1229_v27 }
  0x52   : > { %929 = vmatprep.subr.bf16.mxu1 %v1232_v29 }
  0x53   : > { %889 = vmatpush1.bf16.msra.mxu0 %v1234_v30 }
  0x54   : > { %890 = vmatprep.subr.bf16.mxu0 %v1236_v32 }
  0x55   : > { %930 = vmatpush1.bf16.msra.mxu1 %v1235_v31 }
  0x56   : > { %931 = vmatprep.subr.bf16.mxu1 %v1238_v33 }
  0x57   : > { %891 = vmatpush1.bf16.msra.mxu0 %v1240_v34 }
  0x58   : > { %892 = vmatprep.subr.bf16.mxu0 %v1242_v36 }
  0x59   : > { %932 = vmatpush1.bf16.msra.mxu1 %v1241_v35 }
  0x5a   : > { %933 = vmatprep.subr.bf16.mxu1 %v1244_v37 }
  0x5b   : > { %893 = vmatpush2.bf16.msra.mxu0 %v1246_v38 }
  0x5c   : > { %894 = vmatprep.subr.bf16.mxu0 %v1248_v40 }
  0x5d   : > { %934 = vmatpush2.bf16.msra.mxu1 %v1247_v39 }
  0x5e   : > { %935 = vmatprep.subr.bf16.mxu1 %v1250_v41 }
  0x5f   : > { %895 = vmatpush2.bf16.msra.mxu0 %v1252_v42 }
  0x60   : > { %896 = vmatprep.subr.bf16.mxu0 %v1254_v44 }
  0x61   : > { %936 = vmatpush2.bf16.msra.mxu1 %v1253_v43 }
  0x62   : > { %937 = vmatprep.subr.bf16.mxu1 %v1256_v45 }
  0x63   : > { %897 = vmatpush2.bf16.msra.mxu0 %v1258_v46 }
  0x64   : > { %898 = vmatprep.subr.bf16.mxu0 %v1260_v48 }
  0x65   : > { %938 = vmatpush2.bf16.msra.mxu1 %v1259_v47 }
  0x66   : > { %939 = vmatprep.subr.bf16.mxu1 %v1262_v49 }
  0x67   : > { %899 = vmatpush2.bf16.msra.mxu0 %v1264_v50 }
  0x68   : > { %900 = vmatprep.subr.bf16.mxu0 %v1266_v52 }
  0x69   : > { %940 = vmatpush2.bf16.msra.mxu1 %v1265_v51 }
  0x6a   : > { %941 = vmatprep.subr.bf16.mxu1 %v1268_v53 }
  0x6b   : > { %901 = vmatpush2.bf16.msra.mxu0 %v1270_v54 }
  0x6c   : > { %902 = vmatprep.subr.bf16.mxu0 %v1272_v56 }
  0x6d   : > { %942 = vmatpush2.bf16.msra.mxu1 %v1271_v55 }
  0x6e   : > { %943 = vmatprep.subr.bf16.mxu1 %v1274_v57 }
  0x6f   : > { %903 = vmatpush2.bf16.msra.mxu0 %v1276_v58 }
  0x70   : > { %904 = vmatprep.subr.bf16.mxu0 %v1278_v60 }
  0x71   : > { %944 = vmatpush2.bf16.msra.mxu1 %v1277_v59 }
  0x72   : > { %945 = vmatprep.subr.bf16.mxu1 %v1280_v61 }
  0x73   : > { %905 = vmatpush2.bf16.msra.mxu0 %v1282_v62 }
  0x74   : > { %906 = vmatprep.subr.bf16.mxu0 %v1284_v2 }
  0x75   : > { %946 = vmatpush2.bf16.msra.mxu1 %v1283_v63 }
  0x76   : > { %947 = vmatprep.subr.bf16.mxu1 %v1286_v3 }
  0x77   : > { %907 = vmatpush2.bf16.msra.mxu0 %v1288_v4 }
  0x79   : > { %948 = vmatpush2.bf16.msra.mxu1 %v1289_v5 }
  0x7a   : > { %909 = vmatmul.mubr.bf16.vlgmr.msra.gmra.mxu0 %v1081_v6 }
  0x7c   : > { %950 = vmatmul.mubr.bf16.vlgmr.msra.gmra.mxu1 %v1083_v7 }
 0x13a   : > { %v910_v8 = vpop.f32.mrf.mxu0 }
 0x13c   : > { %v951_v9 = vpop.f32.mrf.mxu1  ;;  %v912_v10 = vpop.f32.mrf.mxu0 }
 0x13d   : > { %v952_v12 = vadd.f32 %v951_v9, %v910_v8 }
 0x13e   : > { %v953_v11 = vpop.f32.mrf.mxu1  ;;  %v914_v0 = vpop.f32.mrf.mxu0 }
 0x13f   : > { %v954_v13 = vadd.f32 %v953_v11, %v912_v10 }
 0x140   : > { %v955_v1 = vpop.f32.mrf.mxu1  ;;  %v915_v15 = vpop.f32.mrf.mxu0 }
 0x141   : > { %v1153_v14 = vpack.c.bf16 %v954_v13, %v952_v12 }
 0x142   : > { %v956_v16 = vpop.f32.mrf.mxu1 }
 0x143   : > { %966 = vst [vmem:[%s474_s8] sm:$0xff] %v1153_v14 }
 0x144 PF: > { %s12_s13 = sadd.s32 1, %s1332_s13   ;;  %s1633_s9 = smov %s1320_s10 }
 0x145   : > { %p9_p10 = scmp.ge.s32.totalorder %s12_s13, 4   ;;  %s1634_s10 = smov %s1384_s17 }
 0x146   : > { %s1635_s11 = smov %s1328_s12  ;;  %s1636_s12 = smov %s1638_s14 }
 0x147   :  { %11 = sbr.rel (!%p9_p10) target bundleno = 3 (0x3), region = 104 }

// kernel: forward.45
= control target key start
LH: loop header
LB: loop body
LE: loop exit
PB: predicated region body
PF: predicated region fallthrough
CT: control target
= control target key end

     0   :  { %s685_s9 = smov 0   ;;  %s687_s10 = smov 0   ;;  %s771_s0 = inlined_call_operand.vmem [shape: bf16[8,128], index: 0, kind: input, shape index: {}]   ;;  %s772_s1 = inlined_call_operand.vmem [shape: bf16[128,512], index: 1, kind: input, shape index: {}]   ;;  %s773_s2 = inlined_call_operand.vmem [shape: bf16[8,512], index: 2, kind: output, shape index: {}]  }
   0x1   :  { %s689_s11 = smov 0   ;;  %s691_s12 = smov 0  }
   0x2   :  { %s693_s13 = smov 0  }
   0x3 LB: > { %s21_s14 = sadd.s32 1, %s663_s12  ;;  %p64_p1 = scmp.ne.s32.totalorder %s655_s10, %s651_s9  ;;  %s667_s13 = sphi %s693_s13, %s12_s13   ;;  %s663_s12 = sphi %s691_s12, %s777_s12   ;;  %s659_s11 = sphi %s689_s11, %s776_s11   ;;  %s655_s10 = sphi %s687_s10, %s775_s10   ;;  %s651_s9 = sphi %s685_s9, %s774_s9  }
   0x4   : > { %p22_p0 = scmp.ge.s32.totalorder %s21_s14, 2  ;;  %p65_p2 = scmp.eq.s32.totalorder %s667_s13, 0 }
   0x5   : > { %s57_s16 = sadd.s32 1, %s655_s10  ;;  %p535_p5 = scmp.ge.s32.totalorder %s667_s13, 2 }
   0x6   : > { %s779_s14 = smov (%p22_p0, %s21_s14), 0  ;;  %p66_p3 = por %p65_p2, %p64_p1 }
   0x7   : > { %s54_s15 = ssub.s32 %s663_s12, %s779_s14  ;;  %125 = sbr.rel (%p535_p5) target bundleno = 24 (0x18), region = 20 }
   0x8   : > { %p55_p4 = scmp.eq.s32.totalorder %s54_s15, 0 }
   0xa   : > { %s720_s17 = scalar_select %p55_p4, %s655_s10, %s57_s16  }
   0xc   : > { %128 = sbr.rel (!%p66_p3) target bundleno = 24 (0x18), region = 24  ;;  %s130_s18 = sand.u32 (%p66_p3), 1, %s655_s10  }
   0xd   : > { %s562_s19 = sshll.u32 (%p66_p3), %s663_s12, 3  ;;  %s536_s20 = sshll.u32 (%p66_p3), %s130_s18, 7 }
   0xe   : > { %s728_s23 = scalar_lea.vmem (%p66_p3), %s772_s1, %s562_s19  ;;  %s132_s24 = scalar_lea.vmem (%p66_p3), [#allocation2], %s536_s20 }
   0xf   : > { %v194_v0 = vld [vmem:[%s728_s23] sm:$0xff] (%p66_p3)  ;;  %v196_v1 = vld [vmem:[%s728_s23 + $0x10] sm:$0xff] (%p66_p3) }
  0x10   : > { %v198_v2 = vld [vmem:[%s728_s23 + $0x20] sm:$0xff] (%p66_p3)  ;;  %195 = vst [vmem:[%s132_s24] sm:$0xff] (%p66_p3), %v194_v0  ;;  %197 = vst [vmem:[%s132_s24 + $0x8] sm:$0xff] (%p66_p3), %v196_v1  ;;  %v200_v3 = vld [vmem:[%s728_s23 + $0x30] sm:$0xff] (%p66_p3) }
  0x11   : > { %199 = vst [vmem:[%s132_s24 + $0x10] sm:$0xff] %v198_v2  ;;  %v202_v4 = vld [vmem:[%s728_s23 + $0x40] sm:$0xff]  ;;  %v204_v5 = vld [vmem:[%s728_s23 + $0x50] sm:$0xff]  ;;  %201 = vst [vmem:[%s132_s24 + $0x18] sm:$0xff] %v200_v3 }
  0x12   : > { %203 = vst [vmem:[%s132_s24 + $0x20] sm:$0xff] %v202_v4  ;;  %205 = vst [vmem:[%s132_s24 + $0x28] sm:$0xff] %v204_v5  ;;  %v206_v6 = vld [vmem:[%s728_s23 + $0x60] sm:$0xff]  ;;  %v208_v7 = vld [vmem:[%s728_s23 + $0x70] sm:$0xff] }
  0x13   : > { %v210_v8 = vld [vmem:[%s728_s23 + $0x80] sm:$0xff]  ;;  %207 = vst [vmem:[%s132_s24 + $0x30] sm:$0xff] %v206_v6  ;;  %209 = vst [vmem:[%s132_s24 + $0x38] sm:$0xff] %v208_v7  ;;  %v212_v9 = vld [vmem:[%s728_s23 + $0x90] sm:$0xff] }
  0x14   : > { %211 = vst [vmem:[%s132_s24 + $0x40] sm:$0xff] %v210_v8  ;;  %v214_v10 = vld [vmem:[%s728_s23 + $0xa0] sm:$0xff]  ;;  %v216_v11 = vld [vmem:[%s728_s23 + $0xb0] sm:$0xff]  ;;  %213 = vst [vmem:[%s132_s24 + $0x48] sm:$0xff] %v212_v9 }
  0x15   : > { %215 = vst [vmem:[%s132_s24 + $0x50] sm:$0xff] %v214_v10  ;;  %217 = vst [vmem:[%s132_s24 + $0x58] sm:$0xff] %v216_v11  ;;  %v218_v12 = vld [vmem:[%s728_s23 + $0xc0] sm:$0xff]  ;;  %v220_v13 = vld [vmem:[%s728_s23 + $0xd0] sm:$0xff] }
  0x16   : > { %v222_v14 = vld [vmem:[%s728_s23 + $0xe0] sm:$0xff]  ;;  %219 = vst [vmem:[%s132_s24 + $0x60] sm:$0xff] %v218_v12  ;;  %221 = vst [vmem:[%s132_s24 + $0x68] sm:$0xff] %v220_v13  ;;  %v224_v15 = vld [vmem:[%s728_s23 + $0xf0] sm:$0xff] }
  0x17   : > { %223 = vst [vmem:[%s132_s24 + $0x70] sm:$0xff] %v222_v14  ;;  %225 = vst [vmem:[%s132_s24 + $0x78] sm:$0xff] %v224_v15 }
  0x18 PF: > { %p539_p6 = scmp.ge.s32.totalorder %s667_s13, 1  ;;  %p230_p7 = scmp.lt.s32.totalorder %s667_s13, 3 }
  0x1a   : > { %p231_p8 = pnand %p539_p6, %p230_p7 }
  0x1b   : > { %s237_s25 = sand.u32 (!%p231_p8), 1, %s651_s9   ;;  %s541_s30 = sshll.u32 (!%p231_p8), %s659_s11, 1 }
  0x1c   : > { %234 = sbr.rel (%p231_p8) target bundleno = 265 (0x109), region = 62  ;;  %s540_s26 = sshll.u32 (!%p231_p8), %s237_s25, 7 }
  0x1d   : > { %s239_s27 = scalar_lea.vmem (!%p231_p8), [#allocation2], %s540_s26  ;;  %p274_p9 = scmp.lt.s32.totalorder (!%p231_p8), %s541_s30, 3 }
  0x21   : > { %v669_v16 = vmov 0   ;;  %v605_v17 = vld [vmem:[%s239_s27 + $0x74] ss:$8 sps:$4 sm:$0xff]   ;;  %v607_v18 = vld [vmem:[%s239_s27 + $0x70] ss:$8 sps:$4 sm:$0xff]   ;;  %s781_s30 = smov (!%p274_p9, %s541_s30), 3 }
  0x22   : > { %411 = vmatprep.mubr.bf16.mxu0 %v669_v16  ;;  %379 = vmatprep.subr.bf16.mxu0 %v605_v17  ;;  %v608_v19 = vld [vmem:[%s239_s27 + $0x64] ss:$8 sps:$4 sm:$0xff]   ;;  %v610_v20 = vld [vmem:[%s239_s27 + $0x60] ss:$8 sps:$4 sm:$0xff]   ;;  %v611_v21 = vld [vmem:[%s239_s27 + $0x54] ss:$8 sps:$4 sm:$0xff]  }
  0x23   : > { %380 = vmatpush1.bf16.msra.mxu0 %v607_v18  ;;  %v613_v22 = vld [vmem:[%s239_s27 + $0x50] ss:$8 sps:$4 sm:$0xff]   ;;  %v614_v23 = vld [vmem:[%s239_s27 + $0x44] ss:$8 sps:$4 sm:$0xff]   ;;  %v616_v24 = vld [vmem:[%s239_s27 + $0x40] ss:$8 sps:$4 sm:$0xff]  }
  0x24   : > { %381 = vmatprep.subr.bf16.mxu0 %v608_v19  ;;  %v617_v25 = vld [vmem:[%s239_s27 + $0x34] ss:$8 sps:$4 sm:$0xff]   ;;  %v619_v26 = vld [vmem:[%s239_s27 + $0x30] ss:$8 sps:$4 sm:$0xff]   ;;  %v620_v27 = vld [vmem:[%s239_s27 + $0x24] ss:$8 sps:$4 sm:$0xff]  }
  0x25   : > { %v622_v28 = vld [vmem:[%s239_s27 + $0x20] ss:$8 sps:$4 sm:$0xff]   ;;  %v623_v29 = vld [vmem:[%s239_s27 + $0x14] ss:$8 sps:$4 sm:$0xff]   ;;  %v625_v30 = vld [vmem:[%s239_s27 + $0x10] ss:$8 sps:$4 sm:$0xff]  }
  0x26   : > { %v626_v31 = vld [vmem:[%s239_s27 + $0x4] ss:$8 sps:$4 sm:$0xff]   ;;  %v628_v32 = vld [vmem:[%s239_s27] ss:$8 sps:$4 sm:$0xff]   ;;  %s542_s3 = sshll.u32 %s781_s30, 2 }
  0x27   : > { %382 = vmatpush1.bf16.msra.mxu0 %v610_v20  ;;  %v282_v33 = vld [vmem:[%s771_s0] sm:$0xf]  ;;  %s279_s6 = scalar_lea.vmem %s773_s2, %s542_s3 }
  0x28   : > { %383 = vmatprep.subr.bf16.mxu0 %v611_v21 }
  0x2b   : > { %384 = vmatpush1.bf16.msra.mxu0 %v613_v22 }
  0x2c   : > { %385 = vmatprep.subr.bf16.mxu0 %v614_v23 }
  0x2f   : > { %386 = vmatpush1.bf16.msra.mxu0 %v616_v24 }
  0x30   : > { %387 = vmatprep.subr.bf16.mxu0 %v617_v25 }
  0x33   : > { %388 = vmatpush1.bf16.msra.mxu0 %v619_v26 }
  0x34   : > { %389 = vmatprep.subr.bf16.mxu0 %v620_v27 }
  0x37   : > { %390 = vmatpush1.bf16.msra.mxu0 %v622_v28 }
  0x38   : > { %391 = vmatprep.subr.bf16.mxu0 %v623_v29 }
  0x3b   : > { %392 = vmatpush1.bf16.msra.mxu0 %v625_v30 }
  0x3c   : > { %393 = vmatprep.subr.bf16.mxu0 %v626_v31 }
  0x3f   : > { %394 = vmatpush1.bf16.msra.mxu0 %v628_v32 }
  0x42   : > { %412 = vmatmul.mubr.bf16.vlgmr.msra.gmra.mxu0 %v282_v33 }
 0x102   : > { %v413_v34 = vpop.f32.mrf.mxu0 }
 0x104   : > { %v415_v35 = vpop.f32.mrf.mxu0 }
 0x105   : > { %v563_v36 = vpack.c.bf16 %v415_v35, %v413_v34 }
 0x106   : > { %v417_v37 = vpop.f32.mrf.mxu0 }
 0x107   : > { %428 = vst [vmem:[%s279_s6] sm:$0xff] %v563_v36 }
 0x108   : > { %v418_v38 = vpop.f32.mrf.mxu0 }
 0x109 PF: > { %s12_s13 = sadd.s32 1, %s667_s13   ;;  %s774_s9 = smov %s655_s10 }
 0x10a   : > { %p9_p10 = scmp.ge.s32.totalorder %s12_s13, 4   ;;  %s775_s10 = smov %s720_s17 }
 0x10b   : > { %s776_s11 = smov %s663_s12  ;;  %s777_s12 = smov %s779_s14 }
 0x10c   :  { %11 = sbr.rel (!%p9_p10) target bundleno = 3 (0x3), region = 104 }

// kernel: forward.46
= control target key start
LH: loop header
LB: loop body
LE: loop exit
PB: predicated region body
PF: predicated region fallthrough
CT: control target
= control target key end

     0   :  { %s685_s9 = smov 0   ;;  %s687_s10 = smov 0   ;;  %s771_s0 = inlined_call_operand.vmem [shape: bf16[8,128], index: 0, kind: input, shape index: {}]   ;;  %s772_s1 = inlined_call_operand.vmem [shape: bf16[128,512], index: 1, kind: input, shape index: {}]   ;;  %s773_s2 = inlined_call_operand.vmem [shape: bf16[8,512], index: 2, kind: output, shape index: {}]  }
   0x1   :  { %s689_s11 = smov 0   ;;  %s691_s12 = smov 0  }
   0x2   :  { %s693_s13 = smov 0  }
   0x3 LB: > { %s21_s14 = sadd.s32 1, %s663_s12  ;;  %p64_p1 = scmp.ne.s32.totalorder %s655_s10, %s651_s9  ;;  %s667_s13 = sphi %s693_s13, %s12_s13   ;;  %s663_s12 = sphi %s691_s12, %s777_s12   ;;  %s659_s11 = sphi %s689_s11, %s776_s11   ;;  %s655_s10 = sphi %s687_s10, %s775_s10   ;;  %s651_s9 = sphi %s685_s9, %s774_s9  }
   0x4   : > { %p22_p0 = scmp.ge.s32.totalorder %s21_s14, 2  ;;  %p65_p2 = scmp.eq.s32.totalorder %s667_s13, 0 }
   0x5   : > { %s57_s16 = sadd.s32 1, %s655_s10  ;;  %p535_p5 = scmp.ge.s32.totalorder %s667_s13, 2 }
   0x6   : > { %s779_s14 = smov (%p22_p0, %s21_s14), 0  ;;  %p66_p3 = por %p65_p2, %p64_p1 }
   0x7   : > { %s54_s15 = ssub.s32 %s663_s12, %s779_s14  ;;  %125 = sbr.rel (%p535_p5) target bundleno = 24 (0x18), region = 20 }
   0x8   : > { %p55_p4 = scmp.eq.s32.totalorder %s54_s15, 0 }
   0xa   : > { %s720_s17 = scalar_select %p55_p4, %s655_s10, %s57_s16  }
   0xc   : > { %128 = sbr.rel (!%p66_p3) target bundleno = 24 (0x18), region = 24  ;;  %s130_s18 = sand.u32 (%p66_p3), 1, %s655_s10  }
   0xd   : > { %s562_s19 = sshll.u32 (%p66_p3), %s663_s12, 3  ;;  %s536_s20 = sshll.u32 (%p66_p3), %s130_s18, 7 }
   0xe   : > { %s728_s23 = scalar_lea.vmem (%p66_p3), %s772_s1, %s562_s19  ;;  %s132_s24 = scalar_lea.vmem (%p66_p3), [#allocation2], %s536_s20 }
   0xf   : > { %v194_v0 = vld [vmem:[%s728_s23] sm:$0xff] (%p66_p3)  ;;  %v196_v1 = vld [vmem:[%s728_s23 + $0x10] sm:$0xff] (%p66_p3) }
  0x10   : > { %v198_v2 = vld [vmem:[%s728_s23 + $0x20] sm:$0xff] (%p66_p3)  ;;  %195 = vst [vmem:[%s132_s24] sm:$0xff] (%p66_p3), %v194_v0  ;;  %197 = vst [vmem:[%s132_s24 + $0x8] sm:$0xff] (%p66_p3), %v196_v1  ;;  %v200_v3 = vld [vmem:[%s728_s23 + $0x30] sm:$0xff] (%p66_p3) }
  0x11   : > { %199 = vst [vmem:[%s132_s24 + $0x10] sm:$0xff] %v198_v2  ;;  %v202_v4 = vld [vmem:[%s728_s23 + $0x40] sm:$0xff]  ;;  %v204_v5 = vld [vmem:[%s728_s23 + $0x50] sm:$0xff]  ;;  %201 = vst [vmem:[%s132_s24 + $0x18] sm:$0xff] %v200_v3 }
  0x12   : > { %203 = vst [vmem:[%s132_s24 + $0x20] sm:$0xff] %v202_v4  ;;  %205 = vst [vmem:[%s132_s24 + $0x28] sm:$0xff] %v204_v5  ;;  %v206_v6 = vld [vmem:[%s728_s23 + $0x60] sm:$0xff]  ;;  %v208_v7 = vld [vmem:[%s728_s23 + $0x70] sm:$0xff] }
  0x13   : > { %v210_v8 = vld [vmem:[%s728_s23 + $0x80] sm:$0xff]  ;;  %207 = vst [vmem:[%s132_s24 + $0x30] sm:$0xff] %v206_v6  ;;  %209 = vst [vmem:[%s132_s24 + $0x38] sm:$0xff] %v208_v7  ;;  %v212_v9 = vld [vmem:[%s728_s23 + $0x90] sm:$0xff] }
  0x14   : > { %211 = vst [vmem:[%s132_s24 + $0x40] sm:$0xff] %v210_v8  ;;  %v214_v10 = vld [vmem:[%s728_s23 + $0xa0] sm:$0xff]  ;;  %v216_v11 = vld [vmem:[%s728_s23 + $0xb0] sm:$0xff]  ;;  %213 = vst [vmem:[%s132_s24 + $0x48] sm:$0xff] %v212_v9 }
  0x15   : > { %215 = vst [vmem:[%s132_s24 + $0x50] sm:$0xff] %v214_v10  ;;  %217 = vst [vmem:[%s132_s24 + $0x58] sm:$0xff] %v216_v11  ;;  %v218_v12 = vld [vmem:[%s728_s23 + $0xc0] sm:$0xff]  ;;  %v220_v13 = vld [vmem:[%s728_s23 + $0xd0] sm:$0xff] }
  0x16   : > { %v222_v14 = vld [vmem:[%s728_s23 + $0xe0] sm:$0xff]  ;;  %219 = vst [vmem:[%s132_s24 + $0x60] sm:$0xff] %v218_v12  ;;  %221 = vst [vmem:[%s132_s24 + $0x68] sm:$0xff] %v220_v13  ;;  %v224_v15 = vld [vmem:[%s728_s23 + $0xf0] sm:$0xff] }
  0x17   : > { %223 = vst [vmem:[%s132_s24 + $0x70] sm:$0xff] %v222_v14  ;;  %225 = vst [vmem:[%s132_s24 + $0x78] sm:$0xff] %v224_v15 }
  0x18 PF: > { %p539_p6 = scmp.ge.s32.totalorder %s667_s13, 1  ;;  %p230_p7 = scmp.lt.s32.totalorder %s667_s13, 3 }
  0x1a   : > { %p231_p8 = pnand %p539_p6, %p230_p7 }
  0x1b   : > { %s237_s25 = sand.u32 (!%p231_p8), 1, %s651_s9   ;;  %s541_s30 = sshll.u32 (!%p231_p8), %s659_s11, 1 }
  0x1c   : > { %234 = sbr.rel (%p231_p8) target bundleno = 265 (0x109), region = 62  ;;  %s540_s26 = sshll.u32 (!%p231_p8), %s237_s25, 7 }
  0x1d   : > { %s239_s27 = scalar_lea.vmem (!%p231_p8), [#allocation2], %s540_s26  ;;  %p274_p9 = scmp.lt.s32.totalorder (!%p231_p8), %s541_s30, 3 }
  0x21   : > { %v669_v16 = vmov 0   ;;  %v605_v17 = vld [vmem:[%s239_s27 + $0x74] ss:$8 sps:$4 sm:$0xff]   ;;  %v607_v18 = vld [vmem:[%s239_s27 + $0x70] ss:$8 sps:$4 sm:$0xff]   ;;  %s781_s30 = smov (!%p274_p9, %s541_s30), 3 }
  0x22   : > { %411 = vmatprep.mubr.bf16.mxu0 %v669_v16  ;;  %379 = vmatprep.subr.bf16.mxu0 %v605_v17  ;;  %v608_v19 = vld [vmem:[%s239_s27 + $0x64] ss:$8 sps:$4 sm:$0xff]   ;;  %v610_v20 = vld [vmem:[%s239_s27 + $0x60] ss:$8 sps:$4 sm:$0xff]   ;;  %v611_v21 = vld [vmem:[%s239_s27 + $0x54] ss:$8 sps:$4 sm:$0xff]  }
  0x23   : > { %380 = vmatpush1.bf16.msra.mxu0 %v607_v18  ;;  %v613_v22 = vld [vmem:[%s239_s27 + $0x50] ss:$8 sps:$4 sm:$0xff]   ;;  %v614_v23 = vld [vmem:[%s239_s27 + $0x44] ss:$8 sps:$4 sm:$0xff]   ;;  %v616_v24 = vld [vmem:[%s239_s27 + $0x40] ss:$8 sps:$4 sm:$0xff]  }
  0x24   : > { %381 = vmatprep.subr.bf16.mxu0 %v608_v19  ;;  %v617_v25 = vld [vmem:[%s239_s27 + $0x34] ss:$8 sps:$4 sm:$0xff]   ;;  %v619_v26 = vld [vmem:[%s239_s27 + $0x30] ss:$8 sps:$4 sm:$0xff]   ;;  %v620_v27 = vld [vmem:[%s239_s27 + $0x24] ss:$8 sps:$4 sm:$0xff]  }
  0x25   : > { %v622_v28 = vld [vmem:[%s239_s27 + $0x20] ss:$8 sps:$4 sm:$0xff]   ;;  %v623_v29 = vld [vmem:[%s239_s27 + $0x14] ss:$8 sps:$4 sm:$0xff]   ;;  %v625_v30 = vld [vmem:[%s239_s27 + $0x10] ss:$8 sps:$4 sm:$0xff]  }
  0x26   : > { %v626_v31 = vld [vmem:[%s239_s27 + $0x4] ss:$8 sps:$4 sm:$0xff]   ;;  %v628_v32 = vld [vmem:[%s239_s27] ss:$8 sps:$4 sm:$0xff]   ;;  %s542_s3 = sshll.u32 %s781_s30, 2 }
  0x27   : > { %382 = vmatpush1.bf16.msra.mxu0 %v610_v20  ;;  %v282_v33 = vld [vmem:[%s771_s0] sm:$0xf]  ;;  %s279_s6 = scalar_lea.vmem %s773_s2, %s542_s3 }
  0x28   : > { %383 = vmatprep.subr.bf16.mxu0 %v611_v21 }
  0x2b   : > { %384 = vmatpush1.bf16.msra.mxu0 %v613_v22 }
  0x2c   : > { %385 = vmatprep.subr.bf16.mxu0 %v614_v23 }
  0x2f   : > { %386 = vmatpush1.bf16.msra.mxu0 %v616_v24 }
  0x30   : > { %387 = vmatprep.subr.bf16.mxu0 %v617_v25 }
  0x33   : > { %388 = vmatpush1.bf16.msra.mxu0 %v619_v26 }
  0x34   : > { %389 = vmatprep.subr.bf16.mxu0 %v620_v27 }
  0x37   : > { %390 = vmatpush1.bf16.msra.mxu0 %v622_v28 }
  0x38   : > { %391 = vmatprep.subr.bf16.mxu0 %v623_v29 }
  0x3b   : > { %392 = vmatpush1.bf16.msra.mxu0 %v625_v30 }
  0x3c   : > { %393 = vmatprep.subr.bf16.mxu0 %v626_v31 }
  0x3f   : > { %394 = vmatpush1.bf16.msra.mxu0 %v628_v32 }
  0x42   : > { %412 = vmatmul.mubr.bf16.vlgmr.msra.gmra.mxu0 %v282_v33 }
 0x102   : > { %v413_v34 = vpop.f32.mrf.mxu0 }
 0x104   : > { %v415_v35 = vpop.f32.mrf.mxu0 }
 0x105   : > { %v563_v36 = vpack.c.bf16 %v415_v35, %v413_v34 }
 0x106   : > { %v417_v37 = vpop.f32.mrf.mxu0 }
 0x107   : > { %428 = vst [vmem:[%s279_s6] sm:$0xff] %v563_v36 }
 0x108   : > { %v418_v38 = vpop.f32.mrf.mxu0 }
 0x109 PF: > { %s12_s13 = sadd.s32 1, %s667_s13   ;;  %s774_s9 = smov %s655_s10 }
 0x10a   : > { %p9_p10 = scmp.ge.s32.totalorder %s12_s13, 4   ;;  %s775_s10 = smov %s720_s17 }
 0x10b   : > { %s776_s11 = smov %s663_s12  ;;  %s777_s12 = smov %s779_s14 }
 0x10c   :  { %11 = sbr.rel (!%p9_p10) target bundleno = 3 (0x3), region = 104 }

// kernel: forward.49
= control target key start
LH: loop header
LB: loop body
LE: loop exit
PB: predicated region body
PF: predicated region fallthrough
CT: control target
= control target key end

     0   :  { %s696_s9 = smov 0   ;;  %s698_s10 = smov 0   ;;  %s782_s0 = inlined_call_operand.vmem [shape: bf16[8,128], index: 0, kind: input, shape index: {}]   ;;  %s783_s1 = inlined_call_operand.vmem [shape: bf16[128,512], index: 1, kind: input, shape index: {}]   ;;  %s784_s2 = inlined_call_operand.vmem [shape: f32[8,512], index: 2, kind: output, shape index: {}]  }
   0x1   :  { %s700_s11 = smov 0   ;;  %s702_s12 = smov 0  }
   0x2   :  { %s704_s13 = smov 0  }
   0x3 LB: > { %s21_s14 = sadd.s32 1, %s674_s12  ;;  %p64_p1 = scmp.ne.s32.totalorder %s666_s10, %s662_s9  ;;  %s678_s13 = sphi %s704_s13, %s12_s13   ;;  %s674_s12 = sphi %s702_s12, %s788_s12   ;;  %s670_s11 = sphi %s700_s11, %s787_s11   ;;  %s666_s10 = sphi %s698_s10, %s786_s10   ;;  %s662_s9 = sphi %s696_s9, %s785_s9  }
   0x4   : > { %p22_p0 = scmp.ge.s32.totalorder %s21_s14, 2  ;;  %p65_p2 = scmp.eq.s32.totalorder %s678_s13, 0 }
   0x5   : > { %s57_s16 = sadd.s32 1, %s666_s10  ;;  %p540_p5 = scmp.ge.s32.totalorder %s678_s13, 2 }
   0x6   : > { %s790_s14 = smov (%p22_p0, %s21_s14), 0  ;;  %p66_p3 = por %p65_p2, %p64_p1 }
   0x7   : > { %s54_s15 = ssub.s32 %s674_s12, %s790_s14  ;;  %125 = sbr.rel (%p540_p5) target bundleno = 24 (0x18), region = 20 }
   0x8   : > { %p55_p4 = scmp.eq.s32.totalorder %s54_s15, 0 }
   0xa   : > { %s731_s17 = scalar_select %p55_p4, %s666_s10, %s57_s16  }
   0xc   : > { %128 = sbr.rel (!%p66_p3) target bundleno = 24 (0x18), region = 24  ;;  %s130_s18 = sand.u32 (%p66_p3), 1, %s666_s10  }
   0xd   : > { %s566_s19 = sshll.u32 (%p66_p3), %s674_s12, 3  ;;  %s541_s20 = sshll.u32 (%p66_p3), %s130_s18, 7 }
   0xe   : > { %s739_s23 = scalar_lea.vmem (%p66_p3), %s783_s1, %s566_s19  ;;  %s132_s24 = scalar_lea.vmem (%p66_p3), [#allocation2], %s541_s20 }
   0xf   : > { %v194_v0 = vld [vmem:[%s739_s23] sm:$0xff] (%p66_p3)  ;;  %v196_v1 = vld [vmem:[%s739_s23 + $0x10] sm:$0xff] (%p66_p3) }
  0x10   : > { %v198_v2 = vld [vmem:[%s739_s23 + $0x20] sm:$0xff] (%p66_p3)  ;;  %195 = vst [vmem:[%s132_s24] sm:$0xff] (%p66_p3), %v194_v0  ;;  %197 = vst [vmem:[%s132_s24 + $0x8] sm:$0xff] (%p66_p3), %v196_v1  ;;  %v200_v3 = vld [vmem:[%s739_s23 + $0x30] sm:$0xff] (%p66_p3) }
  0x11   : > { %199 = vst [vmem:[%s132_s24 + $0x10] sm:$0xff] %v198_v2  ;;  %v202_v4 = vld [vmem:[%s739_s23 + $0x40] sm:$0xff]  ;;  %v204_v5 = vld [vmem:[%s739_s23 + $0x50] sm:$0xff]  ;;  %201 = vst [vmem:[%s132_s24 + $0x18] sm:$0xff] %v200_v3 }
  0x12   : > { %203 = vst [vmem:[%s132_s24 + $0x20] sm:$0xff] %v202_v4  ;;  %205 = vst [vmem:[%s132_s24 + $0x28] sm:$0xff] %v204_v5  ;;  %v206_v6 = vld [vmem:[%s739_s23 + $0x60] sm:$0xff]  ;;  %v208_v7 = vld [vmem:[%s739_s23 + $0x70] sm:$0xff] }
  0x13   : > { %v210_v8 = vld [vmem:[%s739_s23 + $0x80] sm:$0xff]  ;;  %207 = vst [vmem:[%s132_s24 + $0x30] sm:$0xff] %v206_v6  ;;  %209 = vst [vmem:[%s132_s24 + $0x38] sm:$0xff] %v208_v7  ;;  %v212_v9 = vld [vmem:[%s739_s23 + $0x90] sm:$0xff] }
  0x14   : > { %211 = vst [vmem:[%s132_s24 + $0x40] sm:$0xff] %v210_v8  ;;  %v214_v10 = vld [vmem:[%s739_s23 + $0xa0] sm:$0xff]  ;;  %v216_v11 = vld [vmem:[%s739_s23 + $0xb0] sm:$0xff]  ;;  %213 = vst [vmem:[%s132_s24 + $0x48] sm:$0xff] %v212_v9 }
  0x15   : > { %215 = vst [vmem:[%s132_s24 + $0x50] sm:$0xff] %v214_v10  ;;  %217 = vst [vmem:[%s132_s24 + $0x58] sm:$0xff] %v216_v11  ;;  %v218_v12 = vld [vmem:[%s739_s23 + $0xc0] sm:$0xff]  ;;  %v220_v13 = vld [vmem:[%s739_s23 + $0xd0] sm:$0xff] }
  0x16   : > { %v222_v14 = vld [vmem:[%s739_s23 + $0xe0] sm:$0xff]  ;;  %219 = vst [vmem:[%s132_s24 + $0x60] sm:$0xff] %v218_v12  ;;  %221 = vst [vmem:[%s132_s24 + $0x68] sm:$0xff] %v220_v13  ;;  %v224_v15 = vld [vmem:[%s739_s23 + $0xf0] sm:$0xff] }
  0x17   : > { %223 = vst [vmem:[%s132_s24 + $0x70] sm:$0xff] %v222_v14  ;;  %225 = vst [vmem:[%s132_s24 + $0x78] sm:$0xff] %v224_v15 }
  0x18 PF: > { %p544_p6 = scmp.ge.s32.totalorder %s678_s13, 1  ;;  %p230_p7 = scmp.lt.s32.totalorder %s678_s13, 3 }
  0x1a   : > { %p231_p8 = pnand %p544_p6, %p230_p7 }
  0x1b   : > { %s237_s25 = sand.u32 (!%p231_p8), 1, %s662_s9   ;;  %s546_s30 = sshll.u32 (!%p231_p8), %s670_s11, 1 }
  0x1c   : > { %234 = sbr.rel (%p231_p8) target bundleno = 296 (0x128), region = 62  ;;  %s545_s26 = sshll.u32 (!%p231_p8), %s237_s25, 7 }
  0x1d   : > { %s239_s27 = scalar_lea.vmem (!%p231_p8), [#allocation2], %s545_s26  ;;  %p274_p9 = scmp.lt.s32.totalorder (!%p231_p8), %s546_s30, 3 }
  0x21   : > { %v680_v16 = vmov 0   ;;  %v608_v17 = vld [vmem:[%s239_s27 + $0x74] ss:$8 sps:$4 sm:$0xff]   ;;  %v610_v18 = vld [vmem:[%s239_s27 + $0x70] ss:$8 sps:$4 sm:$0xff]   ;;  %s792_s30 = smov (!%p274_p9, %s546_s30), 3 }
  0x22   : > { %411 = vmatprep.mubr.bf16.mxu0 %v680_v16  ;;  %379 = vmatprep.subr.bf16.mxu0 %v608_v17  ;;  %v611_v19 = vld [vmem:[%s239_s27 + $0x64] ss:$8 sps:$4 sm:$0xff]   ;;  %v613_v20 = vld [vmem:[%s239_s27 + $0x60] ss:$8 sps:$4 sm:$0xff]   ;;  %v614_v21 = vld [vmem:[%s239_s27 + $0x54] ss:$8 sps:$4 sm:$0xff]  }
  0x23   : > { %380 = vmatpush1.bf16.msra.mxu0 %v610_v18  ;;  %v616_v22 = vld [vmem:[%s239_s27 + $0x50] ss:$8 sps:$4 sm:$0xff]   ;;  %v617_v23 = vld [vmem:[%s239_s27 + $0x44] ss:$8 sps:$4 sm:$0xff]   ;;  %v619_v24 = vld [vmem:[%s239_s27 + $0x40] ss:$8 sps:$4 sm:$0xff]  }
  0x24   : > { %381 = vmatprep.subr.bf16.mxu0 %v611_v19  ;;  %v620_v25 = vld [vmem:[%s239_s27 + $0x34] ss:$8 sps:$4 sm:$0xff]   ;;  %v622_v26 = vld [vmem:[%s239_s27 + $0x30] ss:$8 sps:$4 sm:$0xff]   ;;  %v623_v27 = vld [vmem:[%s239_s27 + $0x24] ss:$8 sps:$4 sm:$0xff]  }
  0x25   : > { %v625_v28 = vld [vmem:[%s239_s27 + $0x20] ss:$8 sps:$4 sm:$0xff]   ;;  %v626_v29 = vld [vmem:[%s239_s27 + $0x14] ss:$8 sps:$4 sm:$0xff]   ;;  %v628_v30 = vld [vmem:[%s239_s27 + $0x10] ss:$8 sps:$4 sm:$0xff]  }
  0x26   : > { %v629_v31 = vld [vmem:[%s239_s27 + $0x4] ss:$8 sps:$4 sm:$0xff]   ;;  %v631_v32 = vld [vmem:[%s239_s27] ss:$8 sps:$4 sm:$0xff]   ;;  %s547_s3 = sshll.u32 %s792_s30, 3 }
  0x27   : > { %382 = vmatpush1.bf16.msra.mxu0 %v613_v20  ;;  %v282_v33 = vld [vmem:[%s782_s0] sm:$0xf]  ;;  %s279_s6 = scalar_lea.vmem %s784_s2, %s547_s3 }
  0x28   : > { %383 = vmatprep.subr.bf16.mxu0 %v614_v21 }
  0x2b   : > { %384 = vmatpush1.bf16.msra.mxu0 %v616_v22 }
  0x2c   : > { %385 = vmatprep.subr.bf16.mxu0 %v617_v23 }
  0x2f   : > { %386 = vmatpush1.bf16.msra.mxu0 %v619_v24 }
  0x30   : > { %387 = vmatprep.subr.bf16.mxu0 %v620_v25 }
  0x33   : > { %388 = vmatpush1.bf16.msra.mxu0 %v622_v26 }
  0x34   : > { %389 = vmatprep.subr.bf16.mxu0 %v623_v27 }
  0x37   : > { %390 = vmatpush1.bf16.msra.mxu0 %v625_v28 }
  0x38   : > { %391 = vmatprep.subr.bf16.mxu0 %v626_v29 }
  0x3b   : > { %392 = vmatpush1.bf16.msra.mxu0 %v628_v30 }
  0x3c   : > { %393 = vmatprep.subr.bf16.mxu0 %v629_v31 }
  0x3f   : > { %394 = vmatpush1.bf16.msra.mxu0 %v631_v32 }
  0x42   : > { %412 = vmatmul.mubr.bf16.vlgmr.msra.gmra.mxu0 %v282_v33 }
 0x102   : > { %v413_v34 = vpop.f32.mrf.mxu0 }
 0x103   : > { %v420_v35 = vsub.f32 0.0, %v413_v34 }
 0x104   : > { %v415_v36 = vpop.f32.mrf.mxu0 }
 0x105   : > { %v422_v37 = vmul.f32 1.442695, %v420_v35  ;;  %v421_v38 = vsub.f32 0.0, %v415_v36 }
 0x106   : > { %v417_v39 = vpop.f32.mrf.mxu0 }
 0x107   : > { %632 = vpow2.f32 %v422_v37  ;;  %v424_v40 = vmul.f32 1.442695, %v421_v38 }
 0x108   : > { %v418_v41 = vpop.f32.mrf.mxu0 }
 0x109   : > { %634 = vpow2.f32 %v424_v40 }
 0x114   : > { %v633_v42 = vpop.eup %632 }
 0x115   : > { %v426_v43 = vadd.f32 1.0, %v633_v42 }
 0x116   : > { %v635_v44 = vpop.eup %634 }
 0x117   : > { %636 = vrcp.f32 %v426_v43  ;;  %v427_v45 = vadd.f32 1.0, %v635_v44 }
 0x119   : > { %638 = vrcp.f32 %v427_v45 }
 0x124   : > { %v637_v46 = vpop.eup %636 }
 0x125   : > { %432 = vst [vmem:[%s279_s6] sm:$0xff] %v637_v46 }
 0x126   : > { %v639_v47 = vpop.eup %638 }
 0x127   : > { %433 = vst [vmem:[%s279_s6 + $0x8] sm:$0xff] %v639_v47 }
 0x128 PF: > { %s12_s13 = sadd.s32 1, %s678_s13   ;;  %s785_s9 = smov %s666_s10 }
 0x129   : > { %p9_p10 = scmp.ge.s32.totalorder %s12_s13, 4   ;;  %s786_s10 = smov %s731_s17 }
 0x12a   : > { %s787_s11 = smov %s674_s12  ;;  %s788_s12 = smov %s790_s14 }
 0x12b   :  { %11 = sbr.rel (!%p9_p10) target bundleno = 3 (0x3), region = 104 }

</bundles_post_ra>
